<compile_context>
chip_gen: v5e
topology: v5e:2x2
jax: 0.10.0
libtpu: 0.0.40
codegen_flags: <defaults>
</compile_context>

<pallas_src>
import functools

import numpy as np
import jax
import jax.numpy as jnp
from jax.experimental import pallas as pl
from jax.experimental.pallas import tpu as pltpu

LANES = 128
GROUP = 32                    # accumulator sublane rows (4 independent f32 vregs)
MAX_TILE_ROWS = 4096          # ~2 MiB / input / buffer at f32
MIN_STEPS_PER_CORE = 3        # keep the DMA pipeline primed
SMALL_FALLBACK_ELEMS = 32 * 1024   # below this, plain XLA fusion wins


def _cdiv(a, b):
    return -(-a // b)


def _round_up(x, m):
    return _cdiv(x, m) * m


def _core_layout():
    """(num_cores, leading-axis dimension semantics).

    Only v7x exposes two TensorCores to one Pallas program; there CORE_PARALLEL
    is required for the split (plain "parallel" measurably changes nothing).
    Everything else gets a trivial size-1 core axis."""
    try:
        kind = jax.devices()[0].device_kind.lower()
    except Exception:
        kind = ""
    if "v7" in kind or "7x" in kind:
        return 2, pltpu.CORE_PARALLEL
    return 1, pltpu.PARALLEL


def _choose_tile(rows, num_cores):
    per_core = _cdiv(rows, num_cores)
    tile = min(MAX_TILE_ROWS,
               _round_up(_cdiv(per_core, MIN_STEPS_PER_CORE), GROUP))
    tile = max(tile, GROUP)
    steps = _cdiv(per_core, tile)        # grid steps per core
    nblocks = _cdiv(rows, tile)          # blocks that actually exist in HBM
    return tile, steps, nblocks


@functools.lru_cache(maxsize=None)
def _make_loss_asym_kernel(tile_rows, steps, rows, needs_mask):
    def kernel(den_ref, ref_ref, noi_ref, mv_ref, acc_ref):
        c = pl.program_id(0)
        i = pl.program_id(1)

        @pl.when(i == 0)
        def _():
            acc_ref[...] = jnp.zeros_like(acc_ref)

        d = den_ref[...].astype(jnp.float32)
        r = ref_ref[...].astype(jnp.float32)
        n = noi_ref[...].astype(jnp.float32)
        mv = mv_ref[...].astype(jnp.float32)

        # weight = 1 + 10*gate*mvmask == where(gate & mvmask, 11, 1) with
        # gate = ((r - n)*(d - r) > 0).  t = d - r is reused for |t| (one vsub
        # saved per element vs computing (r - d) separately).
        t = d - r
        hot = ((r - n) * t > 0.0) & (jnp.abs(mv) < 1.0)
        l1 = jnp.abs(t) * jnp.where(hot, jnp.float32(11.0), jnp.float32(1.0))

        if needs_mask:
            # Zero rows of a partial edge block (and of a duplicated clamp
            # block on the 2-core split) so they contribute exactly 0.
            row0 = (c * steps + i) * tile_rows
            local = jax.lax.broadcasted_iota(jnp.int32, (tile_rows, 1), 0)
            l1 = jnp.where(row0 + local < rows, l1, 0.0)

        # Per-(sublane, lane) partial sums.  The (., GROUP, 128) split is
        # (8,128)-tile aligned (GROUP % 8 == 0) so the reshape is a free view;
        # GROUP/8 = 4 independent accumulation chains keep VALU latency off the
        # critical path.  Cross-lane reduction is deferred to the wrapper.
        acc_ref[...] += jnp.sum(
            l1.reshape(tile_rows // GROUP, GROUP, LANES), axis=0)

    return kernel


def _loss_asym_jnp(denoise, reference, noise, traMV):
    """Pure-jnp reference / small-input fallback (matches the PyTorch module)."""
    d = denoise.astype(jnp.float32)
    r = reference.astype(jnp.float32)
    n = noise.astype(jnp.float32)
    mv = traMV.astype(jnp.float32)
    gate = jnp.where((r - n) * (d - r) <= -0.0, 0.0, 1.0)
    mvm = jnp.where(jnp.abs(mv) < 1.0, 1.0, 0.0)
    weight = 1.0 + 10.0 * gate * mvm
    return jnp.mean(jnp.abs(r - d) * weight)


def loss_asym(denoise, reference, noise, traMV):
    """Scalar loss = mean(|reference - denoise| * (1 + 10 * gate * mv_mask))."""
    assert denoise.shape == reference.shape == noise.shape == traMV.shape
    total = int(np.prod(denoise.shape))

    if total < SMALL_FALLBACK_ELEMS:
        # Kernel-launch / DMA setup overhead dominates; let XLA fuse it.
        return _loss_asym_jnp(denoise, reference, noise, traMV)

    num_cores, core_sem = _core_layout()
    rows = _cdiv(total, LANES)
    tile_rows, steps, nblocks = _choose_tile(rows, num_cores)
    # Mask needed whenever the grid's row coverage exceeds the true row count.
    needs_mask = (num_cores * steps * tile_rows != rows)

    def prep(a):
        if a.dtype.name not in ("float32", "bfloat16", "float16"):
            a = a.astype(jnp.float32)   # keep bf16/f16 native -> half HBM bytes
        flat = a.reshape(-1)
        if total != rows * LANES:
            # TODO(synk): only taken when numel % 128 != 0 (one small pad copy);
            # padded zeros contribute exactly 0 to the weighted-L1 sum.
            flat = jnp.pad(flat, (0, rows * LANES - total))
        return flat.reshape(rows, LANES)

    inputs = [prep(denoise), prep(reference), prep(noise), prep(traMV)]

    if num_cores * steps > nblocks:
        # Grid covers more blocks than exist (only possible on the 2-core
        # split): clamp the DMA source; the duplicate block's contribution is
        # zeroed by the in-kernel row mask.
        def in_map(c, i):
            return (jnp.minimum(c * steps + i, nblocks - 1), 0)
    else:
        def in_map(c, i):
            return (c * steps + i, 0)

    in_spec = pl.BlockSpec((tile_rows, LANES), in_map)

    # Derive the scoped-VMEM limit from the actual double-buffered tile bytes
    # (v5e default is only 16 MiB) and leave headroom; stays well under 64 MiB.
    vmem_limit = sum(2 * tile_rows * LANES * x.dtype.itemsize for x in inputs)
    vmem_limit = max(int(vmem_limit) + (4 << 20), 16 << 20)

    partials = pl.pallas_call(
        _make_loss_asym_kernel(tile_rows, steps, rows, needs_mask),
        out_shape=jax.ShapeDtypeStruct((num_cores, GROUP, LANES), jnp.float32),
        grid=(num_cores, steps),
        in_specs=[in_spec] * 4,
        out_specs=pl.BlockSpec((None, GROUP, LANES), lambda c, i: (c, 0, 0)),
        compiler_params=pltpu.CompilerParams(
            dimension_semantics=(core_sem, pltpu.ARBITRARY),
            vmem_limit_bytes=vmem_limit),
    )(*inputs)

    return jnp.sum(partials) / jnp.float32(total)


if __name__ == "__main__":
    key = jax.random.PRNGKey(0)
    cases = [
        ((2, 4, 16, 16), jnp.float32),     # tiny -> plain-XLA fallback path
        ((1, 3, 180, 320), jnp.float32),   # Pallas: partial edge-block masking
        ((1, 3, 120, 120), jnp.float32),   # Pallas: numel % 128 != 0 lane pad
        ((1, 3, 180, 320), jnp.bfloat16),  # Pallas: native bf16 streaming
    ]
    for shape, dtype in cases:
        key, k1, k2, k3, k4 = jax.random.split(key, 5)
        den = jax.random.normal(k1, shape, dtype=jnp.float32)
        ref = jax.random.normal(k2, shape, dtype=jnp.float32)
        noi = jax.random.normal(k3, shape, dtype=jnp.float32)
        mv = 2.0 * jax.random.normal(k4, shape, dtype=jnp.float32)
        den, ref, noi, mv = (x.astype(dtype) for x in (den, ref, noi, mv))

        got = jax.block_until_ready(loss_asym(den, ref, noi, mv))
        want = _loss_asym_jnp(den.astype(jnp.float32), ref.astype(jnp.float32),
                              noi.astype(jnp.float32), mv.astype(jnp.float32))
        np.testing.assert_allclose(np.asarray(got), np.asarray(want),
                                   rtol=1e-5, atol=1e-5)
    print("KERNEL_OK")
</pallas_src>

<mosaic_0001>
module attributes {stable_mosaic.version = 11 : i64} {
  func.func @kernel(%arg0: i32, %arg1: i32, %arg2: memref<480x128xf32, #tpu.memory_space<vmem>>, %arg3: memref<480x128xf32, #tpu.memory_space<vmem>>, %arg4: memref<480x128xf32, #tpu.memory_space<vmem>>, %arg5: memref<480x128xf32, #tpu.memory_space<vmem>>, %arg6: memref<1x32x128xf32, #tpu.memory_space<vmem>>) attributes {dimension_semantics = [#tpu.dimension_semantics<parallel>, #tpu.dimension_semantics<arbitrary>], iteration_bounds = array<i64: 1, 3>, scalar_prefetch = 0 : i64, scratch_operands = 0 : i64, tpu.core_type = #tpu.core_type<tc>, window_params = [{transform_indices = @transform_0, window_bounds = array<i64: 480, 128>}, {transform_indices = @transform_1, window_bounds = array<i64: 480, 128>}, {transform_indices = @transform_2, window_bounds = array<i64: 480, 128>}, {transform_indices = @transform_3, window_bounds = array<i64: 480, 128>}, {transform_indices = @transform_4, window_bounds = array<i64: 1, 32, 128>}]} {
    %c0_i32 = arith.constant 0 : i32
    %0 = arith.cmpi eq, %arg1, %c0_i32 : i32
    %1 = arith.extui %0 : i1 to i32
    %c0_i32_0 = arith.constant 0 : i32
    %2 = arith.cmpi ne, %1, %c0_i32_0 : i32
    scf.if %2 {
      %cst_19 = arith.constant 0.000000e+00 : f32
      %41 = vector.broadcast %cst_19 : f32 to vector<32x128xf32>
      %c0_20 = arith.constant 0 : index
      %c0_21 = arith.constant 0 : index
      %c0_22 = arith.constant 0 : index
      %42 = vector.load %arg6[%c0_20, %c0_21, %c0_22] : memref<1x32x128xf32, #tpu.memory_space<vmem>>, vector<1x32x128xf32>
      %43 = vector.shape_cast %42 : vector<1x32x128xf32> to vector<32x128xf32>
      %44 = vector.shape_cast %41 : vector<32x128xf32> to vector<1x32x128xf32>
      tpu.vector_store %arg6[%c0_20, %c0_21, %c0_22], %44 {strides = array<i32>} : memref<1x32x128xf32, #tpu.memory_space<vmem>>, vector<1x32x128xf32>,
    } else {
    }
    %c0 = arith.constant 0 : index
    %c0_1 = arith.constant 0 : index
    %3 = vector.load %arg2[%c0, %c0_1] : memref<480x128xf32, #tpu.memory_space<vmem>>, vector<480x128xf32>
    %c0_2 = arith.constant 0 : index
    %c0_3 = arith.constant 0 : index
    %4 = vector.load %arg3[%c0_2, %c0_3] : memref<480x128xf32, #tpu.memory_space<vmem>>, vector<480x128xf32>
    %c0_4 = arith.constant 0 : index
    %c0_5 = arith.constant 0 : index
    %5 = vector.load %arg4[%c0_4, %c0_5] : memref<480x128xf32, #tpu.memory_space<vmem>>, vector<480x128xf32>
    %c0_6 = arith.constant 0 : index
    %c0_7 = arith.constant 0 : index
    %6 = vector.load %arg5[%c0_6, %c0_7] : memref<480x128xf32, #tpu.memory_space<vmem>>, vector<480x128xf32>
    %7 = arith.subf %3, %4 : vector<480x128xf32>
    %8 = arith.subf %4, %5 : vector<480x128xf32>
    %9 = arith.mulf %8, %7 : vector<480x128xf32>
    %cst = arith.constant 0.000000e+00 : f32
    %10 = vector.broadcast %cst : f32 to vector<480x128xf32>
    %11 = arith.cmpf ogt, %9, %10 : vector<480x128xf32>
    %12 = math.absf %6 : vector<480x128xf32>
    %cst_8 = arith.constant 1.000000e+00 : f32
    %13 = vector.broadcast %cst_8 : f32 to vector<480x128xf32>
    %14 = arith.cmpf olt, %12, %13 : vector<480x128xf32>
    %15 = arith.andi %11, %14 : vector<480x128xi1>
    %16 = math.absf %7 : vector<480x128xf32>
    %cst_9 = arith.constant 1.100000e+01 : f32
    %cst_10 = arith.constant 1.000000e+00 : f32
    %17 = vector.broadcast %cst_9 : f32 to vector<480x128xf32>
    %18 = vector.broadcast %cst_10 : f32 to vector<480x128xf32>
    %19 = arith.select %15, %17, %18 : vector<480x128xi1>, vector<480x128xf32>
    %20 = arith.mulf %16, %19 : vector<480x128xf32>
    %c3_i32 = arith.constant 3 : i32
    %21 = arith.muli %arg0, %c3_i32 : i32
    %22 = arith.addi %21, %arg1 : i32
    %c480_i32 = arith.constant 480 : i32
    %23 = arith.muli %22, %c480_i32 : i32
    %24 = tpu.iota {dimensions = array<i32: 0>} : vector<480x1xi32>
    %25 = vector.broadcast %23 : i32 to vector<480x1xi32>
    %26 = arith.addi %25, %24 : vector<480x1xi32>
    %c1350_i32 = arith.constant 1350 : i32
    %27 = vector.broadcast %c1350_i32 : i32 to vector<480x1xi32>
    %28 = arith.cmpi slt, %26, %27 : vector<480x1xi32>
    %cst_11 = arith.constant 0.000000e+00 : f32
    %29 = vector.shape_cast %28 : vector<480x1xi1> to vector<480x1xi1>
    %30 = vector.broadcast %29 : vector<480x1xi1> to vector<480x128xi1>
    %31 = vector.broadcast %cst_11 : f32 to vector<480x128xf32>
    %32 = arith.select %30, %20, %31 : vector<480x128xi1>, vector<480x128xf32>
    %c0_12 = arith.constant 0 : index
    %c0_13 = arith.constant 0 : index
    %c0_14 = arith.constant 0 : index
    %33 = vector.load %arg6[%c0_12, %c0_13, %c0_14] : memref<1x32x128xf32, #tpu.memory_space<vmem>>, vector<1x32x128xf32>
    %34 = vector.shape_cast %33 : vector<1x32x128xf32> to vector<32x128xf32>
    %35 = vector.shape_cast %32 : vector<480x128xf32> to vector<15x32x128xf32>
    %cst_15 = arith.constant dense<0.000000e+00> : vector<32x128xf32>
    %36 = vector.multi_reduction <add>, %35, %cst_15 [0] : vector<15x32x128xf32> to vector<32x128xf32>
    %37 = arith.addf %34, %36 : vector<32x128xf32>
    %c0_16 = arith.constant 0 : index
    %c0_17 = arith.constant 0 : index
    %c0_18 = arith.constant 0 : index
    %38 = vector.load %arg6[%c0_16, %c0_17, %c0_18] : memref<1x32x128xf32, #tpu.memory_space<vmem>>, vector<1x32x128xf32>
    %39 = vector.shape_cast %38 : vector<1x32x128xf32> to vector<32x128xf32>
    %40 = vector.shape_cast %37 : vector<32x128xf32> to vector<1x32x128xf32>
    tpu.vector_store %arg6[%c0_16, %c0_17, %c0_18], %40 {strides = array<i32>} : memref<1x32x128xf32, #tpu.memory_space<vmem>>, vector<1x32x128xf32>,
    return
  }
  func.func @transform_0(%arg0: i32, %arg1: i32) -> (i32, i32) {
    %c3_i32 = arith.constant 3 : i32
    %0 = arith.muli %arg0, %c3_i32 : i32
    %1 = arith.addi %0, %arg1 : i32
    %c0_i32 = arith.constant 0 : i32
    %c0_i32_0 = arith.constant 0 : i32
    return %1, %c0_i32 : i32, i32
  }
  func.func @transform_1(%arg0: i32, %arg1: i32) -> (i32, i32) {
    %c3_i32 = arith.constant 3 : i32
    %0 = arith.muli %arg0, %c3_i32 : i32
    %1 = arith.addi %0, %arg1 : i32
    %c0_i32 = arith.constant 0 : i32
    %c0_i32_0 = arith.constant 0 : i32
    return %1, %c0_i32 : i32, i32
  }
  func.func @transform_2(%arg0: i32, %arg1: i32) -> (i32, i32) {
    %c3_i32 = arith.constant 3 : i32
    %0 = arith.muli %arg0, %c3_i32 : i32
    %1 = arith.addi %0, %arg1 : i32
    %c0_i32 = arith.constant 0 : i32
    %c0_i32_0 = arith.constant 0 : i32
    return %1, %c0_i32 : i32, i32
  }
  func.func @transform_3(%arg0: i32, %arg1: i32) -> (i32, i32) {
    %c3_i32 = arith.constant 3 : i32
    %0 = arith.muli %arg0, %c3_i32 : i32
    %1 = arith.addi %0, %arg1 : i32
    %c0_i32 = arith.constant 0 : i32
    %c0_i32_0 = arith.constant 0 : i32
    return %1, %c0_i32 : i32, i32
  }
  func.func @transform_4(%arg0: i32, %arg1: i32) -> (i32, i32, i32) {
    %c0_i32 = arith.constant 0 : i32
    %c0_i32_0 = arith.constant 0 : i32
    %c0_i32_1 = arith.constant 0 : i32
    return %arg0, %c0_i32, %c0_i32_0 : i32, i32, i32
  }
}

</mosaic_0001>

<bundles_post_ra>
// kernel: tpu_custom_call.1
= control target key start
LH: loop header
LB: loop body
LE: loop exit
PB: predicated region body
PF: predicated region fallthrough
CT: control target
= control target key end

     0   :  { %9 = vsyncpa [#allocation3], 0  ;;  %s5882_s0 = inlined_call_operand.hbm [shape: f32[1350,128], index: 0, kind: input, shape index: {}]   ;;  %s5883_s1 = inlined_call_operand.hbm [shape: f32[1350,128], index: 1, kind: input, shape index: {}]   ;;  %s5884_s2 = inlined_call_operand.hbm [shape: f32[1350,128], index: 2, kind: input, shape index: {}]   ;;  %s5885_s3 = inlined_call_operand.hbm [shape: f32[1350,128], index: 3, kind: input, shape index: {}]   ;;  %s5886_s4 = inlined_call_operand.hbm [shape: f32[1,32,128], index: 4, kind: output, shape index: {}]  }
   0x1   :  { %11 = vsyncpa [#allocation3 + $0x1], 0 }
   0x2   :  { %12 = vsyncpa [#allocation6], 0 }
   0x3   :  { %14 = vsyncpa [#allocation6 + $0x1], 0 }
   0x4   :  { %15 = vsyncpa [#allocation9], 0 }
   0x5   :  { %17 = vsyncpa [#allocation9 + $0x1], 0 }
   0x6   :  { %18 = vsyncpa [#allocation4], 0  ;;  %s2255_s15 = smov 0   ;;  %s2257_s16 = smov 0  }
   0x7   :  { %s2259_s17 = smov 0   ;;  %s2261_s18 = smov 0  }
   0x8   :  { %s2263_s19 = smov 0   ;;  %s2265_s20 = smov 0  }
   0x9 LB: > { %s2284_s21 = sadd.s32 4294967295, %s2211_s20   ;;  %s33_s22 = sadd.s32 1, %s2207_s19  ;;  %s2211_s20 = sphi %s2265_s20, %s24_s20   ;;  %s2207_s19 = sphi %s2263_s19, %s7657_s19   ;;  %s2203_s18 = sphi %s2261_s18, %s7656_s18   ;;  %s2199_s17 = sphi %s2259_s17, %s7655_s17   ;;  %s2195_s16 = sphi %s2257_s16, %s7654_s16   ;;  %s2191_s15 = sphi %s2255_s15, %s7653_s15  }
   0xa   : > { %p34_p0 = scmp.ge.s32.totalorder %s33_s22, 3  ;;  %s47_s23 = sadd.s32 1, %s2199_s17 }
   0xb   : > { %p54_p1 = scmp.ne.s32.totalorder %s2199_s17, %s2195_s16  ;;  %p55_p2 = scmp.eq.s32.totalorder %s2211_s20, 0 }
   0xc   : > { %s7659_s22 = smov (%p34_p0, %s33_s22), 0  ;;  %p60_p4 = scmp.ne.s32.totalorder %s2195_s16, %s2191_s15 }
   0xd   : > { %p2293_p3 = por %p55_p2, %p54_p1  ;;  %s44_s25 = ssub.s32 %s2207_s19, %s7659_s22 }
   0xe   : > { %p61_p5 = scmp.eq.s32.totalorder %s2284_s21, 0  ;;  %p45_p6 = scmp.eq.s32.totalorder %s44_s25, 0 }
   0xf   : > { %p1858_p8 = scmp.ge.s32.totalorder %s2211_s20, 3 }
  0x10   : > { %p2301_p7 = por %p61_p5, %p60_p4 }
  0x11   : > { %s2306_s27 = scalar_select %p45_p6, %s2199_s17, %s47_s23  }
  0x12   : > { %196 = sbr.rel (%p1858_p8) target bundleno = 175 (0xaf), region = 16 }
  0x17   : > { %199 = sbr.rel (!%p2293_p3) target bundleno = 61 (0x3d), region = 20  ;;  %s200_s28 = sand.u32 (%p2293_p3), 1, %s2199_s17  }
  0x18   : > { %s207_s29 = smul.u32 (%p2293_p3), 60, %s2207_s19  ;;  %s2316_s9 = scalar_lea.sflag (%p2293_p3), [#allocation3], %s200_s28 }
  0x19   : > { %s1889_s30 = smul.u32 (%p2293_p3), 480, %s200_s28 }
  0x1a   : > { %s208_s5 = ssub.s32 (%p2293_p3), 169, %s207_s29 }
  0x1b   : > { %p209_p9 = scmp.lt.s32.totalorder (%p2293_p3), %s208_s5, 60  ;;  %s204_s10 = scalar_lea.vmem (%p2293_p3), [#allocation2], %s1889_s30 }
  0x1d   : > { %s7661_s5 = smov (!%p209_p9, %s208_s5), 60 }
  0x1e   : > { %s1859_s6 = sshll.u32 %s7661_s5, 3 }
  0x1f   : > { %s212_s7 = ssub.s32 480, %s1859_s6 }
  0x20   : > { %s213_s8 = sshll.u32 %s212_s7, 4 }
  0x21   : > { %214 = vsyncadd %s2316_s9, %s213_s8  ;;  %p2319_p10 = scmp.ne.s32.totalorder %s1859_s6, 0  ;;  %s1885_s12 = smul.u32 480, %s2207_s19 }
  0x22   : > { %s2324_s13 = sshll.u32 %s204_s10, 4  ;;  %s1863_s14 = sshll.u32 %s7661_s5, 7  ;;  %s222_s13 = int_to_ptr.vmem [resolvable:$true] %s2324_s13 }
  0x23   : > { %s217_s25 = scalar_lea.hbm %s5882_s0, %s1885_s12  ;;  %s1967_s30 = sshrl.u32 %s1863_s14, 4 }
  0x24   : > { %s219_s28 = sshll.u32 %s217_s25, 4  ;;  %s1976_s10 = scalar_lea.hbm %s5882_s0, 1352  ;;  %s2331_s28 = int_to_ptr.hbm [resolvable:$true] %s219_s28 }
  0x25   : > { %s1965_s29 = sshra.s32 %s2331_s28, 4  ;;  %s1966_s29 = int_to_ptr.hbm [resolvable:$true] %s1965_s29 }
  0x26   : > { %s1972_s6 = scalar_lea.hbm %s1966_s29, %s1967_s30 }
  0x27   : > { %p1973_p11 = scmp.ne.s32.totalorder %s1966_s29, %s1972_s6  ;;  %p1978_p0 = scmp.lt.s32.totalorder %s1976_s10, %s1972_s6 }
  0x29   : > { %p1974_p12 = pnand %p1973_p11, %p2319_p10 }
  0x2b   : > { %p1975_p13 = pneg %p1974_p12 }
  0x2d   : > { %p1980_p1 = pnand %p1978_p0, %p1975_p13 }
  0x2f   : > { %1983 = shalt.err (!%p1980_p1)
}
  0x30   : > { %s1984_s12 = sshra.s32 %s222_s13, 4  ;;  %s2213_s23 = smov [#allocation2]   ;;  %s1985_s12 = int_to_ptr.vmem [resolvable:$true] %s1984_s12 }
  0x31   : > { %s1991_s15 = scalar_lea.vmem %s1985_s12, %s1967_s30  ;;  %s1995_s25 = scalar_lea.vmem %s2213_s23, 960 }
  0x32   : > { %p1992_p2 = scmp.ne.s32.totalorder %s1985_s12, %s1991_s15  ;;  %p1997_p6 = scmp.lt.s32.totalorder %s1995_s25, %s1991_s15 }
  0x34   : > { %p1993_p4 = pnand %p1992_p2, %p2319_p10 }
  0x36   : > { %p1994_p5 = pneg %p1993_p4 }
  0x38   : > { %p1999_p8 = pnand %p1997_p6, %p1994_p5 }
  0x3a   : > { %2002 = shalt.err (!%p1999_p8)
}
  0x3b   : > { %s2214_s29 = smov 128   ;;  %s2215_s6 = smov 8  }
  0x3c   : > { %227 = dma.hbm_to_vmem [thread:$0]  (%p2319_p10), %s2331_s28, %s1863_s14, %s222_s13, %s2316_s9, %s2214_s29, %s2214_s29, %s2215_s6  }
  0x3d PF: > { %230 = sbr.rel (!%p2293_p3) target bundleno = 99 (0x63), region = 24  ;;  %s231_s30 = sand.u32 (%p2293_p3), 1, %s2211_s20  }
  0x3e   : > { %s233_s7 = sand.u32 (%p2293_p3), 1, %s2199_s17   ;;  %s238_s10 = smul.u32 (%p2293_p3), 60, %s2207_s19 }
  0x3f   : > { %s1890_s8 = smul.u32 (%p2293_p3), 480, %s233_s7  ;;  %s2361_s9 = scalar_lea.sflag (%p2293_p3), [#allocation6], %s231_s30 }
  0x40   : > { %s239_s12 = ssub.s32 (%p2293_p3), 169, %s238_s10 }
  0x41   : > { %p240_p9 = scmp.lt.s32.totalorder (%p2293_p3), %s239_s12, 60  ;;  %s235_s13 = scalar_lea.vmem (%p2293_p3), [#allocation5], %s1890_s8 }
  0x43   : > { %s7663_s12 = smov (!%p240_p9, %s239_s12), 60 }
  0x44   : > { %s1864_s11 = sshll.u32 %s7663_s12, 3 }
  0x45   : > { %s243_s15 = ssub.s32 480, %s1864_s11 }
  0x46   : > { %s244_s5 = sshll.u32 %s243_s15, 4 }
  0x47   : > { %245 = vsyncadd %s2361_s9, %s244_s5  ;;  %p2364_p10 = scmp.ne.s32.totalorder %s1864_s11, 0  ;;  %s1886_s28 = smul.u32 480, %s2207_s19 }
  0x48   : > { %s2369_s23 = sshll.u32 %s235_s13, 4  ;;  %s1868_s25 = sshll.u32 %s7663_s12, 7  ;;  %s253_s23 = int_to_ptr.vmem [resolvable:$true] %s2369_s23 }
  0x49   : > { %s248_s30 = scalar_lea.hbm %s5883_s1, %s1886_s28  ;;  %s2006_s10 = sshrl.u32 %s1868_s25, 4 }
  0x4a   : > { %s250_s7 = sshll.u32 %s248_s30, 4  ;;  %s2015_s13 = scalar_lea.hbm %s5883_s1, 1352  ;;  %s2376_s7 = int_to_ptr.hbm [resolvable:$true] %s250_s7 }
  0x4b   : > { %s2004_s8 = sshra.s32 %s2376_s7, 4  ;;  %s2005_s8 = int_to_ptr.hbm [resolvable:$true] %s2004_s8 }
  0x4c   : > { %s2011_s11 = scalar_lea.hbm %s2005_s8, %s2006_s10 }
  0x4d   : > { %p2012_p11 = scmp.ne.s32.totalorder %s2005_s8, %s2011_s11  ;;  %p2017_p0 = scmp.lt.s32.totalorder %s2015_s13, %s2011_s11 }
  0x4f   : > { %p2013_p12 = pnand %p2012_p11, %p2364_p10 }
  0x51   : > { %p2014_p13 = pneg %p2013_p12 }
  0x53   : > { %p2019_p1 = pnand %p2017_p0, %p2014_p13 }
  0x55   : > { %2022 = shalt.err (!%p2019_p1)
}
  0x56   : > { %s2023_s28 = sshra.s32 %s253_s23, 4  ;;  %s2216_s6 = smov [#allocation5]   ;;  %s2024_s28 = int_to_ptr.vmem [resolvable:$true] %s2023_s28 }
  0x57   : > { %s2030_s29 = scalar_lea.vmem %s2024_s28, %s2006_s10  ;;  %s2034_s30 = scalar_lea.vmem %s2216_s6, 960 }
  0x58   : > { %p2031_p2 = scmp.ne.s32.totalorder %s2024_s28, %s2030_s29  ;;  %p2036_p6 = scmp.lt.s32.totalorder %s2034_s30, %s2030_s29 }
  0x5a   : > { %p2032_p4 = pnand %p2031_p2, %p2364_p10 }
  0x5c   : > { %p2033_p5 = pneg %p2032_p4 }
  0x5e   : > { %p2038_p8 = pnand %p2036_p6, %p2033_p5 }
  0x60   : > { %2041 = shalt.err (!%p2038_p8)
}
  0x61   : > { %s2217_s8 = smov 128   ;;  %s2218_s11 = smov 8  }
  0x62   : > { %258 = dma.hbm_to_vmem [thread:$0]  (%p2364_p10), %s2376_s7, %s1868_s25, %s253_s23, %s2361_s9, %s2217_s8, %s2217_s8, %s2218_s11  }
  0x63 PF: > { %261 = sbr.rel (!%p2293_p3) target bundleno = 137 (0x89), region = 28  ;;  %s262_s10 = sand.u32 (%p2293_p3), 1, %s2211_s20  }
  0x64   : > { %s264_s15 = sand.u32 (%p2293_p3), 1, %s2199_s17   ;;  %s269_s13 = smul.u32 (%p2293_p3), 60, %s2207_s19 }
  0x65   : > { %s1891_s5 = smul.u32 (%p2293_p3), 480, %s264_s15  ;;  %s2406_s9 = scalar_lea.sflag (%p2293_p3), [#allocation6], %s262_s10 }
  0x66   : > { %s270_s28 = ssub.s32 (%p2293_p3), 169, %s269_s13 }
  0x67   : > { %p271_p9 = scmp.lt.s32.totalorder (%p2293_p3), %s270_s28, 60  ;;  %s266_s23 = scalar_lea.vmem (%p2293_p3), [#allocation7], %s1891_s5 }
  0x69   : > { %s7665_s28 = smov (!%p271_p9, %s270_s28), 60 }
  0x6a   : > { %s1869_s14 = sshll.u32 %s7665_s28, 3 }
  0x6b   : > { %s274_s29 = ssub.s32 480, %s1869_s14 }
  0x6c   : > { %s275_s12 = sshll.u32 %s274_s29, 4 }
  0x6d   : > { %276 = vsyncadd %s2406_s9, %s275_s12  ;;  %p2409_p10 = scmp.ne.s32.totalorder %s1869_s14, 0  ;;  %s1887_s7 = smul.u32 480, %s2207_s19 }
  0x6e   : > { %s2414_s6 = sshll.u32 %s266_s23, 4  ;;  %s1873_s30 = sshll.u32 %s7665_s28, 7  ;;  %s284_s6 = int_to_ptr.vmem [resolvable:$true] %s2414_s6 }
  0x6f   : > { %s279_s10 = scalar_lea.hbm %s5884_s2, %s1887_s7  ;;  %s2045_s13 = sshrl.u32 %s1873_s30, 4 }
  0x70   : > { %s281_s15 = sshll.u32 %s279_s10, 4  ;;  %s2054_s23 = scalar_lea.hbm %s5884_s2, 1352  ;;  %s2421_s15 = int_to_ptr.hbm [resolvable:$true] %s281_s15 }
  0x71   : > { %s2043_s5 = sshra.s32 %s2421_s15, 4  ;;  %s2044_s5 = int_to_ptr.hbm [resolvable:$true] %s2043_s5 }
  0x72   : > { %s2050_s14 = scalar_lea.hbm %s2044_s5, %s2045_s13 }
  0x73   : > { %p2051_p11 = scmp.ne.s32.totalorder %s2044_s5, %s2050_s14  ;;  %p2056_p0 = scmp.lt.s32.totalorder %s2054_s23, %s2050_s14 }
  0x75   : > { %p2052_p12 = pnand %p2051_p11, %p2409_p10 }
  0x77   : > { %p2053_p13 = pneg %p2052_p12 }
  0x79   : > { %p2058_p1 = pnand %p2056_p0, %p2053_p13 }
  0x7b   : > { %2061 = shalt.err (!%p2058_p1)
}
  0x7c   : > { %s2062_s7 = sshra.s32 %s284_s6, 4  ;;  %s2219_s11 = smov [#allocation7]   ;;  %s2063_s7 = int_to_ptr.vmem [resolvable:$true] %s2062_s7 }
  0x7d   : > { %s2069_s8 = scalar_lea.vmem %s2063_s7, %s2045_s13  ;;  %s2073_s10 = scalar_lea.vmem %s2219_s11, 960 }
  0x7e   : > { %p2070_p2 = scmp.ne.s32.totalorder %s2063_s7, %s2069_s8  ;;  %p2075_p6 = scmp.lt.s32.totalorder %s2073_s10, %s2069_s8 }
  0x80   : > { %p2071_p4 = pnand %p2070_p2, %p2409_p10 }
  0x82   : > { %p2072_p5 = pneg %p2071_p4 }
  0x84   : > { %p2077_p8 = pnand %p2075_p6, %p2072_p5 }
  0x86   : > { %2080 = shalt.err (!%p2077_p8)
}
  0x87   : > { %s2220_s5 = smov 128   ;;  %s2221_s14 = smov 8  }
  0x88   : > { %289 = dma.hbm_to_vmem [thread:$0]  (%p2409_p10), %s2421_s15, %s1873_s30, %s284_s6, %s2406_s9, %s2220_s5, %s2220_s5, %s2221_s14  }
  0x89 PF: > { %292 = sbr.rel (!%p2293_p3) target bundleno = 175 (0xaf), region = 32  ;;  %s293_s13 = sand.u32 (%p2293_p3), 1, %s2199_s17  }
  0x8a   : > { %s300_s29 = smul.u32 (%p2293_p3), 60, %s2207_s19  ;;  %s2450_s11 = scalar_lea.sflag (%p2293_p3), [#allocation9], %s293_s13 }
  0x8b   : > { %s1892_s12 = smul.u32 (%p2293_p3), 480, %s293_s13 }
  0x8c   : > { %s301_s23 = ssub.s32 (%p2293_p3), 169, %s300_s29 }
  0x8d   : > { %p302_p9 = scmp.lt.s32.totalorder (%p2293_p3), %s301_s23, 60  ;;  %s297_s28 = scalar_lea.vmem (%p2293_p3), [#allocation8], %s1892_s12 }
  0x8f   : > { %s7667_s23 = smov (!%p302_p9, %s301_s23), 60 }
  0x90   : > { %s1874_s7 = sshll.u32 %s7667_s23, 3 }
  0x91   : > { %s305_s8 = ssub.s32 480, %s1874_s7 }
  0x92   : > { %s306_s25 = sshll.u32 %s305_s8, 4 }
  0x93   : > { %307 = vsyncadd %s2450_s11, %s306_s25  ;;  %p2453_p3 = scmp.ne.s32.totalorder %s1874_s7, 0  ;;  %s1888_s9 = smul.u32 480, %s2207_s19 }
  0x94   : > { %s2458_s6 = sshll.u32 %s297_s28, 4  ;;  %s1878_s30 = sshll.u32 %s7667_s23, 7  ;;  %s315_s6 = int_to_ptr.vmem [resolvable:$true] %s2458_s6 }
  0x95   : > { %s310_s5 = scalar_lea.hbm %s5885_s3, %s1888_s9  ;;  %s2084_s29 = sshrl.u32 %s1878_s30, 4 }
  0x96   : > { %s312_s14 = sshll.u32 %s310_s5, 4  ;;  %s2093_s25 = scalar_lea.hbm %s5885_s3, 1352  ;;  %s2465_s14 = int_to_ptr.hbm [resolvable:$true] %s312_s14 }
  0x97   : > { %s2082_s13 = sshra.s32 %s2465_s14, 4  ;;  %s2083_s13 = int_to_ptr.hbm [resolvable:$true] %s2082_s13 }
  0x98   : > { %s2089_s12 = scalar_lea.hbm %s2083_s13, %s2084_s29 }
  0x99   : > { %p2090_p10 = scmp.ne.s32.totalorder %s2083_s13, %s2089_s12  ;;  %p2095_p13 = scmp.lt.s32.totalorder %s2093_s25, %s2089_s12 }
  0x9b   : > { %p2091_p11 = pnand %p2090_p10, %p2453_p3 }
  0x9d   : > { %p2092_p12 = pneg %p2091_p11 }
  0x9f   : > { %p2097_p0 = pnand %p2095_p13, %p2092_p12 }
  0xa1   : > { %2100 = shalt.err (!%p2097_p0)
}
  0xa2   : > { %s2101_s28 = sshra.s32 %s315_s6, 4  ;;  %s2222_s15 = smov [#allocation8]   ;;  %s2102_s28 = int_to_ptr.vmem [resolvable:$true] %s2101_s28 }
  0xa3   : > { %s2108_s9 = scalar_lea.vmem %s2102_s28, %s2084_s29  ;;  %s2112_s10 = scalar_lea.vmem %s2222_s15, 960 }
  0xa4   : > { %p2109_p1 = scmp.ne.s32.totalorder %s2102_s28, %s2108_s9  ;;  %p2114_p5 = scmp.lt.s32.totalorder %s2112_s10, %s2108_s9 }
  0xa6   : > { %p2110_p2 = pnand %p2109_p1, %p2453_p3 }
  0xa8   : > { %p2111_p4 = pneg %p2110_p2 }
  0xaa   : > { %p2116_p6 = pnand %p2114_p5, %p2111_p4 }
  0xac   : > { %2119 = shalt.err (!%p2116_p6)
}
  0xad   : > { %s2223_s5 = smov 128   ;;  %s2224_s13 = smov 8  }
  0xae   : > { %320 = dma.hbm_to_vmem [thread:$0]  (%p2453_p3), %s2465_s14, %s1878_s30, %s315_s6, %s2450_s11, %s2223_s5, %s2223_s5, %s2224_s13  }
  0xaf PF: > { %p1879_p8 = scmp.ge.s32.totalorder %s2211_s20, 1  ;;  %p322_p9 = scmp.lt.s32.totalorder %s2211_s20, 4 }
  0xb1   : > { %p323_p10 = pnand %p1879_p8, %p322_p9 }
  0xb3   : > { %326 = sbr.rel (%p323_p10) target bundleno = 696 (0x2b8), region = 36 }
  0xb8   : > { %s328_s29 = sand.u32 1, %s2195_s16  }
  0xb9   : > { %s1893_s12 = smul.u32 480, %s328_s29  ;;  %s329_s7 = scalar_lea.sflag [#allocation3], %s328_s29 }
  0xbb   : > { %s2490_s8 = scalar_lea.vmem [#allocation2], %s1893_s12 }
  0xbc   : > { %2174 = dma.done.wait (%p2301_p7), %s329_s7, 7680  }
  0xbd   : > { %2176 = vsyncadd (%p2301_p7), %s329_s7, 4294959616  ;;  %s338_s23 = sand.u32 1, %s2284_s21   ;;  %s2497_s24 = scalar_lea.vmem [#allocation5], %s1893_s12 }
  0xbe   : > { %s339_s11 = scalar_lea.sflag [#allocation6], %s338_s23 }
  0xbf   : > { %2178 = dma.done.wait (%p2301_p7), %s339_s11, 15360  }
  0xc0   : > { %2180 = vsyncadd (%p2301_p7), %s339_s11, 4294951936  ;;  %s2503_s6 = scalar_lea.vmem [#allocation7], %s1893_s12  ;;  %s359_s30 = scalar_lea.sflag [#allocation9], %s328_s29 }
  0xc1   : > { %s2505_s14 = scalar_lea.vmem [#allocation8], %s1893_s12 }
  0xc2   : > { %2182 = dma.done.wait (%p2301_p7), %s359_s30, 7680  }
  0xc3   : > { %2184 = vsyncadd (%p2301_p7), %s359_s30, 4294959616  ;;  %p1880_p3 = scmp.ne.s32.totalorder %s2203_s18, 0 }
  0xc5   : > { %429 = sbr.rel (%p1880_p3) target bundleno = 207 (0xcf), region = 56 }
  0xca   : > { %v2225_v0 = vmov 0.0  }
  0xcb   : > { %430 = vst [vmem:[#allocation10] sm:$0xff] %v2225_v0 }
  0xcc   : > { %431 = vst [vmem:[#allocation10 + $0x8] sm:$0xff] %v2225_v0 }
  0xcd   : > { %432 = vst [vmem:[#allocation10 + $0x10] sm:$0xff] %v2225_v0 }
  0xce   : > { %433 = vst [vmem:[#allocation10 + $0x18] sm:$0xff] %v2225_v0 }
  0xcf PF: > { %v434_v1 = vld [vmem:[%s2490_s8] sm:$0xff]  ;;  %v435_v3 = vld [vmem:[%s2490_s8 + $0x8] sm:$0xff]  ;;  %v436_v4 = vld [vmem:[%s2490_s8 + $0x10] sm:$0xff]  ;;  %s1276_s26 = smul.u32 480, %s2203_s18  ;;  %s2227_s18 = smov [#allocation10]  }
  0xd0   : > { %v2514_v2 = vld [vmem:[%s2497_s24] sm:$0xff]  ;;  %v437_v5 = vld [vmem:[%s2490_s8 + $0x18] sm:$0xff]  ;;  %v2521_v7 = vld [vmem:[%s2497_s24 + $0x8] sm:$0xff]  ;;  %s1715_s25 = sshll.u32 %s2227_s18, 4  ;;  %s1717_s15 = sshll.u32 %s5886_s4, 4  ;;  %s1716_s25 = int_to_ptr.vmem [resolvable:$true] %s1715_s25  ;;  %s1718_s15 = int_to_ptr.hbm [resolvable:$true] %s1717_s15 }
  0xd1   : > { %6210 = vst [vmem:[#allocation15_spill] sm:$0xff] %v2514_v2  ;;  %v438_v6 = vld [vmem:[%s2490_s8 + $0x20] sm:$0xff]  ;;  %v2524_v8 = vld [vmem:[%s2497_s24 + $0x10] sm:$0xff]  ;;  %v2527_v9 = vld [vmem:[%s2497_s24 + $0x18] sm:$0xff]  ;;  %v2597_v43 = vsub.f32 %v434_v1, %v2514_v2  ;;  %v2613_v51 = vsub.f32 %v435_v3, %v2521_v7  ;;  %p1902_p7 = scmp.eq.s32.totalorder %s2284_s21, 2  ;;  %s2228_s10 = smov 128  }
  0xd2   : > { %6211 = vst [vmem:[#allocation16_spill] sm:$0xff] %v2521_v7  ;;  %v2530_v10 = vld [vmem:[%s2497_s24 + $0x20] sm:$0xff]  ;;  %v439_v11 = vld [vmem:[%s2490_s8 + $0x28] sm:$0xff]  ;;  %v440_v12 = vld [vmem:[%s2490_s8 + $0x30] sm:$0xff]  ;;  %v2616_v52 = vsub.f32 %v436_v4, %v2524_v8  ;;  %v2619_v53 = vsub.f32 %v437_v5, %v2527_v9  ;;  %s2229_s5 = smov 8  }
  0xd3   : > { %6212 = vst [vmem:[#allocation17_spill] sm:$0xff] %v2524_v8  ;;  %v441_v13 = vld [vmem:[%s2490_s8 + $0x38] sm:$0xff]  ;;  %v442_v14 = vld [vmem:[%s2490_s8 + $0x40] sm:$0xff]  ;;  %v2537_v15 = vld [vmem:[%s2497_s24 + $0x28] sm:$0xff]  ;;  %v2622_v54 = vsub.f32 %v438_v6, %v2530_v10 }
  0xd4   : > { %6213 = vst [vmem:[#allocation18_spill] sm:$0xff] %v2527_v9  ;;  %v2540_v16 = vld [vmem:[%s2497_s24 + $0x30] sm:$0xff]  ;;  %v2543_v17 = vld [vmem:[%s2497_s24 + $0x38] sm:$0xff]  ;;  %v2546_v18 = vld [vmem:[%s2497_s24 + $0x40] sm:$0xff]  ;;  %v2638_v62 = vsub.f32 %v439_v11, %v2537_v15 }
  0xd5   : > { %6214 = vst [vmem:[#allocation19_spill] sm:$0xff] %v2530_v10  ;;  %v443_v19 = vld [vmem:[%s2490_s8 + $0x48] sm:$0xff]  ;;  %v444_v20 = vld [vmem:[%s2490_s8 + $0x50] sm:$0xff]  ;;  %v445_v21 = vld [vmem:[%s2490_s8 + $0x58] sm:$0xff]  ;;  %v2641_v63 = vsub.f32 %v440_v12, %v2540_v16  ;;  %v2644_v0 = vsub.f32 %v441_v13, %v2543_v17  ;;  %v2647_v1 = vsub.f32 %v442_v14, %v2546_v18 }
  0xd6   : > { %6215 = vst [vmem:[#allocation20_spill] sm:$0xff] %v2537_v15  ;;  %v446_v22 = vld [vmem:[%s2490_s8 + $0x60] sm:$0xff]  ;;  %v2553_v23 = vld [vmem:[%s2497_s24 + $0x48] sm:$0xff]  ;;  %v2556_v24 = vld [vmem:[%s2497_s24 + $0x50] sm:$0xff] }
  0xd7   : > { %6216 = vst [vmem:[#allocation21_spill] sm:$0xff] %v2540_v16  ;;  %v2559_v25 = vld [vmem:[%s2497_s24 + $0x58] sm:$0xff]  ;;  %v2562_v26 = vld [vmem:[%s2497_s24 + $0x60] sm:$0xff]  ;;  %v447_v27 = vld [vmem:[%s2490_s8 + $0x68] sm:$0xff]  ;;  %v2662_v12 = vsub.f32 %v443_v19, %v2553_v23  ;;  %v2665_v13 = vsub.f32 %v444_v20, %v2556_v24 }
  0xd8   : > { %6217 = vst [vmem:[#allocation22_spill] sm:$0xff] %v2543_v17  ;;  %v448_v28 = vld [vmem:[%s2490_s8 + $0x70] sm:$0xff]  ;;  %v449_v29 = vld [vmem:[%s2490_s8 + $0x78] sm:$0xff]  ;;  %v450_v30 = vld [vmem:[%s2490_s8 + $0x80] sm:$0xff]  ;;  %v2668_v14 = vsub.f32 %v445_v21, %v2559_v25 }
  0xd9   : > { %6218 = vst [vmem:[#allocation23_spill] sm:$0xff] %v2546_v18  ;;  %v2569_v31 = vld [vmem:[%s2497_s24 + $0x68] sm:$0xff]  ;;  %v2572_v32 = vld [vmem:[%s2497_s24 + $0x70] sm:$0xff]  ;;  %v2575_v33 = vld [vmem:[%s2497_s24 + $0x78] sm:$0xff] }
  0xda   : > { %6219 = vst [vmem:[#allocation24_spill] sm:$0xff] %v2559_v25  ;;  %v2578_v34 = vld [vmem:[%s2497_s24 + $0x80] sm:$0xff]  ;;  %v451_v35 = vld [vmem:[%s2490_s8 + $0x88] sm:$0xff]  ;;  %v452_v36 = vld [vmem:[%s2490_s8 + $0x90] sm:$0xff]  ;;  %v2684_v19 = vsub.f32 %v447_v27, %v2569_v31  ;;  %v2687_v20 = vsub.f32 %v448_v28, %v2572_v32  ;;  %v2690_v21 = vsub.f32 %v449_v29, %v2575_v33 }
  0xdb   : > { %6220 = vst [vmem:[#allocation25_spill] sm:$0xff] %v2575_v33  ;;  %v453_v37 = vld [vmem:[%s2490_s8 + $0x98] sm:$0xff]  ;;  %v454_v38 = vld [vmem:[%s2490_s8 + $0xa0] sm:$0xff]  ;;  %v2585_v39 = vld [vmem:[%s2497_s24 + $0x88] sm:$0xff] }
  0xdc   : > { %6221 = vst [vmem:[#allocation26_spill] sm:$0xff] %v2578_v34  ;;  %v2588_v40 = vld [vmem:[%s2497_s24 + $0x90] sm:$0xff]  ;;  %v2591_v41 = vld [vmem:[%s2497_s24 + $0x98] sm:$0xff]  ;;  %v2594_v42 = vld [vmem:[%s2497_s24 + $0xa0] sm:$0xff] }
  0xdd   : > { %6222 = vst [vmem:[#allocation27_spill] sm:$0xff] %v2588_v40  ;;  %v455_v44 = vld [vmem:[%s2490_s8 + $0xa8] sm:$0xff]  ;;  %v456_v45 = vld [vmem:[%s2490_s8 + $0xb0] sm:$0xff]  ;;  %v457_v46 = vld [vmem:[%s2490_s8 + $0xb8] sm:$0xff] }
  0xde   : > { %6223 = vst [vmem:[#allocation28_spill] sm:$0xff] %v2591_v41  ;;  %v458_v47 = vld [vmem:[%s2490_s8 + $0xc0] sm:$0xff]  ;;  %v2604_v48 = vld [vmem:[%s2497_s24 + $0xa8] sm:$0xff]  ;;  %v2607_v49 = vld [vmem:[%s2497_s24 + $0xb0] sm:$0xff] }
  0xdf   : > { %6224 = vst [vmem:[#allocation29_spill] sm:$0xff] %v2594_v42  ;;  %v2610_v50 = vld [vmem:[%s2497_s24 + $0xb8] sm:$0xff]  ;;  %v459_v55 = vld [vmem:[%s2490_s8 + $0xc8] sm:$0xff]  ;;  %v460_v56 = vld [vmem:[%s2490_s8 + $0xd0] sm:$0xff] }
  0xe0   : > { %6225 = vst [vmem:[#allocation30_spill] sm:$0xff] %v2597_v43  ;;  %v461_v57 = vld [vmem:[%s2490_s8 + $0xd8] sm:$0xff]  ;;  %v462_v58 = vld [vmem:[%s2490_s8 + $0xe0] sm:$0xff]  ;;  %v2632_v60 = vld [vmem:[%s2497_s24 + $0xc8] sm:$0xff] }
  0xe1   : > { %6226 = vst [vmem:[#allocation31_spill] sm:$0xff] %v2604_v48  ;;  %v2629_v59 = vld [vmem:[%s2497_s24 + $0xc0] sm:$0xff]  ;;  %v2635_v61 = vld [vmem:[%s2497_s24 + $0xd0] sm:$0xff]  ;;  %v463_v3 = vld [vmem:[%s2490_s8 + $0xe8] sm:$0xff] }
  0xe2   : > { %6227 = vst [vmem:[#allocation32_spill] sm:$0xff] %v2607_v49  ;;  %v464_v4 = vld [vmem:[%s2490_s8 + $0xf0] sm:$0xff]  ;;  %v465_v5 = vld [vmem:[%s2490_s8 + $0xf8] sm:$0xff]  ;;  %v2656_v11 = vld [vmem:[%s2497_s24 + $0xe0] sm:$0xff] }
  0xe3   : > { %6228 = vst [vmem:[#allocation33_spill] sm:$0xff] %v2610_v50  ;;  %v2653_v6 = vld [vmem:[%s2497_s24 + $0xd8] sm:$0xff]  ;;  %v2705_v27 = vld [vmem:[%s2497_s24 + $0x108] sm:$0xff]  ;;  %v2714_v29 = vld [vmem:[%s2503_s6] sm:$0xff] }
  0xe4   : > { %6229 = vst [vmem:[#allocation34_spill] sm:$0xff] %v2613_v51  ;;  %v2711_v28 = vld [vmem:[%s2497_s24 + $0x118] sm:$0xff]  ;;  %v2735_v51 = vld [vmem:[%s2503_s6 + $0x8] sm:$0xff]  ;;  %v492_v16 = vld [vmem:[%s2490_s8 + $0x1d0] sm:$0xff] }
  0xe5   : > { %6230 = vst [vmem:[#allocation35_spill] sm:$0xff] %v2616_v52  ;;  %v2732_v52 = vld [vmem:[%s2497_s24 + $0x120] sm:$0xff]  ;;  %v2762_v43 = vld [vmem:[%s2490_s8 + $0x138] sm:$0xff]  ;;  %v2974_v18 = vld [vmem:[%s2503_s6 + $0x70] sm:$0xff] }
  0xe6   : > { %6231 = vst [vmem:[#allocation36_spill] sm:$0xff] %v2619_v53  ;;  %v2681_v53 = vld [vmem:[%s2497_s24 + $0x100] sm:$0xff]  ;;  %v2861_v2 = vld [vmem:[%s2497_s24 + $0x178] sm:$0xff]  ;;  %v3002_v25 = vld [vmem:[%s2503_s6 + $0x90] sm:$0xff] }
  0xe7   : > { %6232 = vst [vmem:[#allocation37_spill] sm:$0xff] %v2622_v54  ;;  %v2678_v54 = vld [vmem:[%s2497_s24 + $0xf8] sm:$0xff]  ;;  %v3134_v33 = vld [vmem:[%s2503_s6 + $0x148] sm:$0xff] }
  0xe8   : > { %6233 = vst [vmem:[#allocation38_spill] sm:$0xff] %v2629_v59  ;;  %v2873_v9 = vld [vmem:[%s2503_s6 + $0x58] sm:$0xff] }
  0xe9   : > { %6234 = vst [vmem:[#allocation39_spill] sm:$0xff] %v2632_v60  ;;  %v493_v15 = vld [vmem:[%s2490_s8 + $0x1d8] sm:$0xff] }
  0xea   : > { %6235 = vst [vmem:[#allocation40_spill] sm:$0xff] %v2635_v61 }
  0xeb   : > { %6236 = vst [vmem:[#allocation41_spill] sm:$0xff] %v2638_v62  ;;  %v2659_v62 = vld [vmem:[%s2497_s24 + $0xe8] sm:$0xff] }
  0xec   : > { %6237 = vst [vmem:[#allocation42_spill] sm:$0xff] %v2641_v63  ;;  %v2675_v63 = vld [vmem:[%s2497_s24 + $0xf0] sm:$0xff] }
  0xed   : > { %6238 = vst [vmem:[#allocation43_spill] sm:$0xff] %v2644_v0  ;;  %v466_v0 = vld [vmem:[%s2490_s8 + $0x100] sm:$0xff] }
  0xee   : > { %6239 = vst [vmem:[#allocation44_spill] sm:$0xff] %v2647_v1  ;;  %v2671_v1 = vsub.f32 %v446_v22, %v2562_v26  ;;  %v2693_v22 = vsub.f32 %v450_v30, %v2578_v34  ;;  %v2717_v30 = vsub.f32 %v451_v35, %v2585_v39  ;;  %v2738_v35 = vld [vmem:[%s2503_s6 + $0x10] sm:$0xff]  ;;  %v3131_v34 = vld [vmem:[%s2503_s6 + $0x140] sm:$0xff] }
  0xef   : > { %6240 = vst [vmem:[#allocation45_spill] sm:$0xff] %v2653_v6 }
  0xf0   : > { %6241 = vst [vmem:[#allocation46_spill] sm:$0xff] %v2656_v11 }
  0xf1   : > { %6242 = vst [vmem:[#allocation47_spill] sm:$0xff] %v2659_v62 }
  0xf2   : > { %6243 = vst [vmem:[#allocation48_spill] sm:$0xff] %v2662_v12  ;;  %v2729_v12 = vld [vmem:[%s2490_s8 + $0x120] sm:$0xff] }
  0xf3   : > { %6244 = vst [vmem:[#allocation49_spill] sm:$0xff] %v2665_v13  ;;  %v2702_v13 = vld [vmem:[%s2490_s8 + $0x118] sm:$0xff]  ;;  %v2907_v7 = vsub.f32 %v2729_v12, %v2732_v52  ;;  %v490_v12 = vld [vmem:[%s2490_s8 + $0x1c0] sm:$0xff] }
  0xf4   : > { %6245 = vst [vmem:[#allocation50_spill] sm:$0xff] %v2668_v14  ;;  %v2699_v14 = vld [vmem:[%s2490_s8 + $0x110] sm:$0xff] }
  0xf5   : > { %6246 = vst [vmem:[#allocation51_spill] sm:$0xff] %v2671_v1  ;;  %v2696_v1 = vld [vmem:[%s2490_s8 + $0x108] sm:$0xff] }
  0xf6   : > { %6247 = vst [vmem:[#allocation52_spill] sm:$0xff] %v2675_v63 }
  0xf7   : > { %6248 = vst [vmem:[#allocation53_spill] sm:$0xff] %v2678_v54 }
  0xf8   : > { %6249 = vst [vmem:[#allocation54_spill] sm:$0xff] %v2681_v53 }
  0xf9   : > { %6250 = vst [vmem:[#allocation55_spill] sm:$0xff] %v2684_v19  ;;  %v2708_v19 = vld [vmem:[%s2497_s24 + $0x110] sm:$0xff] }
  0xfa   : > { %6251 = vst [vmem:[#allocation56_spill] sm:$0xff] %v2687_v20  ;;  %v2726_v20 = vsub.f32 %v454_v38, %v2594_v42  ;;  %v2750_v38 = vsub.f32 %v457_v46, %v2610_v50  ;;  %v2774_v46 = vld [vmem:[%s2503_s6 + $0x20] sm:$0xff]  ;;  %v2881_v8 = vsub.f32 %v2699_v14, %v2708_v19  ;;  %v2894_v14 = vld [vmem:[%s2497_s24 + $0x188] sm:$0xff] }
  0xfb   : > { %6252 = vst [vmem:[#allocation57_spill] sm:$0xff] %v2690_v21  ;;  %v2723_v21 = vsub.f32 %v453_v37, %v2591_v41  ;;  %v2747_v37 = vsub.f32 %v456_v45, %v2607_v49  ;;  %v2771_v45 = vld [vmem:[%s2497_s24 + $0x138] sm:$0xff]  ;;  %v2792_v50 = vld [vmem:[%s2497_s24 + $0x140] sm:$0xff]  ;;  %v484_v49 = vld [vmem:[%s2490_s8 + $0x190] sm:$0xff] }
  0xfc   : > { %6253 = vst [vmem:[#allocation58_spill] sm:$0xff] %v2693_v22  ;;  %v2720_v22 = vsub.f32 %v452_v36, %v2588_v40  ;;  %v2744_v36 = vsub.f32 %v455_v44, %v2604_v48  ;;  %v2765_v44 = vld [vmem:[%s2497_s24 + $0x128] sm:$0xff]  ;;  %v489_v48 = vld [vmem:[%s2490_s8 + $0x1b8] sm:$0xff]  ;;  %v3151_v40 = vld [vmem:[%s2503_s6 + $0x160] sm:$0xff] }
  0xfd   : > { %6254 = vst [vmem:[#allocation59_spill] sm:$0xff] %v2705_v27  ;;  %v2949_v42 = vld [vmem:[%s2497_s24 + $0x1c8] sm:$0xff]  ;;  %v3165_v41 = vld [vmem:[%s2503_s6 + $0x170] sm:$0xff] }
  0xfe   : > { %6255 = vst [vmem:[#allocation60_spill] sm:$0xff] %v2708_v19  ;;  %v2900_v19 = vld [vmem:[%s2497_s24 + $0x198] sm:$0xff] }
  0xff   : > { %6256 = vst [vmem:[#allocation61_spill] sm:$0xff] %v2711_v28 }
 0x100   : > { %6257 = vst [vmem:[#allocation62_spill] sm:$0xff] %v2714_v29  ;;  %v2842_v29 = vsub.f32 %v466_v0, %v2681_v53  ;;  %v2855_v0 = vld [vmem:[%s2497_s24 + $0x168] sm:$0xff] }
 0x101   : > { %6258 = vst [vmem:[#allocation63_spill] sm:$0xff] %v2717_v30  ;;  %v2741_v30 = vld [vmem:[%s2503_s6 + $0x18] sm:$0xff]  ;;  %v483_v53 = vld [vmem:[%s2490_s8 + $0x188] sm:$0xff] }
 0x102   : > { %6259 = vst [vmem:[#allocation64_spill] sm:$0xff] %v2720_v22  ;;  %v2759_v22 = vld [vmem:[%s2490_s8 + $0x130] sm:$0xff] }
 0x103   : > { %6260 = vst [vmem:[#allocation65_spill] sm:$0xff] %v2723_v21  ;;  %v2756_v21 = vld [vmem:[%s2490_s8 + $0x128] sm:$0xff] }
 0x104   : > { %6261 = vst [vmem:[#allocation66_spill] sm:$0xff] %v2726_v20  ;;  %v2753_v20 = vsub.f32 %v458_v47, %v2629_v59  ;;  %v2777_v47 = vsub.f32 %v459_v55, %v2632_v60  ;;  %v2789_v59 = vld [vmem:[%s2490_s8 + $0x140] sm:$0xff]  ;;  %v2795_v55 = vld [vmem:[%s2503_s6 + $0x28] sm:$0xff]  ;;  %v2933_v10 = vsub.f32 %v2756_v21, %v2765_v44  ;;  %v2952_v21 = vld [vmem:[%s2497_s24 + $0x1d0] sm:$0xff] }
 0x105   : > { %6262 = vst [vmem:[#allocation67_spill] sm:$0xff] %v2732_v52  ;;  %v482_v60 = vld [vmem:[%s2490_s8 + $0x180] sm:$0xff]  ;;  %v2923_v52 = vld [vmem:[%s2497_s24 + $0x1b0] sm:$0xff] }
 0x106   : > { %6263 = vst [vmem:[#allocation68_spill] sm:$0xff] %v2735_v51  ;;  %v2885_v51 = vsub.f32 %v2702_v13, %v2711_v28  ;;  %v2903_v13 = vld [vmem:[%s2497_s24 + $0x1a0] sm:$0xff]  ;;  %v487_v28 = vld [vmem:[%s2490_s8 + $0x1a8] sm:$0xff] }
 0x107   : > { %6264 = vst [vmem:[#allocation69_spill] sm:$0xff] %v2738_v35  ;;  %v2877_v35 = vsub.f32 %v2696_v1, %v2705_v27  ;;  %v485_v1 = vld [vmem:[%s2490_s8 + $0x198] sm:$0xff]  ;;  %v488_v27 = vld [vmem:[%s2490_s8 + $0x1b0] sm:$0xff] }
 0x108   : > { %6265 = vst [vmem:[#allocation70_spill] sm:$0xff] %v2741_v30  ;;  %v2870_v30 = vld [vmem:[%s2503_s6 + $0x50] sm:$0xff] }
 0x109   : > { %6266 = vst [vmem:[#allocation71_spill] sm:$0xff] %v2744_v36  ;;  %v2768_v36 = vld [vmem:[%s2497_s24 + $0x130] sm:$0xff] }
 0x10a   : > { %6267 = vst [vmem:[#allocation72_spill] sm:$0xff] %v2747_v37  ;;  %v2786_v37 = vsub.f32 %v462_v58, %v2656_v11  ;;  %v2810_v58 = vsub.f32 %v465_v5, %v2678_v54  ;;  %v2818_v11 = vld [vmem:[%s2490_s8 + $0x150] sm:$0xff]  ;;  %v2864_v54 = vld [vmem:[%s2497_s24 + $0x180] sm:$0xff] }
 0x10b   : > { %6268 = vst [vmem:[#allocation73_spill] sm:$0xff] %v2750_v38  ;;  %v2783_v38 = vsub.f32 %v461_v57, %v2653_v6  ;;  %v2804_v57 = vsub.f32 %v463_v3, %v2659_v62  ;;  %v2821_v3 = vld [vmem:[%s2490_s8 + $0x158] sm:$0xff]  ;;  %v2830_v5 = vld [vmem:[%s2497_s24 + $0x150] sm:$0xff]  ;;  %v479_v62 = vld [vmem:[%s2490_s8 + $0x168] sm:$0xff] }
 0x10c   : > { %6269 = vst [vmem:[#allocation74_spill] sm:$0xff] %v2753_v20  ;;  %v2780_v20 = vsub.f32 %v460_v56, %v2635_v61  ;;  %v2801_v56 = vld [vmem:[%s2503_s6 + $0x38] sm:$0xff]  ;;  %v480_v6 = vld [vmem:[%s2490_s8 + $0x170] sm:$0xff] }
 0x10d   : > { %6270 = vst [vmem:[#allocation75_spill] sm:$0xff] %v2771_v45  ;;  %v481_v61 = vld [vmem:[%s2490_s8 + $0x178] sm:$0xff] }
 0x10e   : > { %6271 = vst [vmem:[#allocation76_spill] sm:$0xff] %v2774_v46  ;;  %v2937_v46 = vsub.f32 %v2759_v22, %v2768_v36  ;;  %v2955_v22 = vld [vmem:[%s2497_s24 + $0x1d8] sm:$0xff] }
 0x10f   : > { %6272 = vst [vmem:[#allocation77_spill] sm:$0xff] %v2777_v47  ;;  %v2798_v47 = vld [vmem:[%s2503_s6 + $0x30] sm:$0xff] }
 0x110   : > { %6273 = vst [vmem:[#allocation78_spill] sm:$0xff] %v2780_v20  ;;  %v2815_v20 = vld [vmem:[%s2490_s8 + $0x148] sm:$0xff] }
 0x111   : > { %6274 = vst [vmem:[#allocation79_spill] sm:$0xff] %v2783_v38  ;;  %v2807_v38 = vsub.f32 %v464_v4, %v2675_v63  ;;  %v2824_v4 = vld [vmem:[%s2490_s8 + $0x160] sm:$0xff]  ;;  %v2867_v63 = vld [vmem:[%s2503_s6 + $0x48] sm:$0xff] }
 0x112   : > { %6275 = vst [vmem:[#allocation80_spill] sm:$0xff] %v2786_v37  ;;  %v2833_v37 = vld [vmem:[%s2497_s24 + $0x158] sm:$0xff] }
 0x113   : > { %6276 = vst [vmem:[#allocation81_spill] sm:$0xff] %v2792_v50 }
 0x114   : > { %6277 = vst [vmem:[#allocation82_spill] sm:$0xff] %v2795_v55  ;;  %v2929_v55 = vld [vmem:[%s2497_s24 + $0x1c0] sm:$0xff] }
 0x115   : > { %6278 = vst [vmem:[#allocation83_spill] sm:$0xff] %v2798_v47  ;;  %v491_v47 = vld [vmem:[%s2490_s8 + $0x1c8] sm:$0xff] }
 0x116   : > { %6279 = vst [vmem:[#allocation84_spill] sm:$0xff] %v2801_v56  ;;  %v2941_v56 = vsub.f32 %v2762_v43, %v2771_v45  ;;  %v2962_v43 = vsub.f32 %v2789_v59, %v2792_v50  ;;  %v2977_v45 = vld [vmem:[%s2503_s6 + $0x78] sm:$0xff]  ;;  %v2980_v59 = vld [vmem:[%s2503_s6 + $0x80] sm:$0xff]  ;;  %v6395_v50 = vld [vmem:[#allocation68_spill] sm:$0xff] }
 0x117   : > { %6280 = vst [vmem:[#allocation85_spill] sm:$0xff] %v2804_v57  ;;  %v2839_v57 = vld [vmem:[%s2503_s6 + $0x40] sm:$0xff] }
 0x118   : > { %6281 = vst [vmem:[#allocation86_spill] sm:$0xff] %v2807_v38  ;;  %v2827_v38 = vld [vmem:[%s2497_s24 + $0x148] sm:$0xff] }
 0x119   : > { %6282 = vst [vmem:[#allocation87_spill] sm:$0xff] %v2810_v58  ;;  %v2836_v58 = vld [vmem:[%s2497_s24 + $0x160] sm:$0xff]  ;;  %v2984_v17 = vsub.f32 %v2815_v20, %v2827_v38  ;;  %v3005_v20 = vld [vmem:[%s2503_s6 + $0x98] sm:$0xff] }
 0x11a   : > { %6283 = vst [vmem:[#allocation88_spill] sm:$0xff] %v2833_v37 }
 0x11b   : > { %6284 = vst [vmem:[#allocation89_spill] sm:$0xff] %v2836_v58 }
 0x11c   : > { %6285 = vst [vmem:[#allocation90_spill] sm:$0xff] %v2839_v57  ;;  %v2971_v57 = vld [vmem:[%s2503_s6 + $0x68] sm:$0xff] }
 0x11d   : > { %6286 = vst [vmem:[#allocation91_spill] sm:$0xff] %v2842_v29  ;;  %v2858_v29 = vld [vmem:[%s2497_s24 + $0x170] sm:$0xff] }
 0x11e   : > { %6287 = vst [vmem:[#allocation92_spill] sm:$0xff] %v2855_v0 }
 0x11f   : > { %6288 = vst [vmem:[#allocation93_spill] sm:$0xff] %v2858_v29 }
 0x120   : > { %6289 = vst [vmem:[#allocation94_spill] sm:$0xff] %v2861_v2 }
 0x121   : > { %6290 = vst [vmem:[#allocation95_spill] sm:$0xff] %v2864_v54 }
 0x122   : > { %6291 = vst [vmem:[#allocation96_spill] sm:$0xff] %v2870_v30  ;;  %v3029_v30 = vld [vmem:[%s2503_s6 + $0xb8] sm:$0xff] }
 0x123   : > { %6292 = vst [vmem:[#allocation97_spill] sm:$0xff] %v2873_v9  ;;  %v2999_v9 = vld [vmem:[%s2503_s6 + $0x88] sm:$0xff] }
 0x124   : > { %6293 = vst [vmem:[#allocation98_spill] sm:$0xff] %v2877_v35  ;;  %v486_v35 = vld [vmem:[%s2490_s8 + $0x1a0] sm:$0xff] }
 0x125   : > { %6294 = vst [vmem:[#allocation99_spill] sm:$0xff] %v2881_v8  ;;  %v2897_v8 = vld [vmem:[%s2497_s24 + $0x190] sm:$0xff] }
 0x126   : > { %6295 = vst [vmem:[#allocation100_spill] sm:$0xff] %v2885_v51  ;;  %v2926_v51 = vld [vmem:[%s2497_s24 + $0x1b8] sm:$0xff] }
 0x127   : > { %6296 = vst [vmem:[#allocation101_spill] sm:$0xff] %v2894_v14 }
 0x128   : > { %6297 = vst [vmem:[#allocation102_spill] sm:$0xff] %v2897_v8 }
 0x129   : > { %6298 = vst [vmem:[#allocation103_spill] sm:$0xff] %v2900_v19 }
 0x12a   : > { %6299 = vst [vmem:[#allocation104_spill] sm:$0xff] %v2903_v13 }
 0x12b   : > { %6300 = vst [vmem:[#allocation105_spill] sm:$0xff] %v2907_v7  ;;  %v2920_v7 = vld [vmem:[%s2497_s24 + $0x1a8] sm:$0xff] }
 0x12c   : > { %6301 = vst [vmem:[#allocation106_spill] sm:$0xff] %v2920_v7 }
 0x12d   : > { %6302 = vst [vmem:[#allocation107_spill] sm:$0xff] %v2923_v52 }
 0x12e   : > { %6303 = vst [vmem:[#allocation108_spill] sm:$0xff] %v2926_v51 }
 0x12f   : > { %6304 = vst [vmem:[#allocation109_spill] sm:$0xff] %v2929_v55 }
 0x130   : > { %6305 = vst [vmem:[#allocation110_spill] sm:$0xff] %v2933_v10  ;;  %v2992_v10 = vsub.f32 %v2821_v3, %v2833_v37  ;;  %v3014_v3 = vsub.f32 %v480_v6, %v2858_v29  ;;  %v3035_v6 = vsub.f32 %v483_v53, %v2894_v14  ;;  %v3056_v53 = vld [vmem:[%s2503_s6 + $0xe0] sm:$0xff]  ;;  %v6432_v29 = vld [vmem:[#allocation24_spill] sm:$0xff] }
 0x131   : > { %6306 = vst [vmem:[#allocation111_spill] sm:$0xff] %v2937_v46  ;;  %v2958_v46 = vld [vmem:[%s2503_s6 + $0x60] sm:$0xff] }
 0x132   : > { %6307 = vst [vmem:[#allocation112_spill] sm:$0xff] %v2941_v56  ;;  %v2988_v56 = vsub.f32 %v2818_v11, %v2830_v5  ;;  %v3011_v11 = vsub.f32 %v479_v62, %v2855_v0  ;;  %v3032_v62 = vld [vmem:[%s2503_s6 + $0xc0] sm:$0xff] }
 0x133   : > { %6308 = vst [vmem:[#allocation113_spill] sm:$0xff] %v2949_v42 }
 0x134   : > { %6309 = vst [vmem:[#allocation114_spill] sm:$0xff] %v2952_v21 }
 0x135   : > { %6310 = vst [vmem:[#allocation115_spill] sm:$0xff] %v2955_v22 }
 0x136   : > { %6311 = vst [vmem:[#allocation116_spill] sm:$0xff] %v2962_v43  ;;  %v2996_v43 = vsub.f32 %v2824_v4, %v2836_v58  ;;  %v3017_v4 = vsub.f32 %v481_v61, %v2861_v2  ;;  %v3038_v61 = vsub.f32 %v484_v49, %v2897_v8  ;;  %v3059_v49 = vsub.f32 %v487_v28, %v2920_v7  ;;  %v3080_v28 = vld [vmem:[%s2503_s6 + $0x100] sm:$0xff]  ;;  %v6418_v8 = vld [vmem:[#allocation22_spill] sm:$0xff] }
 0x137   : > { %6312 = vst [vmem:[#allocation117_spill] sm:$0xff] %v2977_v45  ;;  %v3148_v45 = vld [vmem:[%s2503_s6 + $0x158] sm:$0xff]  ;;  %v6390_v7 = vld [vmem:[#allocation15_spill] sm:$0xff]  ;;  %v6437_v58 = vsub.f32 %v2562_v26, %v2958_v46  ;;  %v6443_v26 = vsub.f32 %v2572_v32, %v2974_v18 }
 0x138   : > { %6313 = vst [vmem:[#allocation118_spill] sm:$0xff] %v2980_v59  ;;  %v3128_v59 = vld [vmem:[%s2503_s6 + $0x138] sm:$0xff]  ;;  %v3407_v32 = vld [vmem:[%s2505_s14 + $0x60] sm:$0xff] }
 0x139   : > { %6314 = vst [vmem:[#allocation119_spill] sm:$0xff] %v2984_v17  ;;  %v3008_v17 = vld [vmem:[%s2503_s6 + $0xa0] sm:$0xff]  ;;  %v6423_v2 = vld [vmem:[#allocation90_spill] sm:$0xff] }
 0x13a   : > { %6315 = vst [vmem:[#allocation120_spill] sm:$0xff] %v2988_v56  ;;  %v3026_v56 = vld [vmem:[%s2503_s6 + $0xb0] sm:$0xff]  ;;  %v3404_v18 = vld [vmem:[%s2505_s14 + $0x58] sm:$0xff] }
 0x13b   : > { %6316 = vst [vmem:[#allocation121_spill] sm:$0xff] %v2992_v10  ;;  %v3023_v10 = vld [vmem:[%s2503_s6 + $0xa8] sm:$0xff] }
 0x13c   : > { %6317 = vst [vmem:[#allocation122_spill] sm:$0xff] %v2996_v43  ;;  %v3020_v43 = vsub.f32 %v482_v60, %v2864_v54  ;;  %v3041_v60 = vsub.f32 %v485_v1, %v2900_v19  ;;  %v3062_v1 = vsub.f32 %v488_v27, %v2923_v52  ;;  %v3083_v27 = vsub.f32 %v491_v47, %v2949_v42  ;;  %v6355_v47 = vld [vmem:[#allocation31_spill] sm:$0xff]  ;;  %v6414_v19 = vld [vmem:[#allocation21_spill] sm:$0xff]  ;;  %v6421_v54 = vld [vmem:[#allocation44_spill] sm:$0xff] }
 0x13d   : > { %6318 = vst [vmem:[#allocation123_spill] sm:$0xff] %v2999_v9  ;;  %v6361_v9 = vld [vmem:[#allocation39_spill] sm:$0xff] }
 0x13e   : > { %6319 = vst [vmem:[#allocation124_spill] sm:$0xff] %v3002_v25  ;;  %v3185_v25 = vld [vmem:[%s2503_s6 + $0x190] sm:$0xff]  ;;  %v6406_v52 = vld [vmem:[#allocation19_spill] sm:$0xff] }
 0x13f   : > { %6320 = vst [vmem:[#allocation125_spill] sm:$0xff] %v3005_v20  ;;  %v3199_v20 = vld [vmem:[%s2503_s6 + $0x1a0] sm:$0xff] }
 0x140   : > { %6321 = vst [vmem:[#allocation126_spill] sm:$0xff] %v3008_v17  ;;  %v3145_v17 = vld [vmem:[%s2503_s6 + $0x150] sm:$0xff] }
 0x141   : > { %6322 = vst [vmem:[#allocation127_spill] sm:$0xff] %v3011_v11  ;;  %v3053_v11 = vld [vmem:[%s2503_s6 + $0xd8] sm:$0xff] }
 0x142   : > { %6323 = vst [vmem:[#allocation128_spill] sm:$0xff] %v3014_v3  ;;  %v3050_v3 = vld [vmem:[%s2503_s6 + $0xd0] sm:$0xff] }
 0x143   : > { %6324 = vst [vmem:[#allocation129_spill] sm:$0xff] %v3017_v4  ;;  %v3047_v4 = vld [vmem:[%s2503_s6 + $0xc8] sm:$0xff] }
 0x144   : > { %6325 = vst [vmem:[#allocation130_spill] sm:$0xff] %v3020_v43  ;;  %v3044_v43 = vsub.f32 %v486_v35, %v2903_v13  ;;  %v3065_v35 = vsub.f32 %v489_v48, %v2926_v51  ;;  %v3086_v48 = vsub.f32 %v492_v16, %v2952_v21  ;;  %v3168_v16 = vld [vmem:[%s2503_s6 + $0x178] sm:$0xff]  ;;  %v6399_v21 = vld [vmem:[#allocation69_spill] sm:$0xff] }
 0x145   : > { %6326 = vst [vmem:[#allocation131_spill] sm:$0xff] %v3023_v10  ;;  %v6368_v10 = vld [vmem:[#allocation47_spill] sm:$0xff]  ;;  %v6405_v51 = vld [vmem:[#allocation37_spill] sm:$0xff] }
 0x146   : > { %6327 = vst [vmem:[#allocation132_spill] sm:$0xff] %v3026_v56  ;;  %v3202_v56 = vld [vmem:[%s2503_s6 + $0x1a8] sm:$0xff] }
 0x147   : > { %6328 = vst [vmem:[#allocation133_spill] sm:$0xff] %v3029_v30  ;;  %v3216_v30 = vld [vmem:[%s2503_s6 + $0x1b8] sm:$0xff] }
 0x148   : > { %6329 = vst [vmem:[#allocation134_spill] sm:$0xff] %v3032_v62  ;;  %v3162_v62 = vld [vmem:[%s2503_s6 + $0x168] sm:$0xff]  ;;  %v6473_v37 = vld [vmem:[#allocation126_spill] sm:$0xff] }
 0x149   : > { %6330 = vst [vmem:[#allocation135_spill] sm:$0xff] %v3035_v6  ;;  %v3077_v6 = vld [vmem:[%s2503_s6 + $0xf8] sm:$0xff] }
 0x14a   : > { %6331 = vst [vmem:[#allocation136_spill] sm:$0xff] %v3038_v61  ;;  %v3074_v61 = vld [vmem:[%s2503_s6 + $0xf0] sm:$0xff] }
 0x14b   : > { %6332 = vst [vmem:[#allocation137_spill] sm:$0xff] %v3041_v60  ;;  %v3071_v60 = vld [vmem:[%s2503_s6 + $0xe8] sm:$0xff] }
 0x14c   : > { %6333 = vst [vmem:[#allocation138_spill] sm:$0xff] %v3044_v43  ;;  %v3068_v43 = vsub.f32 %v490_v12, %v2929_v55  ;;  %v3089_v12 = vsub.f32 %v493_v15, %v2955_v22  ;;  %v3182_v15 = vld [vmem:[%s2503_s6 + $0x188] sm:$0xff]  ;;  %v6402_v22 = vld [vmem:[#allocation18_spill] sm:$0xff] }
 0x14d   : > { %6334 = vst [vmem:[#allocation139_spill] sm:$0xff] %v3047_v4  ;;  %v6375_v4 = vld [vmem:[#allocation59_spill] sm:$0xff] }
 0x14e   : > { %6335 = vst [vmem:[#allocation140_spill] sm:$0xff] %v3050_v3  ;;  %v6376_v3 = vld [vmem:[#allocation60_spill] sm:$0xff] }
 0x14f   : > { %6336 = vst [vmem:[#allocation141_spill] sm:$0xff] %v3053_v11  ;;  %v3219_v11 = vld [vmem:[%s2503_s6 + $0x1c0] sm:$0xff] }
 0x150   : > { %6337 = vst [vmem:[#allocation142_spill] sm:$0xff] %v3056_v53  ;;  %v3179_v53 = vld [vmem:[%s2503_s6 + $0x180] sm:$0xff] }
 0x151   : > { %6338 = vst [vmem:[#allocation143_spill] sm:$0xff] %v3059_v49  ;;  %v3100_v49 = vld [vmem:[%s2503_s6 + $0x118] sm:$0xff] }
 0x152   : > { %6339 = vst [vmem:[#allocation144_spill] sm:$0xff] %v3062_v1  ;;  %v3097_v1 = vld [vmem:[%s2503_s6 + $0x110] sm:$0xff] }
 0x153   : > { %6340 = vst [vmem:[#allocation145_spill] sm:$0xff] %v3065_v35  ;;  %v3094_v35 = vld [vmem:[%s2503_s6 + $0x108] sm:$0xff] }
 0x154   : > { %6341 = vst [vmem:[#allocation146_spill] sm:$0xff] %v3068_v43  ;;  %v3233_v43 = vld [vmem:[%s2503_s6 + $0x1d0] sm:$0xff] }
 0x155   : > { %6342 = vst [vmem:[#allocation147_spill] sm:$0xff] %v3071_v60 }
 0x156   : > { %6343 = vst [vmem:[#allocation148_spill] sm:$0xff] %v3074_v61  ;;  %v6391_v61 = vld [vmem:[#allocation62_spill] sm:$0xff] }
 0x157   : > { %6344 = vst [vmem:[#allocation149_spill] sm:$0xff] %v3077_v6  ;;  %v6382_v6 = vld [vmem:[#allocation75_spill] sm:$0xff] }
 0x158   : > { %6345 = vst [vmem:[#allocation150_spill] sm:$0xff] %v3080_v28  ;;  %v3196_v28 = vld [vmem:[%s2503_s6 + $0x198] sm:$0xff] }
 0x159   : > { %6346 = vst [vmem:[#allocation151_spill] sm:$0xff] %v3083_v27  ;;  %v3117_v27 = vld [vmem:[%s2503_s6 + $0x130] sm:$0xff] }
 0x15a   : > { %6347 = vst [vmem:[#allocation152_spill] sm:$0xff] %v3086_v48  ;;  %v3114_v48 = vld [vmem:[%s2503_s6 + $0x128] sm:$0xff] }
 0x15b   : > { %6348 = vst [vmem:[#allocation153_spill] sm:$0xff] %v3089_v12  ;;  %v3111_v12 = vld [vmem:[%s2503_s6 + $0x120] sm:$0xff] }
 0x15c   : > { %6349 = vst [vmem:[#allocation154_spill] sm:$0xff] %v3097_v1  ;;  %v6397_v1 = vld [vmem:[#allocation35_spill] sm:$0xff] }
 0x15d   : > { %6350 = vst [vmem:[#allocation155_spill] sm:$0xff] %v3100_v49 }
 0x15e   : > { %6351 = vst [vmem:[#allocation156_spill] sm:$0xff] %v3111_v12  ;;  %v3213_v12 = vld [vmem:[%s2503_s6 + $0x1b0] sm:$0xff] }
 0x15f   : > { %6353 = vst [vmem:[#allocation157_spill] sm:$0xff] %v3128_v59  ;;  %v3230_v59 = vld [vmem:[%s2503_s6 + $0x1c8] sm:$0xff] }
 0x160   : > { %6354 = vst [vmem:[#allocation158_spill] sm:$0xff] %v3131_v34  ;;  %v3236_v34 = vld [vmem:[%s2503_s6 + $0x1d8] sm:$0xff] }
 0x161   : > { %6359 = vst [vmem:[#allocation31_spill] sm:$0xff] %v3148_v45  ;;  %v6472_v45 = vld [vmem:[#allocation29_spill] sm:$0xff] }
 0x162   : > { %6360 = vst [vmem:[#allocation159_spill] sm:$0xff] %v3151_v40  ;;  %v6393_v40 = vld [vmem:[#allocation34_spill] sm:$0xff] }
 0x163   : > { %6365 = vst [vmem:[#allocation39_spill] sm:$0xff] %v3162_v62  ;;  %v6433_v62 = vld [vmem:[#allocation97_spill] sm:$0xff] }
 0x164   : > { %6366 = vst [vmem:[#allocation160_spill] sm:$0xff] %v3165_v41  ;;  %v6434_v0 = vsub.f32 %v6432_v29, %v6433_v62  ;;  %v6440_v29 = vsub.f32 %v2569_v31, %v2971_v57  ;;  %v6442_v62 = vld [vmem:[#allocation56_spill] sm:$0xff]  ;;  %v3401_v57 = vld [vmem:[%s2505_s14 + $0x50] sm:$0xff] }
 0x165   : > { %6367 = vst [vmem:[#allocation161_spill] sm:$0xff] %v3168_v16  ;;  %v6422_v16 = vld [vmem:[#allocation23_spill] sm:$0xff]  ;;  %v3386_v46 = vmul.f32 %v6443_v26, %v6442_v62  ;;  %v6467_v62 = vld [vmem:[#allocation28_spill] sm:$0xff] }
 0x166   : > { %6372 = vst [vmem:[#allocation47_spill] sm:$0xff] %v3179_v53  ;;  %v6424_v41 = vsub.f32 %v6422_v16, %v6423_v2  ;;  %v6428_v2 = vld [vmem:[#allocation96_spill] sm:$0xff] }
 0x167   : > { %6373 = vst [vmem:[#allocation162_spill] sm:$0xff] %v3182_v15  ;;  %v6419_v15 = vld [vmem:[#allocation84_spill] sm:$0xff]  ;;  %v6429_v16 = vsub.f32 %v2556_v24, %v6428_v2  ;;  %v3371_v24 = vld [vmem:[%s2505_s14 + $0x40] sm:$0xff] }
 0x168   : > { %6374 = vst [vmem:[#allocation163_spill] sm:$0xff] %v3185_v25  ;;  %v6417_v25 = vld [vmem:[#allocation43_spill] sm:$0xff]  ;;  %v6420_v14 = vsub.f32 %v6418_v8, %v6419_v15  ;;  %v6426_v8 = vsub.f32 %v2553_v23, %v2867_v63  ;;  %v6427_v15 = vld [vmem:[#allocation49_spill] sm:$0xff]  ;;  %v3368_v63 = vld [vmem:[%s2505_s14 + $0x38] sm:$0xff] }
 0x169   : > { %6379 = vst [vmem:[#allocation59_spill] sm:$0xff] %v3196_v28  ;;  %v6413_v28 = vld [vmem:[#allocation42_spill] sm:$0xff]  ;;  %v6439_v2 = vld [vmem:[#allocation55_spill] sm:$0xff] }
 0x16a   : > { %6380 = vst [vmem:[#allocation60_spill] sm:$0xff] %v3199_v20  ;;  %v6407_v20 = vld [vmem:[#allocation76_spill] sm:$0xff]  ;;  %v3326_v53 = vmul.f32 %v6420_v14, %v6417_v25  ;;  %v6436_v25 = vld [vmem:[#allocation51_spill] sm:$0xff] }
 0x16b   : > { %6381 = vst [vmem:[#allocation164_spill] sm:$0xff] %v3202_v56  ;;  %v6389_v56 = vld [vmem:[#allocation30_spill] sm:$0xff]  ;;  %v6408_v13 = vsub.f32 %v6406_v52, %v6407_v20  ;;  %v6415_v52 = vld [vmem:[#allocation83_spill] sm:$0xff]  ;;  %v3365_v23 = vmul.f32 %v6437_v58, %v6436_v25  ;;  %v6445_v58 = vld [vmem:[#allocation57_spill] sm:$0xff] }
 0x16c   : > { %6383 = vst [vmem:[#allocation75_spill] sm:$0xff] %v3213_v12  ;;  %v6392_v12 = vsub.f32 %v6390_v7, %v6391_v61  ;;  %v6403_v7 = vld [vmem:[#allocation70_spill] sm:$0xff]  ;;  %v6416_v20 = vsub.f32 %v6414_v19, %v6415_v52  ;;  %v3338_v19 = vld [vmem:[%s2505_s14 + $0x28] sm:$0xff]  ;;  %v6447_v25 = vld [vmem:[#allocation117_spill] sm:$0xff] }
 0x16d   : > { %6384 = vst [vmem:[#allocation165_spill] sm:$0xff] %v3216_v30  ;;  %v3275_v30 = vld [vmem:[%s2505_s14] sm:$0xff]  ;;  %v6404_v61 = vsub.f32 %v6402_v22, %v6403_v7  ;;  %v6411_v22 = vld [vmem:[#allocation82_spill] sm:$0xff]  ;;  %v6425_v52 = vld [vmem:[#allocation48_spill] sm:$0xff] }
 0x16e   : > { %6385 = vst [vmem:[#allocation166_spill] sm:$0xff] %v3219_v11  ;;  %v3272_v49 = vmul.f32 %v6392_v12, %v6389_v56  ;;  %v6394_v11 = vld [vmem:[#allocation16_spill] sm:$0xff]  ;;  %v3347_v14 = vmul.f32 %v6426_v8, %v6425_v52  ;;  %v6450_v52 = vld [vmem:[#allocation58_spill] sm:$0xff] }
 0x16f   : > { %6386 = vst [vmem:[#allocation167_spill] sm:$0xff] %v3230_v59  ;;  %v6396_v59 = vsub.f32 %v6394_v11, %v6395_v50  ;;  %v3299_v50 = vmul.f32 %v6408_v13, %v6405_v51  ;;  %v6410_v11 = vld [vmem:[#allocation20_spill] sm:$0xff]  ;;  %v3320_v13 = vmul.f32 %v6416_v20, %v6413_v28  ;;  %v6431_v20 = vld [vmem:[#allocation50_spill] sm:$0xff] }
 0x170   : > { %6387 = vst [vmem:[#allocation168_spill] sm:$0xff] %v3233_v43  ;;  %v6398_v43 = vld [vmem:[#allocation17_spill] sm:$0xff]  ;;  %v6412_v7 = vsub.f32 %v6410_v11, %v6411_v22  ;;  %v3332_v11 = vmul.f32 %v6424_v41, %v6421_v54  ;;  %v3335_v22 = vld [vmem:[%s2505_s14 + $0x20] sm:$0xff]  ;;  %v3353_v41 = vmul.f32 %v6429_v16, %v6427_v15  ;;  %v3359_v54 = vmul.f32 %v6434_v0, %v6431_v20  ;;  %v3374_v8 = vld [vmem:[%s2505_s14 + $0x48] sm:$0xff] }
 0x171   : > { %6388 = vst [vmem:[#allocation169_spill] sm:$0xff] %v3236_v34  ;;  %v3281_v42 = vmul.f32 %v6396_v59, %v6393_v40  ;;  %v6400_v55 = vsub.f32 %v6398_v43, %v6399_v21  ;;  %v6401_v34 = vld [vmem:[#allocation36_spill] sm:$0xff]  ;;  %v3305_v21 = vld [vmem:[%s2505_s14 + $0x10] sm:$0xff]  ;;  %v3380_v0 = vmul.f32 %v6440_v29, %v6439_v2  ;;  %v6451_v28 = vld [vmem:[#allocation26_spill] sm:$0xff] }
 0x172   : > { %v3293_v12 = vmul.f32 %v6404_v61, %v6401_v34  ;;  %v3302_v59 = vld [vmem:[%s2505_s14 + $0x8] sm:$0xff]  ;;  %v6409_v43 = vld [vmem:[#allocation41_spill] sm:$0xff]  ;;  %6430 = vst [vmem:[#allocation15_spill] sm:$0xff] %v3353_v41  ;;  %v6457_v29 = vld [vmem:[#allocation63_spill] sm:$0xff]  ;;  %v6474_v34 = vsub.f32 %v6472_v45, %v6473_v37 }
 0x173   : > { %v3287_v60 = vmul.f32 %v6400_v55, %v6397_v1  ;;  %v3308_v55 = vld [vmem:[%s2505_s14 + $0x18] sm:$0xff]  ;;  %v3314_v61 = vmul.f32 %v6412_v7, %v6409_v43  ;;  %v3341_v7 = vld [vmem:[%s2505_s14 + $0x30] sm:$0xff]  ;;  %6435 = vst [vmem:[#allocation62_spill] sm:$0xff] %v3359_v54  ;;  %v6485_v37 = vld [vmem:[#allocation132_spill] sm:$0xff] }
 0x174   : > { %6438 = vst [vmem:[#allocation16_spill] sm:$0xff] %v3365_v23  ;;  %v6446_v16 = vld [vmem:[#allocation25_spill] sm:$0xff]  ;;  %v6452_v43 = vld [vmem:[#allocation118_spill] sm:$0xff]  ;;  %v6511_v1 = vld [vmem:[#allocation40_spill] sm:$0xff] }
 0x175   : > { %6441 = vst [vmem:[#allocation68_spill] sm:$0xff] %v3380_v0  ;;  %v6448_v20 = vsub.f32 %v6446_v16, %v6447_v25  ;;  %v6453_v51 = vsub.f32 %v6451_v28, %v6452_v43  ;;  %v6458_v25 = vld [vmem:[#allocation123_spill] sm:$0xff]  ;;  %v6461_v16 = vld [vmem:[#allocation64_spill] sm:$0xff]  ;;  %v6468_v2 = vld [vmem:[#allocation125_spill] sm:$0xff] }
 0x176   : > { %6444 = vst [vmem:[#allocation17_spill] sm:$0xff] %v3386_v46  ;;  %v6463_v28 = vld [vmem:[#allocation124_spill] sm:$0xff]  ;;  %v6471_v46 = vld [vmem:[#allocation66_spill] sm:$0xff]  ;;  %v6517_v23 = vld [vmem:[#allocation79_spill] sm:$0xff] }
 0x177   : > { %v3392_v15 = vmul.f32 %v6448_v20, %v6445_v58  ;;  %v3398_v31 = vmul.f32 %v6453_v51, %v6450_v52  ;;  %6455 = vst [vmem:[#allocation70_spill] sm:$0xff] %v3404_v18  ;;  %v6459_v20 = vsub.f32 %v2585_v39, %v6458_v25  ;;  %v6462_v58 = vld [vmem:[#allocation27_spill] sm:$0xff]  ;;  %v6466_v52 = vld [vmem:[#allocation65_spill] sm:$0xff]  ;;  %v3431_v39 = vmul.f32 %v6474_v34, %v6471_v46  ;;  %v3434_v25 = vld [vmem:[%s2505_s14 + $0x68] sm:$0xff] }
 0x178   : > { %6456 = vst [vmem:[#allocation19_spill] sm:$0xff] %v3407_v32  ;;  %v6464_v43 = vsub.f32 %v6462_v58, %v6463_v28  ;;  %v3437_v58 = vld [vmem:[%s2505_s14 + $0x70] sm:$0xff]  ;;  %v6479_v28 = vld [vmem:[#allocation71_spill] sm:$0xff]  ;;  %v3522_v0 = vld [vmem:[%s2505_s14 + $0xd8] sm:$0xff] }
 0x179   : > { %6449 = vst [vmem:[#allocation69_spill] sm:$0xff] %v3392_v15  ;;  %v3413_v26 = vmul.f32 %v6459_v20, %v6457_v29  ;;  %v3440_v20 = vld [vmem:[%s2505_s14 + $0x78] sm:$0xff]  ;;  %v6488_v46 = vld [vmem:[#allocation73_spill] sm:$0xff]  ;;  %v6525_v40 = vld [vmem:[#allocation80_spill] sm:$0xff] }
 0x17a   : > { %6454 = vst [vmem:[#allocation18_spill] sm:$0xff] %v3398_v31  ;;  %v3419_v51 = vmul.f32 %v6464_v43, %v6461_v16  ;;  %v6469_v31 = vsub.f32 %v6467_v62, %v6468_v2  ;;  %v6480_v2 = vld [vmem:[#allocation131_spill] sm:$0xff]  ;;  %v6483_v43 = vld [vmem:[#allocation72_spill] sm:$0xff]  ;;  %v6489_v16 = vld [vmem:[#allocation33_spill] sm:$0xff] }
 0x17b   : > { %6460 = vst [vmem:[#allocation76_spill] sm:$0xff] %v3413_v26  ;;  %v6481_v62 = vsub.f32 %v6355_v47, %v6480_v2  ;;  %v6490_v29 = vld [vmem:[#allocation133_spill] sm:$0xff]  ;;  %v3462_v26 = vld [vmem:[%s2505_s14 + $0x80] sm:$0xff]  ;;  %v3465_v47 = vld [vmem:[%s2505_s14 + $0x88] sm:$0xff] }
 0x17c   : > { %6465 = vst [vmem:[#allocation20_spill] sm:$0xff] %v3419_v51  ;;  %v3425_v15 = vmul.f32 %v6469_v31, %v6466_v52  ;;  %v6484_v52 = vld [vmem:[#allocation32_spill] sm:$0xff]  ;;  %v3468_v2 = vld [vmem:[%s2505_s14 + $0x90] sm:$0xff]  ;;  %v3480_v51 = vld [vmem:[%s2505_s14 + $0x98] sm:$0xff] }
 0x17d   : > { %6475 = vst [vmem:[#allocation21_spill] sm:$0xff] %v3431_v39  ;;  %v3446_v31 = vmul.f32 %v6481_v62, %v6479_v28  ;;  %v6486_v45 = vsub.f32 %v6484_v52, %v6485_v37  ;;  %v6491_v39 = vsub.f32 %v6489_v16, %v6490_v29  ;;  %v6496_v52 = vld [vmem:[#allocation74_spill] sm:$0xff]  ;;  %v3486_v28 = vld [vmem:[%s2505_s14 + $0xa8] sm:$0xff]  ;;  %v6518_v54 = vld [vmem:[#allocation45_spill] sm:$0xff] }
 0x17e   : > { %6470 = vst [vmem:[#allocation82_spill] sm:$0xff] %v3425_v15  ;;  %v6497_v62 = vld [vmem:[#allocation38_spill] sm:$0xff]  ;;  %v3540_v41 = vld [vmem:[%s2505_s14 + $0xf0] sm:$0xff]  ;;  %v3558_v32 = vld [vmem:[%s2505_s14 + $0x108] sm:$0xff] }
 0x17f   : > { %6476 = vst [vmem:[#allocation83_spill] sm:$0xff] %v3434_v25  ;;  %v3452_v34 = vmul.f32 %v6486_v45, %v6483_v43  ;;  %v3458_v15 = vmul.f32 %v6491_v39, %v6488_v46  ;;  %v6498_v37 = vld [vmem:[#allocation134_spill] sm:$0xff]  ;;  %v3483_v46 = vld [vmem:[%s2505_s14 + $0xa0] sm:$0xff]  ;;  %v6533_v18 = vld [vmem:[#allocation85_spill] sm:$0xff] }
 0x180   : > { %6477 = vst [vmem:[#allocation22_spill] sm:$0xff] %v3437_v58  ;;  %v6499_v45 = vsub.f32 %v6497_v62, %v6498_v37  ;;  %v6505_v62 = vld [vmem:[#allocation139_spill] sm:$0xff]  ;;  %v6526_v56 = vld [vmem:[#allocation46_spill] sm:$0xff]  ;;  %v6541_v25 = vld [vmem:[#allocation52_spill] sm:$0xff] }
 0x181   : > { %6478 = vst [vmem:[#allocation84_spill] sm:$0xff] %v3440_v20  ;;  %v6506_v37 = vsub.f32 %v6361_v9, %v6505_v62  ;;  %v6512_v9 = vld [vmem:[#allocation140_spill] sm:$0xff]  ;;  %v3576_v20 = vld [vmem:[%s2505_s14 + $0x120] sm:$0xff]  ;;  %v6540_v58 = vld [vmem:[#allocation86_spill] sm:$0xff] }
 0x182   : > { %6482 = vst [vmem:[#allocation23_spill] sm:$0xff] %v3446_v31  ;;  %v3474_v43 = vmul.f32 %v6499_v45, %v6496_v52  ;;  %v3498_v52 = vld [vmem:[%s2505_s14 + $0xb0] sm:$0xff]  ;;  %v6510_v31 = vld [vmem:[#allocation78_spill] sm:$0xff]  ;;  %v6513_v62 = vsub.f32 %v6511_v1, %v6512_v9 }
 0x183   : > { %6487 = vst [vmem:[#allocation90_spill] sm:$0xff] %v3452_v34  ;;  %v3504_v34 = vld [vmem:[%s2505_s14 + $0xc0] sm:$0xff]  ;;  %v6519_v1 = vld [vmem:[#allocation141_spill] sm:$0xff]  ;;  %v3696_v39 = vld [vmem:[%s2505_s14 + $0x1b8] sm:$0xff] }
 0x184   : > { %6492 = vst [vmem:[#allocation96_spill] sm:$0xff] %v3458_v15  ;;  %v6504_v15 = vld [vmem:[#allocation77_spill] sm:$0xff]  ;;  %v6520_v9 = vsub.f32 %v6518_v54, %v6519_v1  ;;  %v6527_v54 = vld [vmem:[#allocation142_spill] sm:$0xff] }
 0x185   : > { %6493 = vst [vmem:[#allocation24_spill] sm:$0xff] %v3462_v26  ;;  %v3492_v45 = vmul.f32 %v6506_v37, %v6504_v15  ;;  %v3510_v37 = vmul.f32 %v6513_v62, %v6510_v31  ;;  %v3516_v15 = vld [vmem:[%s2505_s14 + $0xc8] sm:$0xff]  ;;  %v3534_v31 = vld [vmem:[%s2505_s14 + $0xe0] sm:$0xff]  ;;  %v6528_v1 = vsub.f32 %v6526_v56, %v6527_v54  ;;  %v6547_v26 = vld [vmem:[#allocation53_spill] sm:$0xff] }
 0x186   : > { %6494 = vst [vmem:[#allocation97_spill] sm:$0xff] %v3465_v47  ;;  %v3528_v62 = vmul.f32 %v6520_v9, %v6517_v23  ;;  %v3552_v23 = vld [vmem:[%s2505_s14 + $0xf8] sm:$0xff]  ;;  %v6534_v56 = vld [vmem:[#allocation147_spill] sm:$0xff]  ;;  %v3642_v29 = vld [vmem:[%s2505_s14 + $0x170] sm:$0xff] }
 0x187   : > { %6495 = vst [vmem:[#allocation25_spill] sm:$0xff] %v3468_v2  ;;  %v3546_v9 = vmul.f32 %v6528_v1, %v6525_v40  ;;  %v6535_v54 = vsub.f32 %v6368_v10, %v6534_v56  ;;  %v3570_v40 = vld [vmem:[%s2505_s14 + $0x110] sm:$0xff]  ;;  %v6542_v10 = vld [vmem:[#allocation148_spill] sm:$0xff]  ;;  %v3594_v2 = vld [vmem:[%s2505_s14 + $0x138] sm:$0xff] }
 0x188   : > { %6500 = vst [vmem:[#allocation117_spill] sm:$0xff] %v3474_v43  ;;  %v3501_v43 = vld [vmem:[%s2505_s14 + $0xb8] sm:$0xff]  ;;  %v6543_v56 = vsub.f32 %v6541_v25, %v6542_v10  ;;  %v6546_v47 = vld [vmem:[#allocation87_spill] sm:$0xff]  ;;  %v6548_v25 = vld [vmem:[#allocation149_spill] sm:$0xff] }
 0x189   : > { %6501 = vst [vmem:[#allocation26_spill] sm:$0xff] %v3480_v51  ;;  %v3564_v1 = vmul.f32 %v6535_v54, %v6533_v18  ;;  %v3588_v18 = vld [vmem:[%s2505_s14 + $0x128] sm:$0xff]  ;;  %v6549_v10 = vsub.f32 %v6547_v26, %v6548_v25  ;;  %v6554_v51 = vld [vmem:[#allocation54_spill] sm:$0xff]  ;;  %v3714_v16 = vld [vmem:[%s2505_s14 + $0x1d0] sm:$0xff] }
 0x18a   : > { %6502 = vst [vmem:[#allocation118_spill] sm:$0xff] %v3483_v46  ;;  %v3582_v54 = vmul.f32 %v6543_v56, %v6540_v58  ;;  %v3606_v58 = vld [vmem:[%s2505_s14 + $0x140] sm:$0xff]  ;;  %v6555_v26 = vld [vmem:[#allocation150_spill] sm:$0xff] }
 0x18b   : > { %6503 = vst [vmem:[#allocation123_spill] sm:$0xff] %v3486_v28  ;;  %v3600_v56 = vmul.f32 %v6549_v10, %v6546_v47  ;;  %v3612_v28 = vld [vmem:[%s2505_s14 + $0x150] sm:$0xff]  ;;  %v6553_v46 = vld [vmem:[#allocation91_spill] sm:$0xff]  ;;  %v6556_v25 = vsub.f32 %v6554_v51, %v6555_v26  ;;  %v3624_v47 = vld [vmem:[%s2505_s14 + $0x158] sm:$0xff]  ;;  %v6562_v51 = vsub.f32 %v6375_v4, %v3094_v35 }
 0x18c   : > { %6507 = vst [vmem:[#allocation27_spill] sm:$0xff] %v3492_v45  ;;  %v3519_v45 = vld [vmem:[%s2505_s14 + $0xd0] sm:$0xff]  ;;  %v6568_v4 = vld [vmem:[#allocation154_spill] sm:$0xff] }
 0x18d   : > { %6508 = vst [vmem:[#allocation124_spill] sm:$0xff] %v3501_v43  ;;  %v3618_v10 = vmul.f32 %v6556_v25, %v6553_v46  ;;  %v6561_v43 = vld [vmem:[#allocation98_spill] sm:$0xff]  ;;  %v6569_v35 = vsub.f32 %v6376_v3, %v6568_v4  ;;  %v6576_v3 = vld [vmem:[#allocation155_spill] sm:$0xff] }
 0x18e   : > { %6509 = vst [vmem:[#allocation28_spill] sm:$0xff] %v3504_v34  ;;  %v3630_v34 = vld [vmem:[%s2505_s14 + $0x168] sm:$0xff]  ;;  %v3636_v26 = vmul.f32 %v6562_v51, %v6561_v43  ;;  %v3645_v46 = vld [vmem:[%s2505_s14 + $0x178] sm:$0xff] }
 0x18f   : > { %6514 = vst [vmem:[#allocation125_spill] sm:$0xff] %v3510_v37  ;;  %v3537_v37 = vld [vmem:[%s2505_s14 + $0xe8] sm:$0xff]  ;;  %v3717_v25 = vld [vmem:[%s2505_s14 + $0x1d8] sm:$0xff] }
 0x190   : > { %6515 = vst [vmem:[#allocation29_spill] sm:$0xff] %v3519_v45  ;;  %v3660_v43 = vld [vmem:[%s2505_s14 + $0x188] sm:$0xff] }
 0x191   : > { %6516 = vst [vmem:[#allocation126_spill] sm:$0xff] %v3522_v0  ;;  %v6567_v0 = vld [vmem:[#allocation99_spill] sm:$0xff]  ;;  %v6584_v45 = vld [vmem:[#allocation156_spill] sm:$0xff] }
 0x192   : > { %6521 = vst [vmem:[#allocation131_spill] sm:$0xff] %v3528_v62  ;;  %v3555_v62 = vld [vmem:[%s2505_s14 + $0x100] sm:$0xff]  ;;  %v3654_v51 = vmul.f32 %v6569_v35, %v6567_v0 }
 0x193   : > { %6522 = vst [vmem:[#allocation32_spill] sm:$0xff] %v3534_v31  ;;  %v6575_v31 = vld [vmem:[#allocation61_spill] sm:$0xff]  ;;  %v3678_v0 = vld [vmem:[%s2505_s14 + $0x1a0] sm:$0xff] }
 0x194   : > { %6523 = vst [vmem:[#allocation132_spill] sm:$0xff] %v3537_v37  ;;  %v6574_v37 = vld [vmem:[#allocation100_spill] sm:$0xff]  ;;  %v6577_v4 = vsub.f32 %v6575_v31, %v6576_v3 }
 0x195   : > { %6524 = vst [vmem:[#allocation33_spill] sm:$0xff] %v3540_v41  ;;  %v3663_v41 = vld [vmem:[%s2505_s14 + $0x190] sm:$0xff] }
 0x196   : > { %6529 = vst [vmem:[#allocation133_spill] sm:$0xff] %v3546_v9  ;;  %v3573_v9 = vld [vmem:[%s2505_s14 + $0x118] sm:$0xff]  ;;  %v3672_v35 = vmul.f32 %v6577_v4, %v6574_v37  ;;  %v3699_v37 = vld [vmem:[%s2505_s14 + $0x1c0] sm:$0xff] }
 0x197   : > { %6530 = vst [vmem:[#allocation38_spill] sm:$0xff] %v3552_v23  ;;  %v6583_v23 = vld [vmem:[#allocation67_spill] sm:$0xff] }
 0x198   : > { %6531 = vst [vmem:[#allocation134_spill] sm:$0xff] %v3555_v62  ;;  %v6582_v62 = vld [vmem:[#allocation105_spill] sm:$0xff]  ;;  %v6585_v31 = vsub.f32 %v6583_v23, %v6584_v45  ;;  %v6593_v4 = vld [vmem:[#allocation111_spill] sm:$0xff]  ;;  %v6595_v23 = vld [vmem:[#allocation112_spill] sm:$0xff] }
 0x199   : > { %6532 = vst [vmem:[#allocation139_spill] sm:$0xff] %v3558_v32  ;;  %v3684_v32 = vld [vmem:[%s2505_s14 + $0x1b0] sm:$0xff] }
 0x19a   : > { %6536 = vst [vmem:[#allocation40_spill] sm:$0xff] %v3564_v1  ;;  %v3591_v1 = vld [vmem:[%s2505_s14 + $0x130] sm:$0xff]  ;;  %v3690_v3 = vmul.f32 %v6585_v31, %v6582_v62  ;;  %v6594_v62 = vsub.f32 %v2768_v36, %v3117_v27  ;;  %v6598_v27 = vld [vmem:[#allocation116_spill] sm:$0xff] }
 0x19b   : > { %6537 = vst [vmem:[#allocation140_spill] sm:$0xff] %v3570_v40  ;;  %v6596_v45 = vld [vmem:[#allocation157_spill] sm:$0xff]  ;;  %v6641_v36 = vld [vmem:[#allocation16_spill] sm:$0xff] }
 0x19c   : > { %6538 = vst [vmem:[#allocation45_spill] sm:$0xff] %v3573_v9  ;;  %v6589_v9 = vld [vmem:[#allocation110_spill] sm:$0xff]  ;;  %v6597_v31 = vsub.f32 %v6382_v6, %v6596_v45  ;;  %v6602_v45 = vld [vmem:[#allocation119_spill] sm:$0xff] }
 0x19d   : > { %6539 = vst [vmem:[#allocation141_spill] sm:$0xff] %v3576_v20  ;;  %v3702_v20 = vld [vmem:[%s2505_s14 + $0x1c8] sm:$0xff] }
 0x19e   : > { %6544 = vst [vmem:[#allocation46_spill] sm:$0xff] %v3582_v54  ;;  %v3609_v54 = vld [vmem:[%s2505_s14 + $0x148] sm:$0xff] }
 0x19f   : > { %6545 = vst [vmem:[#allocation142_spill] sm:$0xff] %v3594_v2  ;;  %v3723_v2 = vmul.f32 %v6594_v62, %v6593_v4  ;;  %v6599_v62 = vld [vmem:[#allocation81_spill] sm:$0xff]  ;;  %v6600_v4 = vld [vmem:[#allocation158_spill] sm:$0xff] }
 0x1a0   : > { %6550 = vst [vmem:[#allocation147_spill] sm:$0xff] %v3600_v56  ;;  %v3627_v56 = vld [vmem:[%s2505_s14 + $0x160] sm:$0xff] }
 0x1a1   : > { %6551 = vst [vmem:[#allocation52_spill] sm:$0xff] %v3609_v54 }
 0x1a2   : > { %6552 = vst [vmem:[#allocation148_spill] sm:$0xff] %v3612_v28  ;;  %v3732_v28 = vmul.f32 %v6597_v31, %v6595_v23  ;;  %v6603_v31 = vsub.f32 %v2827_v38, %v3134_v33  ;;  %v6622_v33 = vand.u32 2147483647, %v3338_v19  ;;  %v6628_v19 = vand.u32 2147483647, %v3368_v63  ;;  %v6650_v63 = vld [vmem:[#allocation19_spill] sm:$0xff] }
 0x1a3   : > { %6557 = vst [vmem:[#allocation53_spill] sm:$0xff] %v3618_v10  ;;  %v3648_v10 = vld [vmem:[%s2505_s14 + $0x180] sm:$0xff]  ;;  %v6651_v6 = vand.u32 2147483647, %v6650_v63  ;;  %v6666_v63 = vld [vmem:[#allocation69_spill] sm:$0xff]  ;;  %v7005_v23 = vld [vmem:[#allocation90_spill] sm:$0xff] }
 0x1a4   : > { %6558 = vst [vmem:[#allocation149_spill] sm:$0xff] %v3624_v47  ;;  %v3750_v54 = vmul.f32 %v6603_v31, %v6602_v45  ;;  %v6619_v31 = vand.u32 2147483647, %v3335_v22  ;;  %vm3804_vm11 = vcmp.lt.f32.partialorder %v6622_v33, 1.0  ;;  %vm3820_vm6 = vcmp.lt.f32.partialorder %v6628_v19, 1.0  ;;  %v6639_v19 = vld [vmem:[#allocation15_spill] sm:$0xff] }
 0x1a5   : > { %6559 = vst [vmem:[#allocation54_spill] sm:$0xff] %v3627_v56  ;;  %vm3856_vm14 = vcmp.lt.f32.partialorder %v6651_v6, 1.0  ;;  %v6665_v6 = vld [vmem:[#allocation17_spill] sm:$0xff]  ;;  %v6702_v56 = vld [vmem:[#allocation26_spill] sm:$0xff]  ;;  %v6720_v45 = vld [vmem:[#allocation127_spill] sm:$0xff] }
 0x1a6   : > { %6560 = vst [vmem:[#allocation150_spill] sm:$0xff] %v3630_v34  ;;  %vm3798_vm10 = vcmp.lt.f32.partialorder %v6619_v31, 1.0  ;;  %v6631_v31 = vand.u32 2147483647, %v3371_v24  ;;  %v6642_v24 = vld [vmem:[#allocation68_spill] sm:$0xff]  ;;  %v6709_v34 = vmov 0 }
 0x1a7   : > { %6563 = vst [vmem:[#allocation170_spill] sm:$0xff] %v3636_v26  ;;  %v3666_v26 = vld [vmem:[%s2505_s14 + $0x198] sm:$0xff] }
 0x1a8   : > { %6564 = vst [vmem:[#allocation171_spill] sm:$0xff] %v3642_v29  ;;  %vm3826_vm12 = vcmp.lt.f32.partialorder %v6631_v31, 1.0  ;;  %v6643_v31 = vand.u32 2147483647, %v3401_v57  ;;  %v6656_v57 = vmov 0  ;;  %v6992_v33 = vld [vmem:[#allocation146_spill] sm:$0xff] }
 0x1a9   : > { %6565 = vst [vmem:[#allocation172_spill] sm:$0xff] %v3645_v46 }
 0x1aa   : > { %6566 = vst [vmem:[#allocation173_spill] sm:$0xff] %v3648_v10  ;;  %vm3844_vm1 = vcmp.lt.f32.partialorder %v6643_v31, 1.0  ;;  %v6679_v31 = vmov 0  ;;  %v6681_v10 = vld [vmem:[#allocation97_spill] sm:$0xff] }
 0x1ab   : > { %6570 = vst [vmem:[#allocation154_spill] sm:$0xff] %v3654_v51  ;;  %v3681_v51 = vld [vmem:[%s2505_s14 + $0x1a8] sm:$0xff]  ;;  %v6682_v46 = vand.u32 2147483647, %v6681_v10  ;;  %v6740_v10 = vmov 0 }
 0x1ac   : > { %6571 = vst [vmem:[#allocation174_spill] sm:$0xff] %v3660_v43 }
 0x1ad   : > { %6572 = vst [vmem:[#allocation175_spill] sm:$0xff] %v3663_v41  ;;  %v6667_v41 = vld [vmem:[#allocation18_spill] sm:$0xff] }
 0x1ae   : > { %6573 = vst [vmem:[#allocation176_spill] sm:$0xff] %v3666_v26 }
 0x1af   : > { %6578 = vst [vmem:[#allocation61_spill] sm:$0xff] %v3672_v35  ;;  %v6590_v35 = vsub.f32 %v2765_v44, %v3114_v48  ;;  %v6601_v44 = vsub.f32 %v6599_v62, %v6600_v4  ;;  %v6605_v62 = vsub.f32 %v2830_v5, %v3145_v17  ;;  %v6607_v4 = vand.u32 2147483647, %v3275_v30 }
 0x1b0   : > { %6579 = vst [vmem:[#allocation155_spill] sm:$0xff] %v3678_v0  ;;  %v6610_v5 = vand.u32 2147483647, %v3302_v59  ;;  %v6613_v30 = vand.u32 2147483647, %v3305_v21  ;;  %v6648_v48 = vmov 0 }
 0x1b1   : > { %6580 = vst [vmem:[#allocation177_spill] sm:$0xff] %v3681_v51  ;;  %v3708_v40 = vmul.f32 %v6590_v35, %v6589_v9  ;;  %v3741_v47 = vmul.f32 %v6601_v44, %v6598_v27  ;;  %v6604_v44 = vld [vmem:[#allocation120_spill] sm:$0xff]  ;;  %vm3770_vm2 = vcmp.lt.f32.partialorder %v6607_v4, 1.0  ;;  %v6616_v59 = vand.u32 2147483647, %v3308_v55  ;;  %v6640_v9 = vld [vmem:[#allocation62_spill] sm:$0xff] }
 0x1b2   : > { %6581 = vst [vmem:[#allocation178_spill] sm:$0xff] %v3684_v32  ;;  %v3759_v35 = vmul.f32 %v6605_v62, %v6604_v44  ;;  %vm3776_vm3 = vcmp.lt.f32.partialorder %v6610_v5, 1.0  ;;  %vm3786_vm8 = vcmp.lt.f32.partialorder %v6613_v30, 1.0  ;;  %v6625_v55 = vand.u32 2147483647, %v3341_v7  ;;  %v6661_v32 = vld [vmem:[#allocation88_spill] sm:$0xff] }
 0x1b3   : > { %6586 = vst [vmem:[#allocation67_spill] sm:$0xff] %v3696_v39  ;;  %vm3792_vm9 = vcmp.lt.f32.partialorder %v6616_v59, 1.0  ;;  %v6634_v59 = vand.u32 2147483647, %v3374_v8  ;;  %v6644_v8 = vmov 0  ;;  %v6662_v51 = vld [vmem:[#allocation31_spill] sm:$0xff] }
 0x1b4   : > { %6587 = vst [vmem:[#allocation156_spill] sm:$0xff] %v3699_v37  ;;  %vm3814_vm7 = vcmp.lt.f32.partialorder %v6625_v55, 1.0  ;;  %v6645_v8 = vsel %vm3844_vm1, 4294967295, %v6644_v8  ;;  %v6652_v55 = vmov 0  ;;  %v6663_v0 = vsub.f32 %v6661_v32, %v6662_v51  ;;  %v6697_v27 = vld [vmem:[#allocation25_spill] sm:$0xff]  ;;  %v6722_v44 = vld [vmem:[#allocation39_spill] sm:$0xff] }
 0x1b5   : > { %6588 = vst [vmem:[#allocation179_spill] sm:$0xff] %v3702_v20  ;;  %vm3832_vm15 = vcmp.lt.f32.partialorder %v6634_v59, 1.0  ;;  %v6646_v59 = vld [vmem:[#allocation70_spill] sm:$0xff]  ;;  %v6653_v55 = vsel %vm3856_vm14, 4294967295, %v6652_v55  ;;  %v6671_v37 = vmov 0  ;;  %v6675_v32 = vmov 0 }
 0x1b6   : > { %6591 = vst [vmem:[#allocation180_spill] sm:$0xff] %v3714_v16  ;;  %v6654_v16 = vld [vmem:[#allocation83_spill] sm:$0xff]  ;;  %v6698_v29 = vand.u32 2147483647, %v6697_v27  ;;  %v6714_v27 = vmov 0  ;;  %v6862_v62 = vmov 0 }
 0x1b7   : > { %6592 = vst [vmem:[#allocation181_spill] sm:$0xff] %v3717_v25  ;;  %v6647_v25 = vand.u32 2147483647, %v6646_v59  ;;  %v6655_v20 = vand.u32 2147483647, %v6654_v16  ;;  %v6669_v16 = vld [vmem:[#allocation22_spill] sm:$0xff] }
 0x1b8   : > { %6606 = vst [vmem:[#allocation157_spill] sm:$0xff] %v3759_v35  ;;  %v6670_v43 = vand.u32 2147483647, %v6669_v16  ;;  %v6673_v59 = vld [vmem:[#allocation84_spill] sm:$0xff]  ;;  %v6683_v16 = vmov 0  ;;  %v6690_v35 = vld [vmem:[#allocation159_spill] sm:$0xff] }
 0x1b9   : > { %vm3850_vm0 = vcmp.lt.f32.partialorder %v6647_v25, 1.0  ;;  %vm3862_vm4 = vcmp.lt.f32.partialorder %v6655_v20, 1.0  ;;  %v6660_v25 = vld [vmem:[#allocation121_spill] sm:$0xff]  ;;  %v6668_v20 = vld [vmem:[#allocation76_spill] sm:$0xff]  ;;  %v6674_v39 = vand.u32 2147483647, %v6673_v59 }
 0x1ba   : > { %v6649_v48 = vsel %vm3850_vm0, 4294967295, %v6648_v48  ;;  %v6657_v57 = vsel %vm3862_vm4, 4294967295, %v6656_v57  ;;  %v3872_v26 = vmul.f32 %v6663_v0, %v6660_v25  ;;  %vm3880_vm4 = vcmp.lt.f32.partialorder %v6670_v43, 1.0  ;;  %v6677_v0 = vld [vmem:[#allocation24_spill] sm:$0xff]  ;;  %v6689_v25 = vld [vmem:[#allocation89_spill] sm:$0xff]  ;;  %v6712_v43 = vld [vmem:[#allocation123_spill] sm:$0xff] }
 0x1bb   : > { %v6672_v37 = vsel %vm3880_vm4, 4294967295, %v6671_v37  ;;  %vm3886_vm1 = vcmp.lt.f32.partialorder %v6674_v39, 1.0  ;;  %v6678_v51 = vand.u32 2147483647, %v6677_v0  ;;  %vm3898_vm0 = vcmp.lt.f32.partialorder %v6682_v46, 1.0  ;;  %v6733_v46 = vld [vmem:[#allocation124_spill] sm:$0xff] }
 0x1bc   : > { %6664 = vst [vmem:[#allocation81_spill] sm:$0xff] %v3872_v26  ;;  %v6676_v32 = vsel %vm3886_vm1, 4294967295, %v6675_v32  ;;  %v6684_v16 = vsel %vm3898_vm0, 4294967295, %v6683_v16  ;;  %v6688_v26 = vld [vmem:[#allocation122_spill] sm:$0xff]  ;;  %v6691_v0 = vsub.f32 %v6689_v25, %v6690_v35  ;;  %vm3917_vm1 = vcmp.lt.f32.partialorder %v6698_v29, 1.0  ;;  %v7167_v38 = vld [vmem:[#allocation175_spill] sm:$0xff] }
 0x1bd   : > { %vm3892_vm5 = vcmp.lt.f32.partialorder %v6678_v51, 1.0  ;;  %v6699_v59 = vmov 0  ;;  %v6703_v39 = vand.u32 2147483647, %v6702_v56  ;;  %v6704_v35 = vmov 0  ;;  %v6707_v25 = vld [vmem:[#allocation118_spill] sm:$0xff] }
 0x1be   : > { %v6680_v31 = vsel %vm3892_vm5, 4294967295, %v6679_v31  ;;  %v3909_v51 = vmul.f32 %v6691_v0, %v6688_v26  ;;  %v6700_v59 = vsel %vm3917_vm1, 4294967295, %v6699_v59  ;;  %v6708_v0 = vand.u32 2147483647, %v6707_v25  ;;  %v6906_v7 = vld [vmem:[#allocation142_spill] sm:$0xff] }
 0x1bf   : > { %6701 = vst [vmem:[#allocation15_spill] sm:$0xff] %v6700_v59  ;;  %vm3923_vm4 = vcmp.lt.f32.partialorder %v6703_v39, 1.0  ;;  %v6729_v26 = vand.u32 2147483647, %v3498_v52  ;;  %v6730_v56 = vmov 0  ;;  %v6744_v52 = vmov 0 }
 0x1c0   : > { %6692 = vst [vmem:[#allocation158_spill] sm:$0xff] %v3909_v51  ;;  %v6705_v35 = vsel %vm3923_vm4, 4294967295, %v6704_v35  ;;  %vm3929_vm14 = vcmp.lt.f32.partialorder %v6708_v0, 1.0  ;;  %v6713_v51 = vand.u32 2147483647, %v6712_v43  ;;  %v6750_v43 = vld [vmem:[#allocation128_spill] sm:$0xff] }
 0x1c1   : > { %6706 = vst [vmem:[#allocation62_spill] sm:$0xff] %v6705_v35  ;;  %v6710_v34 = vsel %vm3929_vm14, 4294967295, %v6709_v34  ;;  %v6721_v35 = vld [vmem:[#allocation92_spill] sm:$0xff]  ;;  %vm3954_vm4 = vcmp.lt.f32.partialorder %v6729_v26, 1.0  ;;  %v6734_v39 = vand.u32 2147483647, %v6733_v46 }
 0x1c2   : > { %6711 = vst [vmem:[#allocation16_spill] sm:$0xff] %v6710_v34  ;;  %vm3935_vm0 = vcmp.lt.f32.partialorder %v6713_v51, 1.0  ;;  %v6723_v25 = vsub.f32 %v6721_v35, %v6722_v44  ;;  %v6731_v56 = vsel %vm3954_vm4, 4294967295, %v6730_v56  ;;  %v6735_v44 = vmov 0  ;;  %v6738_v35 = vld [vmem:[#allocation28_spill] sm:$0xff]  ;;  %v6751_v34 = vld [vmem:[#allocation93_spill] sm:$0xff] }
 0x1c3   : > { %v6715_v27 = vsel %vm3935_vm0, 4294967295, %v6714_v27  ;;  %6732 = vst [vmem:[#allocation19_spill] sm:$0xff] %v6731_v56  ;;  %vm3960_vm1 = vcmp.lt.f32.partialorder %v6734_v39, 1.0  ;;  %v6743_v29 = vand.u32 2147483647, %v3516_v15  ;;  %v6761_v46 = vmov 0 }
 0x1c4   : > { %6716 = vst [vmem:[#allocation68_spill] sm:$0xff] %v6715_v27  ;;  %v3946_v0 = vmul.f32 %v6723_v25, %v6720_v45  ;;  %v6736_v44 = vsel %vm3960_vm1, 4294967295, %v6735_v44  ;;  %v6739_v25 = vand.u32 2147483647, %v6738_v35  ;;  %v6764_v51 = vld [vmem:[#allocation126_spill] sm:$0xff]  ;;  %v6771_v45 = vmov 0 }
 0x1c5   : > { %6737 = vst [vmem:[#allocation83_spill] sm:$0xff] %v6736_v44  ;;  %vm3972_vm0 = vcmp.lt.f32.partialorder %v6743_v29, 1.0  ;;  %v6752_v44 = vld [vmem:[#allocation160_spill] sm:$0xff]  ;;  %v6765_v39 = vand.u32 2147483647, %v6764_v51  ;;  %v6784_v59 = vld [vmem:[#allocation161_spill] sm:$0xff] }
 0x1c6   : > { %6724 = vst [vmem:[#allocation70_spill] sm:$0xff] %v3946_v0  ;;  %vm3966_vm5 = vcmp.lt.f32.partialorder %v6739_v25, 1.0  ;;  %v6745_v52 = vsel %vm3972_vm0, 4294967295, %v6744_v52  ;;  %v6753_v35 = vsub.f32 %v6751_v34, %v6752_v44  ;;  %v6766_v34 = vmov 0  ;;  %v6769_v44 = vld [vmem:[#allocation32_spill] sm:$0xff]  ;;  %v6796_v15 = vld [vmem:[#allocation38_spill] sm:$0xff] }
 0x1c7   : > { %v6741_v10 = vsel %vm3966_vm5, 4294967295, %v6740_v10  ;;  %6746 = vst [vmem:[#allocation31_spill] sm:$0xff] %v6745_v52  ;;  %v6759_v52 = vld [vmem:[#allocation29_spill] sm:$0xff]  ;;  %vm3997_vm4 = vcmp.lt.f32.partialorder %v6765_v39, 1.0  ;;  %v6774_v26 = vld [vmem:[#allocation132_spill] sm:$0xff]  ;;  %v6793_v51 = vmov 0 }
 0x1c8   : > { %6742 = vst [vmem:[#allocation88_spill] sm:$0xff] %v6741_v10  ;;  %v3983_v25 = vmul.f32 %v6753_v35, %v6750_v43  ;;  %v6760_v0 = vand.u32 2147483647, %v6759_v52  ;;  %v6767_v34 = vsel %vm3997_vm4, 4294967295, %v6766_v34  ;;  %v6770_v35 = vand.u32 2147483647, %v6769_v44 }
 0x1c9   : > { %6768 = vst [vmem:[#allocation18_spill] sm:$0xff] %v6767_v34  ;;  %v6776_v52 = vmov 0  ;;  %v6782_v10 = vld [vmem:[#allocation129_spill] sm:$0xff]  ;;  %v6783_v34 = vld [vmem:[#allocation94_spill] sm:$0xff]  ;;  %v6797_v39 = vand.u32 2147483647, %v6796_v15 }
 0x1ca   : > { %6754 = vst [vmem:[#allocation17_spill] sm:$0xff] %v3983_v25  ;;  %vm3991_vm1 = vcmp.lt.f32.partialorder %v6760_v0, 1.0  ;;  %vm4003_vm14 = vcmp.lt.f32.partialorder %v6770_v35, 1.0  ;;  %v6775_v25 = vand.u32 2147483647, %v6774_v26  ;;  %v6785_v44 = vsub.f32 %v6783_v34, %v6784_v59  ;;  %v6801_v34 = vld [vmem:[#allocation134_spill] sm:$0xff] }
 0x1cb   : > { %v6762_v46 = vsel %vm3991_vm1, 4294967295, %v6761_v46  ;;  %v6772_v45 = vsel %vm4003_vm14, 4294967295, %v6771_v45  ;;  %vm4034_vm1 = vcmp.lt.f32.partialorder %v6797_v39, 1.0  ;;  %v6798_v59 = vmov 0  ;;  %v6806_v0 = vld [vmem:[#allocation139_spill] sm:$0xff]  ;;  %v6829_v56 = vld [vmem:[#allocation101_spill] sm:$0xff] }
 0x1cc   : > { %6763 = vst [vmem:[#allocation69_spill] sm:$0xff] %v6762_v46  ;;  %vm4009_vm0 = vcmp.lt.f32.partialorder %v6775_v25, 1.0  ;;  %v4020_v35 = vmul.f32 %v6785_v44, %v6782_v10  ;;  %v6799_v59 = vsel %vm4034_vm1, 4294967295, %v6798_v59  ;;  %v6802_v44 = vand.u32 2147483647, %v6801_v34  ;;  %v6814_v46 = vld [vmem:[#allocation130_spill] sm:$0xff] }
 0x1cd   : > { %6773 = vst [vmem:[#allocation76_spill] sm:$0xff] %v6772_v45  ;;  %v6777_v52 = vsel %vm4009_vm0, 4294967295, %v6776_v52  ;;  %v6803_v29 = vmov 0  ;;  %v6828_v39 = vld [vmem:[#allocation135_spill] sm:$0xff]  ;;  %v6830_v27 = vld [vmem:[#allocation162_spill] sm:$0xff]  ;;  %v6840_v26 = vld [vmem:[#allocation136_spill] sm:$0xff] }
 0x1ce   : > { %6778 = vst [vmem:[#allocation22_spill] sm:$0xff] %v6777_v52  ;;  %v6791_v52 = vld [vmem:[#allocation33_spill] sm:$0xff]  ;;  %vm4040_vm5 = vcmp.lt.f32.partialorder %v6802_v44, 1.0  ;;  %vm6851_vm1 = vcmp.gt.f32.partialorder %v3281_v42, 0.0  ;;  %v6861_v42 = vand.u32 2147483647, %v3588_v18 }
 0x1cf   : > { %6786 = vst [vmem:[#allocation84_spill] sm:$0xff] %v4020_v35  ;;  %v6792_v43 = vand.u32 2147483647, %v6791_v52  ;;  %v6804_v29 = vsel %vm4040_vm5, 4294967295, %v6803_v29  ;;  %v6807_v35 = vand.u32 2147483647, %v6806_v0 }
 0x1d0   : > { %6800 = vst [vmem:[#allocation97_spill] sm:$0xff] %v6799_v59  ;;  %v6808_v52 = vmov 0  ;;  %v6815_v59 = vld [vmem:[#allocation95_spill] sm:$0xff]  ;;  %v6857_v25 = vld [vmem:[#allocation137_spill] sm:$0xff]  ;;  %vm6867_vm14 = vcmp.gt.f32.partialorder %v3293_v12, 0.0  ;;  %v6884_v21 = vmov 0 }
 0x1d1   : > { %vm4028_vm4 = vcmp.lt.f32.partialorder %v6792_v43, 1.0  ;;  %6805 = vst [vmem:[#allocation89_spill] sm:$0xff] %v6804_v29  ;;  %vm4046_vm0 = vcmp.lt.f32.partialorder %v6807_v35, 1.0  ;;  %v6820_v29 = vld [vmem:[#allocation140_spill] sm:$0xff]  ;;  %v6822_v35 = vmov 0  ;;  %v6859_v43 = vld [vmem:[#allocation59_spill] sm:$0xff] }
 0x1d2   : > { %v6794_v51 = vsel %vm4028_vm4, 4294967295, %v6793_v51  ;;  %v6809_v52 = vsel %vm4046_vm0, 4294967295, %v6808_v52  ;;  %v6821_v0 = vand.u32 2147483647, %v6820_v29  ;;  %vm4110_vm4 = vmand %vm6851_vm1, %vm3776_vm3  ;;  %vm4126_vm1 = vcmp.lt.f32.partialorder %v6861_v42, 1.0  ;;  %v6879_v42 = vld [vmem:[#allocation138_spill] sm:$0xff] }
 0x1d3   : > { %6795 = vst [vmem:[#allocation24_spill] sm:$0xff] %v6794_v51  ;;  %v6816_v51 = vld [vmem:[#allocation47_spill] sm:$0xff]  ;;  %v6863_v62 = vsel %vm4126_vm1, 4294967295, %v6862_v62  ;;  %v6908_v5 = vmov 0  ;;  %v6912_v30 = vmov 0  ;;  %v7156_v17 = vld [vmem:[#allocation174_spill] sm:$0xff] }
 0x1d4   : > { %6810 = vst [vmem:[#allocation159_spill] sm:$0xff] %v6809_v52  ;;  %v6817_v34 = vsub.f32 %v6815_v59, %v6816_v51  ;;  %vm4062_vm13 = vcmp.lt.f32.partialorder %v6821_v0, 1.0  ;;  %v6831_v51 = vsub.f32 %v6829_v56, %v6830_v27  ;;  %v6835_v0 = vmov 0 }
 0x1d5   : > { %v6823_v35 = vsel %vm4062_vm13, 4294967295, %v6822_v35 }
 0x1d6   : > { %v4057_v44 = vmul.f32 %v6817_v34, %v6814_v46  ;;  %6824 = vst [vmem:[#allocation26_spill] sm:$0xff] %v6823_v35  ;;  %v4073_v59 = vmul.f32 %v6831_v51, %v6828_v39  ;;  %v6832_v34 = vld [vmem:[#allocation61_spill] sm:$0xff]  ;;  %v6841_v35 = vld [vmem:[#allocation102_spill] sm:$0xff]  ;;  %v6842_v46 = vld [vmem:[#allocation163_spill] sm:$0xff]  ;;  %v7232_v39 = vmov 0 }
 0x1d7   : > { %v6843_v27 = vsub.f32 %v6841_v35, %v6842_v46  ;;  %v6844_v51 = vld [vmem:[#allocation141_spill] sm:$0xff]  ;;  %v6852_v46 = vmov 0 }
 0x1d8   : > { %6818 = vst [vmem:[#allocation25_spill] sm:$0xff] %v4057_v44  ;;  %v6833_v44 = vld [vmem:[#allocation45_spill] sm:$0xff]  ;;  %v6853_v46 = vsel %vm4110_vm4, 4294967295, %v6852_v46  ;;  %vm4142_vm4 = vmand %vm6867_vm14, %vm3792_vm9  ;;  %vm6892_vm9 = vcmp.gt.f32.partialorder %v3332_v11, 0.0  ;;  %v6902_v11 = vld [vmem:[#allocation106_spill] sm:$0xff] }
 0x1d9   : > { %v6834_v29 = vand.u32 2147483647, %v6833_v44  ;;  %v4089_v56 = vmul.f32 %v6843_v27, %v6840_v26  ;;  %v6845_v44 = vand.u32 2147483647, %v6844_v51 }
 0x1db   : > { %vm4078_vm0 = vcmp.lt.f32.partialorder %v6834_v29, 1.0  ;;  %vm4094_vm13 = vcmp.lt.f32.partialorder %v6845_v44, 1.0  ;;  %v6881_v44 = vld [vmem:[#allocation60_spill] sm:$0xff] }
 0x1dc   : > { %v6836_v0 = vsel %vm4078_vm0, 4294967295, %v6835_v0  ;;  %vm6848_vm0 = vcmp.gt.f32.partialorder %v3272_v49, 0.0  ;;  %v6858_v49 = vld [vmem:[#allocation103_spill] sm:$0xff] }
 0x1dd   : > { %vm4102_vm5 = vmand %vm6848_vm0, %vm3770_vm2  ;;  %v6860_v52 = vsub.f32 %v6858_v49, %v6859_v43  ;;  %vm6864_vm2 = vcmp.gt.f32.partialorder %v3287_v60, 0.0  ;;  %vm6870_vm0 = vcmp.gt.f32.partialorder %v3299_v50, 0.0  ;;  %v6880_v50 = vld [vmem:[#allocation104_spill] sm:$0xff] }
 0x1de   : > { %vm4134_vm3 = vmand %vm6864_vm2, %vm3786_vm8  ;;  %vm6873_vm8 = vcmp.gt.f32.partialorder %v3314_v61, 0.0  ;;  %v6882_v27 = vsub.f32 %v6880_v50, %v6881_v44  ;;  %v6883_v61 = vand.u32 2147483647, %v3591_v1  ;;  %v6893_v1 = vmov 0  ;;  %v6903_v43 = vld [vmem:[#allocation164_spill] sm:$0xff]  ;;  %v6931_v44 = vld [vmem:[#allocation75_spill] sm:$0xff] }
 0x1df   : > { %v4121_v10 = vmul.f32 %v6860_v52, %v6857_v25  ;;  %vm4150_vm1 = vmand %vm6870_vm0, %vm3798_vm10  ;;  %vm6889_vm0 = vcmp.gt.f32.partialorder %v3326_v53, 0.0  ;;  %v6904_v4 = vsub.f32 %v6902_v11, %v6903_v43  ;;  %v6964_v43 = vld [vmem:[#allocation15_spill] sm:$0xff]  ;;  %v6994_v53 = vld [vmem:[#allocation166_spill] sm:$0xff]  ;;  %v7132_v25 = vmov 0 }
 0x1e0   : > { %vm4158_vm2 = vmand %vm6873_vm8, %vm3804_vm11  ;;  %v4169_v15 = vmul.f32 %v6882_v27, %v6879_v42  ;;  %vm4174_vm10 = vcmp.lt.f32.partialorder %v6883_v61, 1.0  ;;  %vm6886_vm11 = vcmp.gt.f32.partialorder %v3320_v13, 0.0  ;;  %v6890_v27 = vmov 0  ;;  %v6901_v61 = vld [vmem:[#allocation143_spill] sm:$0xff]  ;;  %v7291_v52 = vld [vmem:[#allocation180_spill] sm:$0xff] }
 0x1e1   : > { %v6885_v21 = vsel %vm4174_vm10, 4294967295, %v6884_v21  ;;  %vm4182_vm14 = vmand %vm6886_vm11, %vm3814_vm7  ;;  %vm6895_vm7 = vcmp.gt.f32.partialorder %v3347_v14, 0.0  ;;  %v6896_v13 = vmov 0  ;;  %v4217_v49 = vmul.f32 %v6904_v4, %v6901_v61 }
 0x1e2   : > { %vm4190_vm8 = vmand %vm6889_vm0, %vm3820_vm6  ;;  %v6907_v14 = vand.u32 2147483647, %v6906_v7  ;;  %v6916_v4 = vmov 0  ;;  %vm6918_vm6 = vnez %v6653_v55  ;;  %v6939_v55 = vmov 0 }
 0x1e3   : > { %v6891_v27 = vsel %vm4190_vm8, 4294967295, %v6890_v27  ;;  %vm4198_vm10 = vmand %vm6892_vm9, %vm3826_vm12  ;;  %6905 = vst [vmem:[#allocation118_spill] sm:$0xff] %v4217_v49  ;;  %vm6911_vm9 = vcmp.gt.f32.partialorder %v6639_v19, 0.0  ;;  %v6962_v7 = vmov 0  ;;  %v7042_v49 = vmov 0 }
 0x1e4   : > { %v6894_v1 = vsel %vm4198_vm10, 4294967295, %v6893_v1  ;;  %vm4206_vm11 = vmand %vm6895_vm7, %vm3832_vm15  ;;  %vm4222_vm12 = vcmp.lt.f32.partialorder %v6907_v14, 1.0  ;;  %vm6910_vm15 = vnez %v6645_v8  ;;  %vm6914_vm7 = vnez %v6649_v48  ;;  %v6929_v14 = vld [vmem:[#allocation144_spill] sm:$0xff] }
 0x1e5   : > { %v6897_v13 = vsel %vm4206_vm11, 4294967295, %v6896_v13  ;;  %v6909_v5 = vsel %vm4222_vm12, 4294967295, %v6908_v5  ;;  %vm4230_vm0 = vmand %vm6911_vm9, %vm6910_vm15  ;;  %vm6915_vm11 = vcmp.gt.f32.partialorder %v6640_v9, 0.0  ;;  %vm6919_vm12 = vcmp.gt.f32.partialorder %v6641_v36, 0.0  ;;  %v6930_v36 = vld [vmem:[#allocation107_spill] sm:$0xff]  ;;  %v7047_v9 = vld [vmem:[#allocation125_spill] sm:$0xff] }
 0x1e6   : > { %v6913_v30 = vsel %vm4230_vm0, 4294967295, %v6912_v30  ;;  %vm4238_vm10 = vmand %vm6915_vm11, %vm6914_vm7  ;;  %v6920_v8 = vmov 0  ;;  %vm6922_vm15 = vnez %v6657_v57  ;;  %vm6923_vm9 = vcmp.gt.f32.partialorder %v6642_v24, 0.0 }
 0x1e7   : > { %v6917_v4 = vsel %vm4238_vm10, 4294967295, %v6916_v4  ;;  %vm4246_vm8 = vmand %vm6919_vm12, %vm6918_vm6  ;;  %v6924_v48 = vmov 0  ;;  %v6932_v22 = vsub.f32 %v6930_v36, %v6931_v44  ;;  %v6934_v24 = vand.u32 2147483647, %v3606_v58  ;;  %v6955_v36 = vld [vmem:[#allocation145_spill] sm:$0xff]  ;;  %v6970_v44 = vld [vmem:[#allocation62_spill] sm:$0xff] }
 0x1e8   : > { %v6921_v8 = vsel %vm4246_vm8, 4294967295, %v6920_v8  ;;  %vm4254_vm0 = vmand %vm6923_vm9, %vm6922_vm15  ;;  %v6935_v57 = vmov 0  ;;  %vm6937_vm12 = vnez %v6672_v37  ;;  %vm6938_vm7 = vcmp.gt.f32.partialorder %v6665_v6, 0.0  ;;  %v7010_v6 = vld [vmem:[#allocation83_spill] sm:$0xff] }
 0x1e9   : > { %v6925_v48 = vsel %vm4254_vm0, 4294967295, %v6924_v48  ;;  %v4265_v50 = vmul.f32 %v6932_v22, %v6929_v14  ;;  %vm4270_vm6 = vcmp.lt.f32.partialorder %v6934_v24, 1.0  ;;  %vm4278_vm15 = vmand %vm6938_vm7, %vm6937_vm12  ;;  %vm6941_vm9 = vnez %v6676_v32  ;;  %v6957_v24 = vld [vmem:[#allocation165_spill] sm:$0xff] }
 0x1ea   : > { %v6936_v57 = vsel %vm4270_vm6, 4294967295, %v6935_v57  ;;  %v6940_v55 = vsel %vm4278_vm15, 4294967295, %v6939_v55  ;;  %vm6942_vm0 = vcmp.gt.f32.partialorder %v6666_v63, 0.0  ;;  %v6943_v22 = vmov 0  ;;  %v6966_v63 = vld [vmem:[#allocation20_spill] sm:$0xff]  ;;  %v7114_v32 = vld [vmem:[#allocation153_spill] sm:$0xff] }
 0x1eb   : > { %6933 = vst [vmem:[#allocation123_spill] sm:$0xff] %v4265_v50  ;;  %vm4286_vm8 = vmand %vm6942_vm0, %vm6941_vm9  ;;  %vm6945_vm11 = vnez %v6680_v31  ;;  %vm6946_vm6 = vcmp.gt.f32.partialorder %v6667_v41, 0.0  ;;  %v6947_v58 = vmov 0  ;;  %vm6949_vm12 = vnez %v6684_v16  ;;  %v6956_v41 = vld [vmem:[#allocation108_spill] sm:$0xff]  ;;  %v7003_v50 = vld [vmem:[#allocation19_spill] sm:$0xff] }
 0x1ec   : > { %v6944_v22 = vsel %vm4286_vm8, 4294967295, %v6943_v22  ;;  %vm4294_vm10 = vmand %vm6946_vm6, %vm6945_vm11  ;;  %vm6950_vm7 = vcmp.gt.f32.partialorder %v6668_v20, 0.0  ;;  %v6951_v37 = vmov 0  ;;  %v6958_v11 = vsub.f32 %v6956_v41, %v6957_v24  ;;  %v6960_v16 = vld [vmem:[#allocation52_spill] sm:$0xff] }
 0x1ed   : > { %v6948_v58 = vsel %vm4294_vm10, 4294967295, %v6947_v58  ;;  %vm4302_vm15 = vmand %vm6950_vm7, %vm6949_vm12  ;;  %v6961_v20 = vand.u32 2147483647, %v6960_v16  ;;  %vm6965_vm6 = vnez %v6964_v43  ;;  %vm6967_vm9 = vcmp.gt.f32.partialorder %v6966_v63, 0.0  ;;  %v6976_v24 = vld [vmem:[#allocation16_spill] sm:$0xff]  ;;  %v6978_v16 = vld [vmem:[#allocation21_spill] sm:$0xff] }
 0x1ee   : > { %v6952_v37 = vsel %vm4302_vm15, 4294967295, %v6951_v37  ;;  %v4313_v19 = vmul.f32 %v6958_v11, %v6955_v36  ;;  %vm4326_vm12 = vmand %vm6967_vm9, %vm6965_vm6  ;;  %v6968_v31 = vmov 0  ;;  %vm6971_vm7 = vnez %v6970_v44  ;;  %v6972_v11 = vld [vmem:[#allocation82_spill] sm:$0xff]  ;;  %v6982_v63 = vld [vmem:[#allocation68_spill] sm:$0xff] }
 0x1ef   : > { %vm4318_vm11 = vcmp.lt.f32.partialorder %v6961_v20, 1.0  ;;  %v6969_v31 = vsel %vm4326_vm12, 4294967295, %v6968_v31  ;;  %vm6973_vm15 = vcmp.gt.f32.partialorder %v6972_v11, 0.0  ;;  %v6974_v41 = vmov 0  ;;  %v6984_v20 = vld [vmem:[#allocation23_spill] sm:$0xff]  ;;  %v7052_v11 = vld [vmem:[#allocation18_spill] sm:$0xff] }
 0x1f0   : > { %6959 = vst [vmem:[#allocation92_spill] sm:$0xff] %v4313_v19  ;;  %v6963_v7 = vsel %vm4318_vm11, 4294967295, %v6962_v7  ;;  %vm4334_vm10 = vmand %vm6973_vm15, %vm6971_vm7  ;;  %vm6977_vm0 = vnez %v6976_v24  ;;  %vm6979_vm11 = vcmp.gt.f32.partialorder %v6978_v16, 0.0  ;;  %v6980_v43 = vmov 0  ;;  %v6993_v16 = vld [vmem:[#allocation109_spill] sm:$0xff] }
 0x1f1   : > { %v6975_v41 = vsel %vm4334_vm10, 4294967295, %v6974_v41  ;;  %vm4342_vm8 = vmand %vm6979_vm11, %vm6977_vm0  ;;  %vm6983_vm6 = vnez %v6982_v63  ;;  %vm6985_vm9 = vcmp.gt.f32.partialorder %v6984_v20, 0.0  ;;  %v6986_v44 = vmov 0  ;;  %v6998_v63 = vld [vmem:[#allocation148_spill] sm:$0xff] }
 0x1f2   : > { %v6981_v43 = vsel %vm4342_vm8, 4294967295, %v6980_v43  ;;  %vm4350_vm12 = vmand %vm6985_vm9, %vm6983_vm6  ;;  %v6995_v12 = vsub.f32 %v6993_v16, %v6994_v53  ;;  %v6999_v20 = vand.u32 2147483647, %v6998_v63  ;;  %v7000_v19 = vmov 0  ;;  %v7017_v16 = vld [vmem:[#allocation88_spill] sm:$0xff]  ;;  %v7019_v63 = vld [vmem:[#allocation117_spill] sm:$0xff] }
 0x1f3   : > { %v6987_v44 = vsel %vm4350_vm12, 4294967295, %v6986_v44  ;;  %vm7004_vm11 = vnez %v7003_v50  ;;  %vm7006_vm7 = vcmp.gt.f32.partialorder %v7005_v23, 0.0  ;;  %v7007_v24 = vmov 0  ;;  %v7024_v23 = vld [vmem:[#allocation31_spill] sm:$0xff] }
 0x1f4   : > { %6988 = vst [vmem:[#allocation39_spill] sm:$0xff] %v6987_v44  ;;  %v4361_v51 = vmul.f32 %v6995_v12, %v6992_v33  ;;  %vm4366_vm0 = vcmp.lt.f32.partialorder %v6999_v20, 1.0  ;;  %vm4374_vm6 = vmand %vm7006_vm7, %vm7004_vm11  ;;  %vm7011_vm9 = vnez %v7010_v6  ;;  %v7012_v12 = vld [vmem:[#allocation96_spill] sm:$0xff]  ;;  %v7014_v53 = vmov 0  ;;  %v7026_v20 = vld [vmem:[#allocation27_spill] sm:$0xff] }
 0x1f5   : > { %v7001_v19 = vsel %vm4366_vm0, 4294967295, %v7000_v19  ;;  %v7008_v24 = vsel %vm4374_vm6, 4294967295, %v7007_v24  ;;  %vm7013_vm12 = vcmp.gt.f32.partialorder %v7012_v12, 0.0  ;;  %vm7018_vm15 = vnez %v7017_v16  ;;  %v7093_v12 = vld [vmem:[#allocation97_spill] sm:$0xff]  ;;  %v7229_v42 = vld [vmem:[#allocation123_spill] sm:$0xff] }
 0x1f6   : > { %6996 = vst [vmem:[#allocation124_spill] sm:$0xff] %v4361_v51  ;;  %vm4382_vm8 = vmand %vm7013_vm12, %vm7011_vm9  ;;  %vm7020_vm0 = vcmp.gt.f32.partialorder %v7019_v63, 0.0  ;;  %v7021_v50 = vmov 0  ;;  %vm7025_vm11 = vnez %v7024_v23  ;;  %vm7027_vm7 = vcmp.gt.f32.partialorder %v7026_v20, 0.0  ;;  %v7035_v63 = vld [vmem:[#allocation113_spill] sm:$0xff]  ;;  %v7088_v51 = vld [vmem:[#allocation46_spill] sm:$0xff] }
 0x1f7   : > { %7002 = vst [vmem:[#allocation28_spill] sm:$0xff] %v7001_v19  ;;  %v7015_v53 = vsel %vm4382_vm8, 4294967295, %v7014_v53  ;;  %vm4390_vm10 = vmand %vm7020_vm0, %vm7018_vm15  ;;  %v7028_v6 = vmov 0  ;;  %v7040_v23 = vld [vmem:[#allocation149_spill] sm:$0xff]  ;;  %vm7048_vm9 = vcmp.gt.f32.partialorder %v7047_v9, 0.0  ;;  %v7049_v16 = vmov 0 }
 0x1f8   : > { %7009 = vst [vmem:[#allocation93_spill] sm:$0xff] %v7008_v24  ;;  %v7022_v50 = vsel %vm4390_vm10, 4294967295, %v7021_v50  ;;  %vm4398_vm6 = vmand %vm7027_vm7, %vm7025_vm11  ;;  %v7036_v24 = vld [vmem:[#allocation167_spill] sm:$0xff]  ;;  %v7041_v20 = vand.u32 2147483647, %v7040_v23  ;;  %vm7053_vm7 = vnez %v7052_v11  ;;  %v7061_v23 = vld [vmem:[#allocation133_spill] sm:$0xff] }
 0x1f9   : > { %7016 = vst [vmem:[#allocation160_spill] sm:$0xff] %v7015_v53  ;;  %v7029_v6 = vsel %vm4398_vm6, 4294967295, %v7028_v6  ;;  %v7034_v53 = vld [vmem:[#allocation151_spill] sm:$0xff]  ;;  %v7037_v35 = vsub.f32 %v7035_v63, %v7036_v24  ;;  %v7056_v24 = vmov 0  ;;  %v7059_v63 = vld [vmem:[#allocation76_spill] sm:$0xff]  ;;  %v7066_v9 = vld [vmem:[#allocation22_spill] sm:$0xff] }
 0x1fa   : > { %7023 = vst [vmem:[#allocation29_spill] sm:$0xff] %v7022_v50  ;;  %vm4414_vm15 = vcmp.lt.f32.partialorder %v7041_v20, 1.0  ;;  %vm7060_vm12 = vnez %v7059_v63  ;;  %v7068_v20 = vld [vmem:[#allocation40_spill] sm:$0xff]  ;;  %v7070_v11 = vmov 0  ;;  %v7084_v44 = vmov 0 }
 0x1fb   : > { %7030 = vst [vmem:[#allocation126_spill] sm:$0xff] %v7029_v6  ;;  %v4409_v19 = vmul.f32 %v7037_v35, %v7034_v53  ;;  %v7043_v49 = vsel %vm4414_vm15, 4294967295, %v7042_v49  ;;  %v7045_v6 = vld [vmem:[#allocation69_spill] sm:$0xff]  ;;  %v7054_v35 = vld [vmem:[#allocation131_spill] sm:$0xff]  ;;  %vm7062_vm15 = vcmp.gt.f32.partialorder %v7061_v23, 0.0  ;;  %v7077_v23 = vld [vmem:[#allocation114_spill] sm:$0xff] }
 0x1fc   : > { %7044 = vst [vmem:[#allocation132_spill] sm:$0xff] %v7043_v49  ;;  %vm7046_vm0 = vnez %v7045_v6  ;;  %vm7055_vm6 = vcmp.gt.f32.partialorder %v7054_v35, 0.0  ;;  %vm4438_vm8 = vmand %vm7062_vm15, %vm7060_vm12  ;;  %v7063_v6 = vmov 0  ;;  %v7090_v63 = vmov 0  ;;  %v7116_v35 = vld [vmem:[#allocation169_spill] sm:$0xff] }
 0x1fd   : > { %7038 = vst [vmem:[#allocation32_spill] sm:$0xff] %v4409_v19  ;;  %vm4422_vm11 = vmand %vm7048_vm9, %vm7046_vm0  ;;  %v7064_v6 = vsel %vm4438_vm8, 4294967295, %v7063_v6  ;;  %vm7067_vm0 = vnez %v7066_v9  ;;  %vm7069_vm9 = vcmp.gt.f32.partialorder %v7068_v20, 0.0  ;;  %v7082_v9 = vld [vmem:[#allocation54_spill] sm:$0xff]  ;;  %v7129_v19 = vld [vmem:[#allocation17_spill] sm:$0xff]  ;;  %v7141_v61 = vmov 0 }
 0x1fe   : > { %v7050_v16 = vsel %vm4422_vm11, 4294967295, %v7049_v16  ;;  %vm4430_vm10 = vmand %vm7055_vm6, %vm7053_vm7  ;;  %7065 = vst [vmem:[#allocation33_spill] sm:$0xff] %v7064_v6  ;;  %v7081_v6 = vld [vmem:[#allocation158_spill] sm:$0xff]  ;;  %v7083_v20 = vand.u32 2147483647, %v7082_v9  ;;  %vm7089_vm7 = vcmp.gt.f32.partialorder %v7088_v51, 0.0 }
 0x1ff   : > { %7051 = vst [vmem:[#allocation94_spill] sm:$0xff] %v7050_v16  ;;  %v7057_v24 = vsel %vm4430_vm10, 4294967295, %v7056_v24  ;;  %vm4446_vm11 = vmand %vm7069_vm9, %vm7067_vm0  ;;  %v7078_v16 = vld [vmem:[#allocation168_spill] sm:$0xff]  ;;  %vm7094_vm9 = vnez %v7093_v12  ;;  %v7102_v9 = vld [vmem:[#allocation53_spill] sm:$0xff]  ;;  %v7111_v12 = vmov 0 }
 0x200   : > { %7058 = vst [vmem:[#allocation161_spill] sm:$0xff] %v7057_v24  ;;  %v7071_v11 = vsel %vm4446_vm11, 4294967295, %v7070_v11  ;;  %v7076_v24 = vld [vmem:[#allocation152_spill] sm:$0xff]  ;;  %v7079_v50 = vsub.f32 %v7077_v23, %v7078_v16  ;;  %vm4462_vm12 = vcmp.lt.f32.partialorder %v7083_v20, 1.0  ;;  %v7097_v16 = vmov 0  ;;  %v7100_v23 = vld [vmem:[#allocation89_spill] sm:$0xff] }
 0x201   : > { %7072 = vst [vmem:[#allocation38_spill] sm:$0xff] %v7071_v11  ;;  %v7085_v44 = vsel %vm4462_vm12, 4294967295, %v7084_v44  ;;  %v7086_v11 = vld [vmem:[#allocation24_spill] sm:$0xff]  ;;  %vm7101_vm6 = vnez %v7100_v23  ;;  %vm7103_vm12 = vcmp.gt.f32.partialorder %v7102_v9, 0.0  ;;  %v7107_v51 = vld [vmem:[#allocation159_spill] sm:$0xff]  ;;  %v7109_v20 = vld [vmem:[#allocation170_spill] sm:$0xff] }
 0x202   : > { %v4457_v49 = vmul.f32 %v7079_v50, %v7076_v24  ;;  %vm7087_vm15 = vnez %v7086_v11  ;;  %v7095_v50 = vld [vmem:[#allocation147_spill] sm:$0xff]  ;;  %vm4486_vm10 = vmand %vm7103_vm12, %vm7101_vm6  ;;  %v7104_v11 = vmov 0  ;;  %v7213_v24 = vld [vmem:[#allocation157_spill] sm:$0xff] }
 0x203   : > { %vm4470_vm0 = vmand %vm7089_vm7, %vm7087_vm15  ;;  %vm7096_vm11 = vcmp.gt.f32.partialorder %v7095_v50, 0.0  ;;  %v7105_v11 = vsel %vm4486_vm10, 4294967295, %v7104_v11  ;;  %vm7108_vm15 = vnez %v7107_v51  ;;  %vm7110_vm7 = vcmp.gt.f32.partialorder %v7109_v20, 0.0  ;;  %v7115_v9 = vld [vmem:[#allocation115_spill] sm:$0xff]  ;;  %v7119_v51 = vld [vmem:[#allocation150_spill] sm:$0xff] }
 0x204   : > { %7080 = vst [vmem:[#allocation134_spill] sm:$0xff] %v4457_v49  ;;  %v7091_v63 = vsel %vm4470_vm0, 4294967295, %v7090_v63  ;;  %vm4478_vm8 = vmand %vm7096_vm11, %vm7094_vm9  ;;  %v7117_v49 = vsub.f32 %v7115_v9, %v7116_v35  ;;  %v7120_v20 = vand.u32 2147483647, %v7119_v51  ;;  %v7125_v50 = vld [vmem:[#allocation154_spill] sm:$0xff]  ;;  %v7130_v51 = vld [vmem:[#allocation171_spill] sm:$0xff] }
 0x205   : > { %7092 = vst [vmem:[#allocation139_spill] sm:$0xff] %v7091_v63  ;;  %v7098_v16 = vsel %vm4478_vm8, 4294967295, %v7097_v16  ;;  %vm4494_vm0 = vmand %vm7110_vm7, %vm7108_vm15  ;;  %v7121_v63 = vmov 0  ;;  %vm7126_vm9 = vcmp.gt.f32.partialorder %v7125_v50, 0.0  ;;  %v2226_v9 = vmov 1.0   ;;  %v7220_v33 = vld [vmem:[#allocation160_spill] sm:$0xff] }
 0x206   : > { %7099 = vst [vmem:[#allocation95_spill] sm:$0xff] %v7098_v16  ;;  %v7112_v12 = vsel %vm4494_vm0, 4294967295, %v7111_v12  ;;  %v4505_v16 = vmul.f32 %v7117_v49, %v7114_v32  ;;  %vm4510_vm6 = vcmp.lt.f32.partialorder %v7120_v20, 1.0  ;;  %v7131_v20 = vand.u32 2147483647, %v7130_v51  ;;  %v7138_v51 = vld [vmem:[#allocation84_spill] sm:$0xff] }
 0x207   : > { %7106 = vst [vmem:[#allocation47_spill] sm:$0xff] %v7105_v11  ;;  %v7118_v11 = vld [vmem:[#allocation70_spill] sm:$0xff]  ;;  %v7122_v63 = vsel %vm4510_vm6, 4294967295, %v7121_v63  ;;  %vm7134_vm6 = vnez %v6836_v0  ;;  %vm7146_vm7 = vnez %v6853_v46  ;;  %v7150_v35 = vmov 0  ;;  %v7280_v23 = vld [vmem:[#allocation179_spill] sm:$0xff] }
 0x208   : > { %7113 = vst [vmem:[#allocation140_spill] sm:$0xff] %v7112_v12  ;;  %v7123_v12 = vld [vmem:[#allocation26_spill] sm:$0xff]  ;;  %vm4528_vm11 = vcmp.lt.f32.partialorder %v7131_v20, 1.0  ;;  %v7139_v20 = vld [vmem:[#allocation172_spill] sm:$0xff]  ;;  %v4568_v29 = vsel %vm7146_vm7, 11.0, %v2226_v9  ;;  %v4588_v46 = vsel %vm4134_vm3, 11.0, %v2226_v9 }
 0x209   : > { %vm7124_vm12 = vnez %v7123_v12  ;;  %v7133_v25 = vsel %vm4528_vm11, 4294967295, %v7132_v25  ;;  %v7136_v12 = vmov 0  ;;  %v7140_v14 = vand.u32 2147483647, %v7139_v20  ;;  %v7148_v20 = vld [vmem:[#allocation173_spill] sm:$0xff] }
 0x20a   : > { %vm4518_vm15 = vmand %vm7126_vm9, %vm7124_vm12  ;;  %vm7135_vm12 = vcmp.gt.f32.partialorder %v6832_v34, 0.0  ;;  %v7144_v34 = vmov 0  ;;  %v7149_v50 = vand.u32 2147483647, %v7148_v20  ;;  %v7157_v20 = vand.u32 2147483647, %v7156_v17 }
 0x20b   : > { %vm4536_vm9 = vmand %vm7135_vm12, %vm7134_vm6  ;;  %vm4546_vm11 = vcmp.lt.f32.partialorder %v7140_v14, 1.0  ;;  %vm7143_vm6 = vcmp.gt.f32.partialorder %v3690_v3, 0.0  ;;  %v4563_v14 = vsel %vm4102_vm5, 11.0, %v2226_v9  ;;  %v7147_v3 = vld [vmem:[#allocation25_spill] sm:$0xff]  ;;  %v7158_v49 = vmov 0 }
 0x20c   : > { %v7137_v12 = vsel %vm4536_vm9, 4294967295, %v7136_v12  ;;  %v7142_v61 = vsel %vm4546_vm11, 4294967295, %v7141_v61  ;;  %vm4554_vm12 = vmand %vm7143_vm6, %vm4094_vm13  ;;  %vm4573_vm6 = vcmp.lt.f32.partialorder %v7149_v50, 1.0  ;;  %vm7152_vm11 = vnez %v6863_v62 }
 0x20d   : > { %v7145_v34 = vsel %vm4554_vm12, 4294967295, %v7144_v34  ;;  %v7151_v35 = vsel %vm4573_vm6, 4294967295, %v7150_v35  ;;  %vm7153_vm12 = vcmp.gt.f32.partialorder %v3708_v40, 0.0  ;;  %v4593_v50 = vsel %vm4142_vm4, 11.0, %v2226_v9 }
 0x20e   : > { %vm4581_vm9 = vmand %vm7153_vm12, %vm7152_vm11  ;;  %v4598_v62 = vsel %vm4150_vm1, 11.0, %v2226_v9  ;;  %v4603_v40 = vsel %vm4158_vm2, 11.0, %v2226_v9  ;;  %vm4608_vm3 = vcmp.lt.f32.partialorder %v7157_v20, 1.0  ;;  %vm7160_vm4 = vnez %v6885_v21 }
 0x20f   : > { %v7159_v49 = vsel %vm4608_vm3, 4294967295, %v7158_v49  ;;  %vm7161_vm11 = vcmp.gt.f32.partialorder %v3723_v2, 0.0  ;;  %v4623_v18 = vsel %vm4182_vm14, 11.0, %v2226_v9  ;;  %vm7164_vm1 = vnez %v6891_v27 }
 0x210   : > { %vm4616_vm7 = vmand %vm7161_vm11, %vm7160_vm4  ;;  %v4628_v60 = vsel %vm7164_vm1, 11.0, %v2226_v9  ;;  %vm7165_vm2 = vnez %v6894_v1  ;;  %vm7166_vm12 = vnez %v6897_v13  ;;  %v7168_v17 = vand.u32 2147483647, %v7167_v38 }
 0x211   : > { %v4633_v21 = vsel %vm7165_vm2, 11.0, %v2226_v9  ;;  %v4638_v2 = vsel %vm7166_vm12, 11.0, %v2226_v9  ;;  %v7169_v20 = vmov 0  ;;  %vm7171_vm11 = vnez %v6909_v5 }
 0x212   : > { %vm4643_vm14 = vcmp.lt.f32.partialorder %v7168_v17, 1.0  ;;  %vm7172_vm1 = vcmp.gt.f32.partialorder %v3732_v28, 0.0  ;;  %vm7175_vm2 = vnez %v6913_v30  ;;  %vm7176_vm12 = vnez %v6917_v4  ;;  %v7179_v30 = vld [vmem:[#allocation176_spill] sm:$0xff] }
 0x213   : > { %v7170_v20 = vsel %vm4643_vm14, 4294967295, %v7169_v20  ;;  %vm4651_vm5 = vmand %vm7172_vm1, %vm7171_vm11  ;;  %v4658_v1 = vsel %vm7175_vm2, 11.0, %v2226_v9  ;;  %v4663_v13 = vsel %vm7176_vm12, 11.0, %v2226_v9  ;;  %vm7177_vm4 = vnez %v6921_v8 }
 0x214   : > { %v4668_v5 = vsel %vm7177_vm4, 11.0, %v2226_v9  ;;  %vm7178_vm11 = vnez %v6925_v48  ;;  %v7180_v38 = vand.u32 2147483647, %v7179_v30  ;;  %v7181_v17 = vmov 0 }
 0x215   : > { %v4673_v28 = vsel %vm7178_vm11, 11.0, %v2226_v9  ;;  %vm7183_vm12 = vnez %v6936_v57  ;;  %vm7184_vm13 = vcmp.gt.f32.partialorder %v3741_v47, 0.0  ;;  %vm7187_vm4 = vnez %v6940_v55  ;;  %v7191_v55 = vld [vmem:[#allocation155_spill] sm:$0xff] }
 0x216   : > { %vm4678_vm2 = vcmp.lt.f32.partialorder %v7180_v38, 1.0  ;;  %vm4686_vm14 = vmand %vm7184_vm13, %vm7183_vm12  ;;  %v4693_v8 = vsel %vm7187_vm4, 11.0, %v2226_v9  ;;  %vm7188_vm11 = vnez %v6944_v22  ;;  %vm7189_vm1 = vnez %v6948_v58 }
 0x217   : > { %v7182_v17 = vsel %vm4678_vm2, 4294967295, %v7181_v17  ;;  %v4698_v48 = vsel %vm7188_vm11, 11.0, %v2226_v9  ;;  %v4703_v57 = vsel %vm7189_vm1, 11.0, %v2226_v9  ;;  %vm7190_vm13 = vnez %v6952_v37 }
 0x218   : > { %v4708_v47 = vsel %vm7190_vm13, 11.0, %v2226_v9  ;;  %v7192_v30 = vand.u32 2147483647, %v7191_v55  ;;  %v7193_v38 = vmov 0  ;;  %vm7195_vm11 = vnez %v6963_v7 }
 0x219   : > { %vm7196_vm2 = vcmp.gt.f32.partialorder %v3750_v54, 0.0  ;;  %vm7199_vm1 = vnez %v6969_v31  ;;  %vm7200_vm13 = vnez %v6975_v41  ;;  %vm7201_vm12 = vnez %v6981_v43  ;;  %v7203_v54 = vld [vmem:[#allocation39_spill] sm:$0xff]  ;;  %v7207_v31 = vld [vmem:[#allocation177_spill] sm:$0xff]  ;;  %v7211_v41 = vld [vmem:[#allocation28_spill] sm:$0xff] }
 0x21a   : > { %vm4713_vm4 = vcmp.lt.f32.partialorder %v7192_v30, 1.0  ;;  %vm4721_vm3 = vmand %vm7196_vm2, %vm7195_vm11  ;;  %v4728_v58 = vsel %vm7199_vm1, 11.0, %v2226_v9  ;;  %v4733_v37 = vsel %vm7200_vm13, 11.0, %v2226_v9  ;;  %v4738_v7 = vsel %vm7201_vm12, 11.0, %v2226_v9  ;;  %v7206_v30 = vld [vmem:[#allocation118_spill] sm:$0xff] }
 0x21b   : > { %v7194_v38 = vsel %vm4713_vm4, 4294967295, %v7193_v38  ;;  %7202 = vst [vmem:[#allocation101_spill] sm:$0xff] %v4738_v7  ;;  %vm7204_vm2 = vnez %v7203_v54  ;;  %v7208_v0 = vand.u32 2147483647, %v7207_v31  ;;  %v7209_v32 = vmov 0  ;;  %v7217_v54 = vld [vmem:[#allocation93_spill] sm:$0xff] }
 0x21c   : > { %v4743_v55 = vsel %vm7204_vm2, 11.0, %v2226_v9  ;;  %vm7212_vm13 = vnez %v7211_v41  ;;  %vm7214_vm4 = vcmp.gt.f32.partialorder %v7213_v24, 0.0  ;;  %v7215_v43 = vmov 0  ;;  %v7223_v31 = vld [vmem:[#allocation29_spill] sm:$0xff]  ;;  %v7226_v24 = vld [vmem:[#allocation126_spill] sm:$0xff] }
 0x21d   : > { %7205 = vst [vmem:[#allocation162_spill] sm:$0xff] %v4743_v55  ;;  %vm4748_vm1 = vcmp.lt.f32.partialorder %v7208_v0, 1.0  ;;  %vm4756_vm6 = vmand %vm7214_vm4, %vm7212_vm13  ;;  %vm7218_vm12 = vnez %v7217_v54  ;;  %vm7221_vm2 = vnez %v7220_v33  ;;  %vm7224_vm11 = vnez %v7223_v31  ;;  %v7230_v54 = vld [vmem:[#allocation178_spill] sm:$0xff]  ;;  %v7234_v33 = vld [vmem:[#allocation132_spill] sm:$0xff] }
 0x21e   : > { %v7210_v32 = vsel %vm4748_vm1, 4294967295, %v7209_v32  ;;  %v7216_v43 = vsel %vm4756_vm6, 4294967295, %v7215_v43  ;;  %v4763_v53 = vsel %vm7218_vm12, 11.0, %v2226_v9  ;;  %v4768_v0 = vsel %vm7221_vm2, 11.0, %v2226_v9  ;;  %v7252_v55 = vld [vmem:[#allocation92_spill] sm:$0xff] }
 0x21f   : > { %7219 = vst [vmem:[#allocation61_spill] sm:$0xff] %v4763_v53  ;;  %v4773_v41 = vsel %vm7224_vm11, 11.0, %v2226_v9  ;;  %vm7227_vm4 = vnez %v7226_v24  ;;  %v7231_v26 = vand.u32 2147483647, %v7230_v54  ;;  %vm7235_vm2 = vnez %v7234_v33  ;;  %v7240_v24 = vld [vmem:[#allocation94_spill] sm:$0xff]  ;;  %v7246_v54 = vld [vmem:[#allocation33_spill] sm:$0xff] }
 0x220   : > { %7222 = vst [vmem:[#allocation45_spill] sm:$0xff] %v4768_v0  ;;  %v4778_v36 = vsel %vm7227_vm4, 11.0, %v2226_v9  ;;  %v7236_v0 = vld [vmem:[#allocation81_spill] sm:$0xff]  ;;  %v7238_v31 = vmov 0  ;;  %vm7241_vm11 = vnez %v7240_v24  ;;  %vm7247_vm13 = vnez %v7246_v54  ;;  %v7253_v24 = vld [vmem:[#allocation67_spill] sm:$0xff] }
 0x221   : > { %7225 = vst [vmem:[#allocation102_spill] sm:$0xff] %v4773_v41  ;;  %vm4783_vm12 = vcmp.lt.f32.partialorder %v7231_v26, 1.0  ;;  %vm7237_vm1 = vcmp.gt.f32.partialorder %v7236_v0, 0.0  ;;  %v7243_v41 = vld [vmem:[#allocation161_spill] sm:$0xff]  ;;  %v4808_v33 = vsel %vm7247_vm13, 11.0, %v2226_v9  ;;  %v7249_v0 = vld [vmem:[#allocation38_spill] sm:$0xff] }
 0x222   : > { %7228 = vst [vmem:[#allocation163_spill] sm:$0xff] %v4778_v36  ;;  %v7233_v39 = vsel %vm4783_vm12, 4294967295, %v7232_v39  ;;  %vm4791_vm6 = vmand %vm7237_vm1, %vm7235_vm2  ;;  %v4798_v36 = vsel %vm7241_vm11, 11.0, %v2226_v9  ;;  %vm7244_vm4 = vnez %v7243_v41  ;;  %vm7250_vm1 = vnez %v7249_v0  ;;  %v7261_v54 = vld [vmem:[#allocation139_spill] sm:$0xff]  ;;  %v7314_v41 = vld [vmem:[#allocation34_spill] sm:$0xff] }
 0x223   : > { %v7239_v31 = vsel %vm4791_vm6, 4294967295, %v7238_v31  ;;  %7242 = vst [vmem:[#allocation141_spill] sm:$0xff] %v4798_v36  ;;  %v4803_v26 = vsel %vm7244_vm4, 11.0, %v2226_v9  ;;  %v4813_v53 = vsel %vm7250_vm1, 11.0, %v2226_v9  ;;  %vm909_vm2 = vcmp.gt.f32.partialorder %v7252_v55, 0.0  ;;  %v7414_v36 = vld [vmem:[#allocation74_spill] sm:$0xff] }
 0x224   : > { %7245 = vst [vmem:[#allocation103_spill] sm:$0xff] %v4803_v26  ;;  %v7254_v7 = vand.u32 2147483647, %v7253_v24  ;;  %vm7257_vm4 = vnez %v7085_v44  ;;  %vm7258_vm12 = vcmp.gt.f32.partialorder %v7081_v6, 0.0  ;;  %vm7262_vm13 = vnez %v7261_v54  ;;  %v7267_v26 = vld [vmem:[#allocation124_spill] sm:$0xff] }
 0x225   : > { %7248 = vst [vmem:[#allocation59_spill] sm:$0xff] %v4808_v33  ;;  %vm4826_vm6 = vmand %vm7258_vm12, %vm7257_vm4  ;;  %v4833_v0 = vsel %vm7262_vm13, 11.0, %v2226_v9  ;;  %v4843_v44 = vsel %vm4486_vm10, 11.0, %v2226_v9  ;;  %v4848_v33 = vsel %vm4494_vm0, 11.0, %v2226_v9  ;;  %v7268_v54 = vld [vmem:[#allocation156_spill] sm:$0xff]  ;;  %vm7273_vm4 = vcmp.gt.f32.partialorder %v7118_v11, 0.0 }
 0x226   : > { %7251 = vst [vmem:[#allocation104_spill] sm:$0xff] %v4813_v53  ;;  %vm4818_vm11 = vcmp.lt.f32.partialorder %v7254_v7, 1.0  ;;  %v4838_v7 = vsel %vm4478_vm8, 11.0, %v2226_v9  ;;  %v7269_v55 = vand.u32 2147483647, %v7268_v54  ;;  %vm7272_vm8 = vnez %v7122_v63  ;;  %v7279_v6 = vld [vmem:[#allocation32_spill] sm:$0xff] }
 0x227   : > { %7263 = vst [vmem:[#allocation60_spill] sm:$0xff] %v4833_v0  ;;  %vm4861_vm13 = vmand %vm7273_vm4, %vm7272_vm8  ;;  %v4868_v24 = vsel %vm4518_vm15, 11.0, %v2226_v9  ;;  %vm7277_vm10 = vnez %v7137_v12  ;;  %vm7278_vm0 = vnez %v7145_v34  ;;  %v4883_v11 = vsel %vm4581_vm9, 11.0, %v2226_v9  ;;  %v7429_v0 = vld [vmem:[#allocation79_spill] sm:$0xff] }
 0x228   : > { %vm4853_vm1 = vcmp.lt.f32.partialorder %v7269_v55, 1.0  ;;  %7276 = vst [vmem:[#allocation106_spill] sm:$0xff] %v4868_v24  ;;  %v4873_v55 = vsel %vm7277_vm10, 11.0, %v2226_v9  ;;  %v4878_v63 = vsel %vm7278_vm0, 11.0, %v2226_v9  ;;  %vm911_vm8 = vcmp.gt.f32.partialorder %v7279_v6, 0.0  ;;  %v7445_v12 = vld [vmem:[#allocation87_spill] sm:$0xff] }
 0x229   : > { %v7281_v54 = vand.u32 2147483647, %v7280_v23  ;;  %vm7284_vm4 = vnez %v7133_v25  ;;  %vm7285_vm10 = vcmp.gt.f32.partialorder %v7129_v19, 0.0  ;;  %v4903_v34 = vsel %vm4616_vm7, 11.0, %v2226_v9  ;;  %v7290_v23 = vld [vmem:[#allocation134_spill] sm:$0xff] }
 0x22a   : > { %vm4896_vm12 = vmand %vm7285_vm10, %vm7284_vm4  ;;  %7288 = vst [vmem:[#allocation164_spill] sm:$0xff] %v4903_v34  ;;  %v4908_v45 = vsel %vm4651_vm5, 11.0, %v2226_v9  ;;  %v4913_v25 = vsel %vm4686_vm14, 11.0, %v2226_v9  ;;  %v4918_v19 = vsel %vm4721_vm3, 11.0, %v2226_v9  ;;  %vm912_vm9 = vcmp.gt.f32.partialorder %v7290_v23, 0.0  ;;  %v7454_v23 = vld [vmem:[#allocation99_spill] sm:$0xff] }
 0x22b   : > { %vm4888_vm15 = vcmp.lt.f32.partialorder %v7281_v54, 1.0  ;;  %7289 = vst [vmem:[#allocation142_spill] sm:$0xff] %v4918_v19  ;;  %v7292_v54 = vand.u32 2147483647, %v7291_v52  ;;  %vm7295_vm5 = vnez %v7142_v61  ;;  %vm7296_vm0 = vcmp.gt.f32.partialorder %v7138_v51, 0.0  ;;  %v7303_v51 = vld [vmem:[#allocation30_spill] sm:$0xff] }
 0x22c   : > { %vm4931_vm4 = vmand %vm7296_vm0, %vm7295_vm5  ;;  %vm7299_vm3 = vnez %v7216_v43  ;;  %vm7301_vm14 = vnez %v7239_v31  ;;  %v4948_v61 = vsel %vm4826_vm6, 11.0, %v2226_v9  ;;  %v7304_v52 = vand.u32 2147483647, %v7303_v51  ;;  %v7306_v43 = vld [vmem:[#allocation181_spill] sm:$0xff]  ;;  %v7464_v31 = vld [vmem:[#allocation110_spill] sm:$0xff] }
 0x22d   : > { %vm4923_vm7 = vcmp.lt.f32.partialorder %v7292_v54, 1.0  ;;  %v4938_v4 = vsel %vm7299_vm3, 11.0, %v2226_v9  ;;  %v4943_v22 = vsel %vm7301_vm14, 11.0, %v2226_v9  ;;  %7302 = vst [vmem:[#allocation75_spill] sm:$0xff] %v4948_v61  ;;  %vm913_vm10 = vcmp.gt.f32.partialorder %v4505_v16, 0.0 }
 0x22e   : > { %7300 = vst [vmem:[#allocation107_spill] sm:$0xff] %v4938_v4  ;;  %v4953_v54 = vmul.f32 %v4563_v14, %v7304_v52  ;;  %v7307_v19 = vand.u32 2147483647, %v7306_v43  ;;  %vm7310_vm0 = vnez %v7151_v35  ;;  %vm7311_vm3 = vcmp.gt.f32.partialorder %v7147_v3, 0.0  ;;  %v7317_v52 = vld [vmem:[#allocation35_spill] sm:$0xff]  ;;  %v7320_v3 = vld [vmem:[#allocation36_spill] sm:$0xff] }
 0x22f   : > { %vm4966_vm14 = vmand %vm7311_vm3, %vm7310_vm0  ;;  %v4973_v14 = vsel %vm4861_vm13, 11.0, %v2226_v9  ;;  %v7315_v51 = vand.u32 2147483647, %v7314_v41  ;;  %v7318_v43 = vand.u32 2147483647, %v7317_v52  ;;  %vm7323_vm6 = vnez %v7159_v49  ;;  %v7443_v24 = vld [vmem:[#allocation60_spill] sm:$0xff] }
 0x230   : > { %7305 = vst [vmem:[#allocation108_spill] sm:$0xff] %v4953_v54  ;;  %vm4958_vm5 = vcmp.lt.f32.partialorder %v7307_v19, 1.0  ;;  %v7321_v54 = vand.u32 2147483647, %v7320_v3  ;;  %vm7324_vm13 = vcmp.gt.f32.partialorder %v4073_v59, 0.0  ;;  %v7333_v59 = vld [vmem:[#allocation42_spill] sm:$0xff]  ;;  %vm7336_vm3 = vnez %v7170_v20 }
 0x231   : > { %v4978_v19 = vmul.f32 %v4568_v29, %v7315_v51  ;;  %v4983_v35 = vmul.f32 %v4588_v46, %v7318_v43  ;;  %vm4994_vm0 = vmand %vm7324_vm13, %vm7323_vm6  ;;  %v5001_v29 = vsel %vm4896_vm12, 11.0, %v2226_v9  ;;  %v7327_v46 = vld [vmem:[#allocation37_spill] sm:$0xff]  ;;  %v7334_v52 = vand.u32 2147483647, %v7333_v59 }
 0x232   : > { %v4988_v61 = vmul.f32 %v4593_v50, %v7321_v54  ;;  %v7328_v41 = vand.u32 2147483647, %v7327_v46  ;;  %v7330_v50 = vld [vmem:[#allocation41_spill] sm:$0xff]  ;;  %vm7337_vm12 = vcmp.gt.f32.partialorder %v4089_v56, 0.0  ;;  %v7346_v56 = vld [vmem:[#allocation48_spill] sm:$0xff]  ;;  %vm7349_vm13 = vnez %v7182_v17  ;;  %v7359_v17 = vld [vmem:[#allocation51_spill] sm:$0xff] }
 0x233   : > { %7316 = vst [vmem:[#allocation165_spill] sm:$0xff] %v4978_v19  ;;  %v7331_v54 = vand.u32 2147483647, %v7330_v50  ;;  %v5016_v43 = vmul.f32 %v4623_v18, %v7334_v52  ;;  %vm5022_vm6 = vmand %vm7337_vm12, %vm7336_vm3  ;;  %v7343_v18 = vld [vmem:[#allocation44_spill] sm:$0xff]  ;;  %v7347_v50 = vand.u32 2147483647, %v7346_v56  ;;  %vm7362_vm12 = vnez %v7194_v38 }
 0x234   : > { %7319 = vst [vmem:[#allocation52_spill] sm:$0xff] %v4983_v35  ;;  %v5006_v51 = vmul.f32 %v4598_v62, %v7328_v41  ;;  %v5029_v62 = vsel %vm4931_vm4, 11.0, %v2226_v9  ;;  %v7344_v41 = vand.u32 2147483647, %v7343_v18  ;;  %vm7350_vm4 = vcmp.gt.f32.partialorder %v4121_v10, 0.0  ;;  %v7353_v59 = vld [vmem:[#allocation49_spill] sm:$0xff] }
 0x235   : > { %7322 = vst [vmem:[#allocation15_spill] sm:$0xff] %v4988_v61  ;;  %v5011_v49 = vmul.f32 %v4603_v40, %v7331_v54  ;;  %v7340_v40 = vld [vmem:[#allocation43_spill] sm:$0xff]  ;;  %v5044_v54 = vmul.f32 %v4638_v2, %v7347_v50  ;;  %vm5050_vm3 = vmand %vm7350_vm4, %vm7349_vm13  ;;  %v7360_v10 = vand.u32 2147483647, %v7359_v17  ;;  %vm7363_vm13 = vcmp.gt.f32.partialorder %v4169_v15, 0.0  ;;  %v7369_v50 = vld [vmem:[#allocation56_spill] sm:$0xff] }
 0x236   : > { %7329 = vst [vmem:[#allocation20_spill] sm:$0xff] %v5006_v51  ;;  %v7341_v3 = vand.u32 2147483647, %v7340_v40  ;;  %v5039_v20 = vmul.f32 %v4633_v21, %v7344_v41  ;;  %v7354_v21 = vand.u32 2147483647, %v7353_v59  ;;  %v7356_v40 = vld [vmem:[#allocation50_spill] sm:$0xff]  ;;  %vm7375_vm4 = vnez %v7210_v32 }
 0x237   : > { %7332 = vst [vmem:[#allocation62_spill] sm:$0xff] %v5011_v49  ;;  %v7357_v2 = vand.u32 2147483647, %v7356_v40  ;;  %v5070_v18 = vmul.f32 %v4668_v5, %v7360_v10  ;;  %v7366_v41 = vld [vmem:[#allocation55_spill] sm:$0xff]  ;;  %v7370_v5 = vand.u32 2147483647, %v7369_v50 }
 0x238   : > { %7335 = vst [vmem:[#allocation82_spill] sm:$0xff] %v5016_v43  ;;  %v5034_v46 = vmul.f32 %v4628_v60, %v7341_v3  ;;  %v1202_v60 = vsel %vm4966_vm14, 11.0, %v2226_v9  ;;  %v5060_v52 = vmul.f32 %v4658_v1, %v7354_v21  ;;  %vm5076_vm14 = vmand %vm7363_vm13, %vm7362_vm12  ;;  %v1203_v1 = vsel %vm4994_vm0, 11.0, %v2226_v9  ;;  %v7372_v38 = vld [vmem:[#allocation57_spill] sm:$0xff]  ;;  %v7379_v40 = vld [vmem:[#allocation58_spill] sm:$0xff] }
 0x239   : > { %7345 = vst [vmem:[#allocation21_spill] sm:$0xff] %v5039_v20  ;;  %v5065_v3 = vmul.f32 %v4663_v13, %v7357_v2  ;;  %v7367_v13 = vand.u32 2147483647, %v7366_v41  ;;  %v5091_v59 = vmul.f32 %v4693_v8, %v7370_v5  ;;  %v7373_v15 = vand.u32 2147483647, %v7372_v38  ;;  %v7382_v17 = vld [vmem:[#allocation63_spill] sm:$0xff] }
 0x23a   : > { %7342 = vst [vmem:[#allocation16_spill] sm:$0xff] %v5034_v46  ;;  %vm7376_vm12 = vcmp.gt.f32.partialorder %v7206_v30, 0.0  ;;  %v7380_v8 = vand.u32 2147483647, %v7379_v40  ;;  %v7385_v32 = vld [vmem:[#allocation64_spill] sm:$0xff]  ;;  %vm7388_vm13 = vnez %v7233_v39  ;;  %v7395_v5 = vld [vmem:[#allocation66_spill] sm:$0xff] }
 0x23b   : > { %7348 = vst [vmem:[#allocation68_spill] sm:$0xff] %v5044_v54  ;;  %v5086_v56 = vmul.f32 %v4673_v28, %v7367_v13  ;;  %v5096_v21 = vmul.f32 %v4698_v48, %v7373_v15  ;;  %vm5102_vm0 = vmand %vm7376_vm12, %vm7375_vm4  ;;  %v1204_v28 = vsel %vm5022_vm6, 11.0, %v2226_v9  ;;  %v7383_v48 = vand.u32 2147483647, %v7382_v17  ;;  %v7392_v13 = vld [vmem:[#allocation65_spill] sm:$0xff]  ;;  %v7399_v39 = vld [vmem:[#allocation71_spill] sm:$0xff] }
 0x23c   : > { %7355 = vst [vmem:[#allocation23_spill] sm:$0xff] %v5060_v52  ;;  %v5112_v2 = vmul.f32 %v4703_v57, %v7380_v8  ;;  %v7386_v30 = vand.u32 2147483647, %v7385_v32  ;;  %vm7389_vm4 = vcmp.gt.f32.partialorder %v7229_v42, 0.0  ;;  %v1205_v57 = vsel %vm5050_vm3, 11.0, %v2226_v9  ;;  %v7397_v38 = vld [vmem:[#allocation101_spill] sm:$0xff]  ;;  %vm5154_vm3 = vmand %vm909_vm2, %vm4818_vm11 }
 0x23d   : > { %7358 = vst [vmem:[#allocation109_spill] sm:$0xff] %v5065_v3  ;;  %v5117_v10 = vmul.f32 %v4708_v47, %v7383_v48  ;;  %vm5128_vm6 = vmand %vm7389_vm4, %vm7388_vm13  ;;  %v7393_v47 = vand.u32 2147483647, %v7392_v13  ;;  %v7400_v42 = vand.u32 2147483647, %v7399_v39  ;;  %v7401_v40 = vld [vmem:[#allocation162_spill] sm:$0xff] }
 0x23e   : > { %7361 = vst [vmem:[#allocation166_spill] sm:$0xff] %v5070_v18  ;;  %v5122_v41 = vmul.f32 %v4728_v58, %v7386_v30  ;;  %v7396_v58 = vand.u32 2147483647, %v7395_v5  ;;  %v7406_v48 = vld [vmem:[#allocation72_spill] sm:$0xff]  ;;  %v7408_v30 = vld [vmem:[#allocation61_spill] sm:$0xff]  ;;  %vm7418_vm2 = vcmp.gt.f32.partialorder %v7267_v26, 0.0 }
 0x23f   : > { %7368 = vst [vmem:[#allocation148_spill] sm:$0xff] %v5086_v56  ;;  %v5138_v50 = vmul.f32 %v4733_v37, %v7393_v47  ;;  %v5148_v8 = vmul.f32 %v7401_v40, %v7400_v42  ;;  %v1206_v37 = vsel %vm5076_vm14, 11.0, %v2226_v9  ;;  %v7407_v32 = vand.u32 2147483647, %v7406_v48  ;;  %v7410_v47 = vld [vmem:[#allocation73_spill] sm:$0xff]  ;;  %v7416_v42 = vld [vmem:[#allocation102_spill] sm:$0xff]  ;;  %vm5180_vm11 = vmand %vm7418_vm2, %vm4853_vm1 }
 0x240   : > { %7371 = vst [vmem:[#allocation19_spill] sm:$0xff] %v5091_v59  ;;  %v5143_v15 = vmul.f32 %v7397_v38, %v7396_v58  ;;  %v7411_v5 = vand.u32 2147483647, %v7410_v47  ;;  %v7412_v58 = vld [vmem:[#allocation45_spill] sm:$0xff]  ;;  %v7415_v39 = vand.u32 2147483647, %v7414_v36  ;;  %vm1091_vm1 = vmand %vm911_vm8, %vm4888_vm15 }
 0x241   : > { %7374 = vst [vmem:[#allocation90_spill] sm:$0xff] %v5096_v21  ;;  %v5164_v13 = vmul.f32 %v7408_v30, %v7407_v32  ;;  %v1207_v17 = vsel %vm5102_vm0, 11.0, %v2226_v9  ;;  %v7421_v48 = vld [vmem:[#allocation77_spill] sm:$0xff]  ;;  %v7423_v30 = vld [vmem:[#allocation163_spill] sm:$0xff]  ;;  %v7430_v26 = vand.u32 2147483647, %v7429_v0  ;;  %vm1092_vm8 = vmand %vm912_vm9, %vm4923_vm7 }
 0x242   : > { %7381 = vst [vmem:[#allocation83_spill] sm:$0xff] %v5112_v2  ;;  %v5169_v38 = vmul.f32 %v7412_v58, %v7411_v5  ;;  %v5174_v40 = vmul.f32 %v7416_v42, %v7415_v39  ;;  %v7422_v32 = vand.u32 2147483647, %v7421_v48  ;;  %v7425_v5 = vld [vmem:[#allocation78_spill] sm:$0xff]  ;;  %v7427_v36 = vld [vmem:[#allocation141_spill] sm:$0xff]  ;;  %v7431_v42 = vld [vmem:[#allocation103_spill] sm:$0xff] }
 0x243   : > { %7384 = vst [vmem:[#allocation96_spill] sm:$0xff] %v5117_v10  ;;  %v7426_v58 = vand.u32 2147483647, %v7425_v5  ;;  %v1208_v53 = vsel %vm5128_vm6, 11.0, %v2226_v9  ;;  %v7433_v48 = vld [vmem:[#allocation80_spill] sm:$0xff]  ;;  %v1209_v6 = vsel %vm5154_vm3, 11.0, %v2226_v9  ;;  %vm1093_vm15 = vmand %vm913_vm10, %vm4958_vm5 }
 0x244   : > { %7387 = vst [vmem:[#allocation88_spill] sm:$0xff] %v5122_v41  ;;  %v5190_v47 = vmul.f32 %v7423_v30, %v7422_v32  ;;  %v7434_v32 = vand.u32 2147483647, %v7433_v48  ;;  %v7435_v30 = vld [vmem:[#allocation59_spill] sm:$0xff]  ;;  %v7439_v0 = vld [vmem:[#allocation104_spill] sm:$0xff] }
 0x245   : > { %7394 = vst [vmem:[#allocation117_spill] sm:$0xff] %v5138_v50  ;;  %v5195_v39 = vmul.f32 %v7427_v36, %v7426_v58  ;;  %v7437_v58 = vld [vmem:[#allocation85_spill] sm:$0xff]  ;;  %v7446_v48 = vand.u32 2147483647, %v7445_v12  ;;  %v7455_v27 = vand.u32 2147483647, %v7454_v23 }
 0x246   : > { %7398 = vst [vmem:[#allocation31_spill] sm:$0xff] %v5143_v15  ;;  %v5212_v5 = vmul.f32 %v7435_v30, %v7434_v32  ;;  %v7438_v36 = vand.u32 2147483647, %v7437_v58  ;;  %v7448_v30 = vld [vmem:[#allocation91_spill] sm:$0xff] }
 0x247   : > { %7402 = vst [vmem:[#allocation27_spill] sm:$0xff] %v5148_v8  ;;  %v5234_v32 = vmul.f32 %v4838_v7, %v7446_v48  ;;  %v7449_v58 = vand.u32 2147483647, %v7448_v30  ;;  %v1210_v7 = vsel %vm5180_vm11, 11.0, %v2226_v9  ;;  %v7461_v48 = vld [vmem:[#allocation105_spill] sm:$0xff]  ;;  %v1211_v30 = vsel %vm1091_vm1, 11.0, %v2226_v9 }
 0x248   : > { %7409 = vst [vmem:[#allocation113_spill] sm:$0xff] %v5164_v13  ;;  %v7462_v4 = vand.u32 2147483647, %v7461_v48  ;;  %v7474_v48 = vld [vmem:[#allocation116_spill] sm:$0xff] }
 0x249   : > { %7413 = vst [vmem:[#allocation167_spill] sm:$0xff] %v5169_v38 }
 0x24a   : > { %7417 = vst [vmem:[#allocation149_spill] sm:$0xff] %v5174_v40  ;;  %v5200_v40 = vmul.f32 %v7431_v42, %v7430_v26  ;;  %v7441_v26 = vld [vmem:[#allocation86_spill] sm:$0xff]  ;;  %v5266_v16 = vmul.f32 %v4878_v63, %v7462_v4  ;;  %v1212_v63 = vsel %vm1092_vm8, 11.0, %v2226_v9  ;;  %v7475_v4 = vand.u32 2147483647, %v7474_v48 }
 0x24b   : > { %7424 = vst [vmem:[#allocation69_spill] sm:$0xff] %v5190_v47  ;;  %v7442_v42 = vand.u32 2147483647, %v7441_v26  ;;  %v7488_v48 = vld [vmem:[#allocation122_spill] sm:$0xff] }
 0x24c   : > { %7428 = vst [vmem:[#allocation125_spill] sm:$0xff] %v5195_v39  ;;  %v5217_v39 = vmul.f32 %v7439_v0, %v7438_v36  ;;  %v5239_v36 = vmul.f32 %v4843_v44, %v7449_v58  ;;  %v7451_v0 = vld [vmem:[#allocation98_spill] sm:$0xff]  ;;  %v7465_v58 = vand.u32 2147483647, %v7464_v31  ;;  %v7477_v31 = vld [vmem:[#allocation119_spill] sm:$0xff] }
 0x24d   : > { %7432 = vst [vmem:[#allocation18_spill] sm:$0xff] %v5200_v40  ;;  %v5222_v40 = vmul.f32 %v7443_v24, %v7442_v42  ;;  %v7452_v26 = vand.u32 2147483647, %v7451_v0  ;;  %v7456_v42 = vld [vmem:[#allocation106_spill] sm:$0xff]  ;;  %v7458_v24 = vld [vmem:[#allocation100_spill] sm:$0xff] }
 0x24e   : > { %7436 = vst [vmem:[#allocation131_spill] sm:$0xff] %v5212_v5  ;;  %v5256_v44 = vmul.f32 %v7456_v42, %v7455_v27  ;;  %v7459_v12 = vand.u32 2147483647, %v7458_v24  ;;  %v5272_v0 = vmul.f32 %v4883_v11, %v7465_v58  ;;  %v7469_v27 = vld [vmem:[#allocation164_spill] sm:$0xff]  ;;  %v7478_v11 = vand.u32 2147483647, %v7477_v31 }
 0x24f   : > { %7440 = vst [vmem:[#allocation76_spill] sm:$0xff] %v5217_v39  ;;  %v5244_v34 = vmul.f32 %v4848_v33, %v7452_v26  ;;  %v7467_v26 = vld [vmem:[#allocation111_spill] sm:$0xff]  ;;  %v7471_v24 = vld [vmem:[#allocation112_spill] sm:$0xff]  ;;  %v7479_v58 = vld [vmem:[#allocation142_spill] sm:$0xff] }
 0x250   : > { %7444 = vst [vmem:[#allocation133_spill] sm:$0xff] %v5222_v40  ;;  %v5261_v33 = vmul.f32 %v4873_v55, %v7459_v12  ;;  %v7468_v23 = vand.u32 2147483647, %v7467_v26  ;;  %v7472_v55 = vand.u32 2147483647, %v7471_v24  ;;  %v7481_v26 = vld [vmem:[#allocation120_spill] sm:$0xff] }
 0x251   : > { %7447 = vst [vmem:[#allocation22_spill] sm:$0xff] %v5234_v32  ;;  %v7485_v24 = vld [vmem:[#allocation121_spill] sm:$0xff]  ;;  %v7492_v31 = vld [vmem:[#allocation127_spill] sm:$0xff] }
 0x252   : > { %7450 = vst [vmem:[#allocation40_spill] sm:$0xff] %v5239_v36  ;;  %v5277_v42 = vmul.f32 %v7469_v27, %v7468_v23  ;;  %v5282_v12 = vmul.f32 %v4908_v45, %v7472_v55  ;;  %v7482_v23 = vand.u32 2147483647, %v7481_v26  ;;  %v7483_v27 = vld [vmem:[#allocation107_spill] sm:$0xff]  ;;  %v1213_v45 = vsel %vm1093_vm15, 11.0, %v2226_v9  ;;  %v7495_v26 = vld [vmem:[#allocation128_spill] sm:$0xff] }
 0x253   : > { %7453 = vst [vmem:[#allocation114_spill] sm:$0xff] %v5244_v34  ;;  %v7486_v55 = vand.u32 2147483647, %v7485_v24 }
 0x254   : > { %7457 = vst [vmem:[#allocation168_spill] sm:$0xff] %v5256_v44 }
 0x255   : > { %7460 = vst [vmem:[#allocation158_spill] sm:$0xff] %v5261_v33 }
 0x256   : > { %7463 = vst [vmem:[#allocation54_spill] sm:$0xff] %v5266_v16  ;;  %v5288_v16 = vmul.f32 %v4913_v25, %v7475_v4  ;;  %v7489_v25 = vand.u32 2147483647, %v7488_v48  ;;  %v7490_v4 = vld [vmem:[#allocation75_spill] sm:$0xff] }
 0x257   : > { %7466 = vst [vmem:[#allocation24_spill] sm:$0xff] %v5272_v0  ;;  %v5293_v0 = vmul.f32 %v7479_v58, %v7478_v11  ;;  %v7493_v11 = vand.u32 2147483647, %v7492_v31 }
 0x258   : > { %7470 = vst [vmem:[#allocation46_spill] sm:$0xff] %v5277_v42  ;;  %v5298_v42 = vmul.f32 %v7483_v27, %v7482_v23  ;;  %v7496_v23 = vand.u32 2147483647, %v7495_v26  ;;  %v7498_v27 = vld [vmem:[#allocation129_spill] sm:$0xff]  ;;  %v7508_v26 = vld [vmem:[#allocation136_spill] sm:$0xff] }
 0x259   : > { %7473 = vst [vmem:[#allocation97_spill] sm:$0xff] %v5282_v12  ;;  %v5304_v12 = vmul.f32 %v4943_v22, %v7486_v55  ;;  %v5314_v58 = vmul.f32 %v4973_v14, %v7493_v11  ;;  %v7499_v24 = vand.u32 2147483647, %v7498_v27  ;;  %v7501_v55 = vld [vmem:[#allocation130_spill] sm:$0xff]  ;;  %v7505_v14 = vld [vmem:[#allocation135_spill] sm:$0xff] }
 0x25a   : > { %7476 = vst [vmem:[#allocation147_spill] sm:$0xff] %v5288_v16  ;;  %v5309_v16 = vmul.f32 %v7490_v4, %v7489_v25  ;;  %v5320_v9 = vmul.f32 %v5001_v29, %v7496_v23  ;;  %v7502_v48 = vand.u32 2147483647, %v7501_v55  ;;  %v7504_v4 = vlaneseq  ;;  %v7511_v23 = vld [vmem:[#allocation137_spill] sm:$0xff] }
 0x25b   : > { %7480 = vst [vmem:[#allocation89_spill] sm:$0xff] %v5293_v0  ;;  %v5325_v22 = vmul.f32 %v5029_v62, %v7499_v24  ;;  %v7506_v11 = vand.u32 2147483647, %v7505_v14  ;;  %v7512_v27 = vand.u32 2147483647, %v7511_v23  ;;  %v7514_v62 = vld [vmem:[#allocation138_spill] sm:$0xff] }
 0x25c   : > { %7484 = vst [vmem:[#allocation53_spill] sm:$0xff] %v5298_v42  ;;  %v5329_v25 = vmul.f32 %v1202_v60, %v7502_v48  ;;  %v5332_v31 = vshrl.u32 %v7504_v4, 7  ;;  %v7515_v24 = vand.u32 2147483647, %v7514_v62  ;;  %v7517_v60 = vld [vmem:[#allocation143_spill] sm:$0xff] }
 0x25d   : > { %7487 = vst [vmem:[#allocation159_spill] sm:$0xff] %v5304_v12  ;;  %v7518_v48 = vand.u32 2147483647, %v7517_v60 }
 0x25e   : > { %7491 = vst [vmem:[#allocation170_spill] sm:$0xff] %v5309_v16  ;;  %v7509_v16 = vand.u32 2147483647, %v7508_v26  ;;  %v5348_v55 = vmul.f32 %v1206_v37, %v7515_v24  ;;  %v7532_v24 = vld [vmem:[#allocation152_spill] sm:$0xff]  ;;  %v1306_v12 = vadd.s32 224, %v5332_v31  ;;  %v1307_v42 = vadd.s32 232, %v5332_v31 }
 0x25f   : > { %7494 = vst [vmem:[#allocation115_spill] sm:$0xff] %v5314_v58  ;;  %v5336_v58 = vmul.f32 %v1203_v1, %v7506_v11  ;;  %v5352_v4 = vmul.f32 %v1207_v17, %v7518_v48  ;;  %v7523_v11 = vld [vmem:[#allocation145_spill] sm:$0xff]  ;;  %v7533_v60 = vand.u32 2147483647, %v7532_v24  ;;  %v1290_v24 = vadd.s32 96, %v5332_v31 }
 0x260   : > { %7497 = vst [vmem:[#allocation169_spill] sm:$0xff] %v5320_v9  ;;  %v5340_v29 = vmul.f32 %v1204_v28, %v7509_v16  ;;  %v5344_v9 = vmul.f32 %v1205_v57, %v7512_v27  ;;  %v7524_v26 = vand.u32 2147483647, %v7523_v11  ;;  %v7526_v16 = vld [vmem:[#allocation146_spill] sm:$0xff]  ;;  %v7529_v27 = vld [vmem:[#allocation151_spill] sm:$0xff]  ;;  %v7535_v48 = vld [vmem:[#allocation153_spill] sm:$0xff] }
 0x261   : > { %7500 = vst [vmem:[#allocation70_spill] sm:$0xff] %v5325_v22  ;;  %v7527_v23 = vand.u32 2147483647, %v7526_v16  ;;  %v7530_v62 = vand.u32 2147483647, %v7529_v27  ;;  %v5372_v17 = vmul.f32 %v1212_v63, %v7533_v60  ;;  %v1280_v11 = vadd.s32 16, %v5332_v31 }
 0x262   : > { %7503 = vst [vmem:[#allocation150_spill] sm:$0xff] %v5329_v25  ;;  %v7520_v25 = vld [vmem:[#allocation144_spill] sm:$0xff]  ;;  %v5360_v28 = vmul.f32 %v1209_v6, %v7524_v26  ;;  %v1279_v6 = vadd.s32 8, %v5332_v31  ;;  %v1282_v26 = vadd.s32 32, %v5332_v31  ;;  %v1284_v16 = vadd.s32 48, %v5332_v31 }
 0x263   : > { %7507 = vst [vmem:[#allocation26_spill] sm:$0xff] %v5336_v58  ;;  %v7521_v14 = vand.u32 2147483647, %v7520_v25  ;;  %v5364_v57 = vmul.f32 %v1210_v7, %v7527_v23  ;;  %v5368_v37 = vmul.f32 %v1211_v30, %v7530_v62  ;;  %v7536_v25 = vand.u32 2147483647, %v7535_v48 }
 0x264   : > { %7510 = vst [vmem:[#allocation154_spill] sm:$0xff] %v5340_v29  ;;  %v1281_v7 = vadd.s32 24, %v5332_v31  ;;  %v1283_v30 = vadd.s32 40, %v5332_v31  ;;  %v1285_v63 = vadd.s32 56, %v5332_v31  ;;  %v1286_v23 = vadd.s32 64, %v5332_v31 }
 0x265   : > { %7513 = vst [vmem:[#allocation17_spill] sm:$0xff] %v5344_v9  ;;  %v5356_v1 = vmul.f32 %v1208_v53, %v7521_v14  ;;  %v5376_v53 = vmul.f32 %v1213_v45, %v7536_v25  ;;  %v5378_v14 = vstv %s1276_s26  ;;  %v1287_v45 = vadd.s32 72, %v5332_v31 }
 0x266   : > { %7516 = vst [vmem:[#allocation171_spill] sm:$0xff] %v5348_v55  ;;  %v1288_v27 = vadd.s32 80, %v5332_v31  ;;  %v1289_v62 = vadd.s32 88, %v5332_v31  ;;  %v1291_v60 = vadd.s32 104, %v5332_v31  ;;  %v1292_v48 = vadd.s32 112, %v5332_v31 }
 0x267   : > { %7519 = vst [vmem:[#allocation84_spill] sm:$0xff] %v5352_v4  ;;  %v1293_v25 = vadd.s32 120, %v5332_v31  ;;  %v1300_v4 = vadd.s32 176, %v5332_v31  ;;  %v1301_v55 = vadd.s32 184, %v5332_v31  ;;  %v1302_v9 = vadd.s32 192, %v5332_v31 }
 0x268   : > { %7522 = vst [vmem:[#allocation172_spill] sm:$0xff] %v5356_v1  ;;  %v1299_v1 = vadd.s32 168, %v5332_v31  ;;  %v1303_v29 = vadd.s32 200, %v5332_v31  ;;  %v1304_v58 = vadd.s32 208, %v5332_v31  ;;  %v1305_v22 = vadd.s32 216, %v5332_v31 }
 0x269   : > { %7525 = vst [vmem:[#allocation25_spill] sm:$0xff] %v5360_v28  ;;  %v1298_v28 = vadd.s32 160, %v5332_v31  ;;  %v1308_v0 = vadd.s32 240, %v5332_v31  ;;  %v1309_v33 = vadd.s32 248, %v5332_v31  ;;  %v1310_v44 = vadd.s32 256, %v5332_v31 }
 0x26a   : > { %7528 = vst [vmem:[#allocation173_spill] sm:$0xff] %v5364_v57  ;;  %v1297_v57 = vadd.s32 152, %v5332_v31  ;;  %v1311_v34 = vadd.s32 264, %v5332_v31  ;;  %v1312_v36 = vadd.s32 272, %v5332_v31  ;;  %v1313_v32 = vadd.s32 280, %v5332_v31 }
 0x26b   : > { %7531 = vst [vmem:[#allocation174_spill] sm:$0xff] %v5368_v37  ;;  %v1296_v37 = vadd.s32 144, %v5332_v31  ;;  %v1314_v40 = vadd.s32 288, %v5332_v31  ;;  %v1315_v39 = vadd.s32 296, %v5332_v31  ;;  %v1316_v5 = vadd.s32 304, %v5332_v31 }
 0x26c   : > { %7534 = vst [vmem:[#allocation175_spill] sm:$0xff] %v5372_v17  ;;  %v1295_v17 = vadd.s32 136, %v5332_v31  ;;  %v1317_v47 = vadd.s32 312, %v5332_v31  ;;  %v1318_v38 = vadd.s32 320, %v5332_v31  ;;  %v1319_v13 = vadd.s32 328, %v5332_v31 }
 0x26d   : > { %7537 = vst [vmem:[#allocation176_spill] sm:$0xff] %v5376_v53  ;;  %v1294_v53 = vadd.s32 128, %v5332_v31  ;;  %v1320_v8 = vadd.s32 336, %v5332_v31  ;;  %v1321_v15 = vadd.s32 344, %v5332_v31  ;;  %v1322_v50 = vadd.s32 352, %v5332_v31 }
 0x26e   : > { %v1323_v41 = vadd.s32 360, %v5332_v31  ;;  %v1324_v10 = vadd.s32 368, %v5332_v31  ;;  %v1325_v2 = vadd.s32 376, %v5332_v31  ;;  %v1326_v21 = vadd.s32 384, %v5332_v31 }
 0x26f   : > { %v1327_v59 = vadd.s32 392, %v5332_v31  ;;  %v1328_v56 = vadd.s32 400, %v5332_v31  ;;  %v1329_v18 = vadd.s32 408, %v5332_v31  ;;  %v1330_v3 = vadd.s32 416, %v5332_v31 }
 0x270   : > { %v1331_v52 = vadd.s32 424, %v5332_v31  ;;  %v1332_v54 = vadd.s32 432, %v5332_v31  ;;  %v1333_v20 = vadd.s32 440, %v5332_v31  ;;  %v1334_v46 = vadd.s32 448, %v5332_v31 }
 0x271   : > { %v1335_v43 = vadd.s32 456, %v5332_v31  ;;  %v1336_v49 = vadd.s32 464, %v5332_v31  ;;  %v1337_v61 = vadd.s32 472, %v5332_v31  ;;  %v5441_v51 = vadd.s32 %v5378_v14, %v5332_v31 }
 0x272   : > { %v5444_v35 = vadd.s32 %v5378_v14, %v1279_v6  ;;  %v5447_v19 = vadd.s32 %v5378_v14, %v1280_v11  ;;  %v5450_v31 = vadd.s32 %v5378_v14, %v1281_v7  ;;  %v5456_v6 = vadd.s32 %v5378_v14, %v1283_v30 }
 0x273   : > { %7538 = vst [vmem:[#allocation155_spill] sm:$0xff] %v5441_v51  ;;  %v5453_v51 = vadd.s32 %v5378_v14, %v1282_v26  ;;  %v5462_v11 = vadd.s32 %v5378_v14, %v1285_v63  ;;  %v5468_v7 = vadd.s32 %v5378_v14, %v1287_v45  ;;  %v5474_v26 = vadd.s32 %v5378_v14, %v1289_v62 }
 0x274   : > { %7539 = vst [vmem:[#allocation39_spill] sm:$0xff] %v5444_v35  ;;  %v5459_v35 = vadd.s32 %v5378_v14, %v1284_v16  ;;  %v5477_v30 = vadd.s32 %v5378_v14, %v1290_v24  ;;  %v5480_v16 = vadd.s32 %v5378_v14, %v1291_v60  ;;  %v5483_v63 = vadd.s32 %v5378_v14, %v1292_v48 }
 0x275   : > { %7540 = vst [vmem:[#allocation118_spill] sm:$0xff] %v5447_v19  ;;  %v5465_v19 = vadd.s32 %v5378_v14, %v1286_v23  ;;  %v5486_v23 = vadd.s32 %v5378_v14, %v1293_v25  ;;  %v5489_v45 = vadd.s32 %v5378_v14, %v1294_v53  ;;  %v5495_v62 = vadd.s32 %v5378_v14, %v1296_v37 }
 0x276   : > { %7541 = vst [vmem:[#allocation177_spill] sm:$0xff] %v5450_v31  ;;  %v5471_v31 = vadd.s32 %v5378_v14, %v1288_v27  ;;  %v5492_v27 = vadd.s32 %v5378_v14, %v1295_v17  ;;  %v5498_v24 = vadd.s32 %v5378_v14, %v1297_v57  ;;  %v5501_v60 = vadd.s32 %v5378_v14, %v1298_v28 }
 0x277   : > { %v5504_v48 = vadd.s32 %v5378_v14, %v1299_v1  ;;  %v5507_v25 = vadd.s32 %v5378_v14, %v1300_v4  ;;  %v5510_v53 = vadd.s32 %v5378_v14, %v1301_v55  ;;  %v5513_v17 = vadd.s32 %v5378_v14, %v1302_v9 }
 0x278   : > { %v5516_v37 = vadd.s32 %v5378_v14, %v1303_v29  ;;  %v5519_v57 = vadd.s32 %v5378_v14, %v1304_v58  ;;  %v5522_v28 = vadd.s32 %v5378_v14, %v1305_v22  ;;  %v5525_v1 = vadd.s32 %v5378_v14, %v1306_v12 }
 0x279   : > { %v5528_v4 = vadd.s32 %v5378_v14, %v1307_v42  ;;  %v5531_v55 = vadd.s32 %v5378_v14, %v1308_v0  ;;  %v5534_v9 = vadd.s32 %v5378_v14, %v1309_v33  ;;  %v5537_v29 = vadd.s32 %v5378_v14, %v1310_v44 }
 0x27a   : > { %v5540_v58 = vadd.s32 %v5378_v14, %v1311_v34  ;;  %v5543_v22 = vadd.s32 %v5378_v14, %v1312_v36  ;;  %v5546_v12 = vadd.s32 %v5378_v14, %v1313_v32  ;;  %v5549_v42 = vadd.s32 %v5378_v14, %v1314_v40 }
 0x27b   : > { %v5552_v0 = vadd.s32 %v5378_v14, %v1315_v39  ;;  %v5555_v33 = vadd.s32 %v5378_v14, %v1316_v5  ;;  %v5558_v44 = vadd.s32 %v5378_v14, %v1317_v47  ;;  %v5561_v34 = vadd.s32 %v5378_v14, %v1318_v38 }
 0x27c   : > { %7542 = vst [vmem:[#allocation28_spill] sm:$0xff] %v5546_v12  ;;  %v5564_v36 = vadd.s32 %v5378_v14, %v1319_v13  ;;  %v5567_v32 = vadd.s32 %v5378_v14, %v1320_v8  ;;  %v5570_v40 = vadd.s32 %v5378_v14, %v1321_v15  ;;  %v5573_v39 = vadd.s32 %v5378_v14, %v1322_v50 }
 0x27d   : > { %v5576_v5 = vadd.s32 %v5378_v14, %v1323_v41  ;;  %v5579_v47 = vadd.s32 %v5378_v14, %v1324_v10  ;;  %v5582_v38 = vadd.s32 %v5378_v14, %v1325_v2  ;;  %v5585_v13 = vadd.s32 %v5378_v14, %v1326_v21 }
 0x27e   : > { %v5588_v8 = vadd.s32 %v5378_v14, %v1327_v59  ;;  %v5591_v15 = vadd.s32 %v5378_v14, %v1328_v56  ;;  %v5594_v50 = vadd.s32 %v5378_v14, %v1329_v18  ;;  %v5597_v41 = vadd.s32 %v5378_v14, %v1330_v3 }
 0x27f   : > { %v5600_v10 = vadd.s32 %v5378_v14, %v1331_v52  ;;  %v5603_v2 = vadd.s32 %v5378_v14, %v1332_v54  ;;  %v5606_v21 = vadd.s32 %v5378_v14, %v1333_v20  ;;  %v5609_v59 = vadd.s32 %v5378_v14, %v1334_v46  ;;  %v7549_v52 = vld [vmem:[#allocation155_spill] sm:$0xff]  ;;  %v7551_v54 = vld [vmem:[#allocation118_spill] sm:$0xff]  ;;  %v7552_v20 = vld [vmem:[#allocation177_spill] sm:$0xff] }
 0x280   : > { %v5612_v56 = vadd.s32 %v5378_v14, %v1335_v43  ;;  %v5615_v18 = vadd.s32 %v5378_v14, %v1336_v49  ;;  %v5618_v3 = vadd.s32 %v5378_v14, %v1337_v61  ;;  %vm1399_vm9 = vcmp.lt.s32.totalorder %v7549_v52, 1350  ;;  %v7553_v61 = vld [vmem:[#allocation108_spill] sm:$0xff]  ;;  %v7554_v43 = vld [vmem:[#allocation165_spill] sm:$0xff]  ;;  %v7558_v52 = vld [vmem:[#allocation62_spill] sm:$0xff] }
 0x281   : > { %7543 = vst [vmem:[#allocation157_spill] sm:$0xff] %v5600_v10  ;;  %v7550_v10 = vld [vmem:[#allocation39_spill] sm:$0xff]  ;;  %vm1401_vm10 = vcmp.lt.s32.totalorder %v7551_v54, 1350  ;;  %vm1402_vm5 = vcmp.lt.s32.totalorder %v7552_v20, 1350  ;;  %vm1403_vm14 = vcmp.lt.s32.totalorder %v5453_v51, 1350  ;;  %vm1404_vm12 = vcmp.lt.s32.totalorder %v5456_v6, 1350 }
 0x282   : > { %7544 = vst [vmem:[#allocation93_spill] sm:$0xff] %v5606_v21  ;;  %vm1400_vm7 = vcmp.lt.s32.totalorder %v7550_v10, 1350  ;;  %vm1417_vm4 = vcmp.lt.s32.totalorder %v5495_v62, 1350  ;;  %vm1418_vm6 = vcmp.lt.s32.totalorder %v5498_v24, 1350  ;;  %vm1419_vm3 = vcmp.lt.s32.totalorder %v5501_v60, 1350  ;;  %v7555_v14 = vld [vmem:[#allocation52_spill] sm:$0xff] }
 0x283   : > { %7545 = vst [vmem:[#allocation160_spill] sm:$0xff] %v5609_v59  ;;  %vm1420_vm2 = vcmp.lt.s32.totalorder %v5504_v48, 1350  ;;  %vm1421_vm11 = vcmp.lt.s32.totalorder %v5507_v25, 1350  ;;  %vm1422_vm1 = vcmp.lt.s32.totalorder %v5510_v53, 1350  ;;  %vm1423_vm8 = vcmp.lt.s32.totalorder %v5513_v17, 1350  ;;  %v7557_v59 = vld [vmem:[#allocation15_spill] sm:$0xff] }
 0x284   : > { %7546 = vst [vmem:[#allocation29_spill] sm:$0xff] %v5612_v56  ;;  %vm1424_vm15 = vcmp.lt.s32.totalorder %v5516_v37, 1350  ;;  %v1579_v49 = vsel %vm1399_vm9, %v7553_v61, 0.0  ;;  %v1580_v46 = vsel %vm1400_vm7, %v7554_v43, 0.0  ;;  %v1582_v21 = vsel %vm1402_vm5, %v7557_v59, 0.0  ;;  %v7559_v10 = vld [vmem:[#allocation82_spill] sm:$0xff] }
 0x285   : > { %7547 = vst [vmem:[#allocation126_spill] sm:$0xff] %v5615_v18  ;;  %v7556_v18 = vld [vmem:[#allocation20_spill] sm:$0xff]  ;;  %v1584_v61 = vsel %vm1404_vm12, %v7558_v52, 0.0  ;;  %vm7560_vm9 = vcmp.lt.s32.totalorder %v5459_v35, 1350  ;;  %vm7562_vm7 = vcmp.lt.s32.totalorder %v5462_v11, 1350  ;;  %v7563_v51 = vld [vmem:[#allocation21_spill] sm:$0xff] }
 0x286   : > { %7548 = vst [vmem:[#allocation123_spill] sm:$0xff] %v5618_v3  ;;  %v1581_v3 = vsel %vm1401_vm10, %v7555_v14, 0.0  ;;  %v1583_v56 = vsel %vm1403_vm14, %v7556_v18, 0.0  ;;  %v1585_v43 = vsel %vm7560_vm9, %v7559_v10, 0.0  ;;  %v7561_v54 = vld [vmem:[#allocation16_spill] sm:$0xff]  ;;  %vm1428_vm10 = vcmp.lt.s32.totalorder %v5528_v4, 1350 }
 0x287   : > { %v1586_v14 = vsel %vm7562_vm7, %v7561_v54, 0.0  ;;  %vm7564_vm5 = vcmp.lt.s32.totalorder %v5465_v19, 1350  ;;  %v7565_v6 = vld [vmem:[#allocation68_spill] sm:$0xff]  ;;  %vm7566_vm13 = vcmp.lt.s32.totalorder %v5468_v7, 1350  ;;  %v7567_v18 = vld [vmem:[#allocation23_spill] sm:$0xff]  ;;  %vm7568_vm9 = vcmp.lt.s32.totalorder %v5471_v31, 1350 }
 0x288   : > { %v1587_v59 = vsel %vm7564_vm5, %v7563_v51, 0.0  ;;  %v1588_v35 = vsel %vm7566_vm13, %v7565_v6, 0.0  ;;  %v1589_v11 = vsel %vm7568_vm9, %v7567_v18, 0.0  ;;  %v7569_v20 = vld [vmem:[#allocation109_spill] sm:$0xff]  ;;  %vm7570_vm7 = vcmp.lt.s32.totalorder %v5474_v26, 1350  ;;  %v7571_v19 = vld [vmem:[#allocation166_spill] sm:$0xff] }
 0x289   : > { %v1590_v52 = vsel %vm7570_vm7, %v7569_v20, 0.0  ;;  %v1643_v10 = vadd.f32 %v1583_v56, %v1579_v49  ;;  %vm7572_vm12 = vcmp.lt.s32.totalorder %v5477_v30, 1350  ;;  %v1657_v54 = vadd.f32 %v1584_v61, %v1580_v46  ;;  %v7573_v31 = vld [vmem:[#allocation148_spill] sm:$0xff]  ;;  %v7575_v56 = vld [vmem:[#allocation19_spill] sm:$0xff]  ;;  %v7577_v18 = vld [vmem:[#allocation90_spill] sm:$0xff] }
 0x28a   : > { %v1591_v7 = vsel %vm7572_vm12, %v7571_v19, 0.0  ;;  %v1671_v51 = vadd.f32 %v1585_v43, %v1581_v3  ;;  %v1685_v6 = vadd.f32 %v1586_v14, %v1582_v21  ;;  %vm7574_vm9 = vcmp.lt.s32.totalorder %v5480_v16, 1350  ;;  %v7579_v30 = vld [vmem:[#allocation83_spill] sm:$0xff]  ;;  %v7583_v61 = vld [vmem:[#allocation88_spill] sm:$0xff]  ;;  %v7584_v14 = vld [vmem:[#allocation117_spill] sm:$0xff] }
 0x28b   : > { %v1592_v26 = vsel %vm7574_vm9, %v7573_v31, 0.0  ;;  %vm7576_vm7 = vcmp.lt.s32.totalorder %v5483_v63, 1350  ;;  %vm7578_vm5 = vcmp.lt.s32.totalorder %v5486_v23, 1350  ;;  %v1644_v12 = vadd.f32 %v1643_v10, %v1587_v59  ;;  %v7581_v63 = vld [vmem:[#allocation96_spill] sm:$0xff]  ;;  %v7586_v62 = vld [vmem:[#allocation27_spill] sm:$0xff]  ;;  %v7589_v60 = vld [vmem:[#allocation149_spill] sm:$0xff] }
 0x28c   : > { %v1593_v49 = vsel %vm7576_vm7, %v7575_v56, 0.0  ;;  %v1594_v20 = vsel %vm7578_vm5, %v7577_v18, 0.0  ;;  %vm1436_vm12 = vcmp.lt.s32.totalorder %v5552_v0, 1350  ;;  %vm1437_vm14 = vcmp.lt.s32.totalorder %v5555_v33, 1350  ;;  %v7590_v25 = vld [vmem:[#allocation69_spill] sm:$0xff]  ;;  %v7593_v18 = vld [vmem:[#allocation18_spill] sm:$0xff] }
 0x28d   : > { %vm7580_vm13 = vcmp.lt.s32.totalorder %v5489_v45, 1350  ;;  %v1658_v21 = vadd.f32 %v1657_v54, %v1588_v35  ;;  %v1672_v3 = vadd.f32 %v1671_v51, %v1589_v11  ;;  %v1686_v46 = vadd.f32 %v1685_v6, %v1590_v52  ;;  %v7585_v45 = vld [vmem:[#allocation31_spill] sm:$0xff]  ;;  %v7591_v56 = vld [vmem:[#allocation125_spill] sm:$0xff] }
 0x28e   : > { %v1595_v16 = vsel %vm7580_vm13, %v7579_v30, 0.0  ;;  %vm1439_vm9 = vcmp.lt.s32.totalorder %v5561_v34, 1350  ;;  %vm7582_vm7 = vcmp.lt.s32.totalorder %v5492_v27, 1350  ;;  %v1597_v43 = vsel %vm1417_vm4, %v7583_v61, 0.0  ;;  %v7595_v17 = vld [vmem:[#allocation131_spill] sm:$0xff] }
 0x28f   : > { %v1596_v23 = vsel %vm7582_vm7, %v7581_v63, 0.0  ;;  %v1598_v59 = vsel %vm1418_vm6, %v7584_v14, 0.0  ;;  %v1645_v10 = vadd.f32 %v1644_v12, %v1591_v7  ;;  %vm1440_vm5 = vcmp.lt.s32.totalorder %v5564_v36, 1350  ;;  %v7587_v12 = vld [vmem:[#allocation113_spill] sm:$0xff]  ;;  %v7588_v7 = vld [vmem:[#allocation167_spill] sm:$0xff] }
 0x290   : > { %vm1441_vm13 = vcmp.lt.s32.totalorder %v5567_v32, 1350  ;;  %vm1442_vm0 = vcmp.lt.s32.totalorder %v5570_v40, 1350  ;;  %v1599_v27 = vsel %vm1419_vm3, %v7585_v45, 0.0  ;;  %v1659_v35 = vadd.f32 %v1658_v21, %v1592_v26  ;;  %v7603_v14 = vld [vmem:[#allocation93_spill] sm:$0xff] }
 0x291   : > { %v1673_v11 = vadd.f32 %v1672_v3, %v1593_v49  ;;  %v1687_v52 = vadd.f32 %v1686_v46, %v1594_v20  ;;  %vm1443_vm4 = vcmp.lt.s32.totalorder %v5573_v39, 1350  ;;  %v1600_v24 = vsel %vm1420_vm2, %v7586_v62, 0.0  ;;  %v7598_v46 = vld [vmem:[#allocation133_spill] sm:$0xff]  ;;  %v7611_v62 = vld [vmem:[#allocation158_spill] sm:$0xff] }
 0x292   : > { %v1601_v19 = vsel %vm1421_vm11, %v7587_v12, 0.0  ;;  %v1602_v54 = vsel %vm1422_vm1, %v7588_v7, 0.0  ;;  %v1646_v51 = vadd.f32 %v1645_v10, %v1595_v16  ;;  %vm1444_vm6 = vcmp.lt.s32.totalorder %v5576_v5, 1350  ;;  %v7615_v7 = vld [vmem:[#allocation126_spill] sm:$0xff] }
 0x293   : > { %v1603_v48 = vsel %vm1423_vm8, %v7589_v60, 0.0  ;;  %v1660_v6 = vadd.f32 %v1659_v35, %v1596_v23  ;;  %v1674_v31 = vadd.f32 %v1673_v11, %v1597_v43  ;;  %v1688_v26 = vadd.f32 %v1687_v52, %v1598_v59  ;;  %v7600_v23 = vld [vmem:[#allocation22_spill] sm:$0xff]  ;;  %v7604_v59 = vld [vmem:[#allocation40_spill] sm:$0xff] }
 0x294   : > { %v1604_v53 = vsel %vm1424_vm15, %v7590_v25, 0.0  ;;  %vm7592_vm11 = vcmp.lt.s32.totalorder %v5519_v57, 1350  ;;  %vm7594_vm1 = vcmp.lt.s32.totalorder %v5522_v28, 1350  ;;  %v1647_v30 = vadd.f32 %v1646_v51, %v1599_v27  ;;  %v7597_v57 = vld [vmem:[#allocation76_spill] sm:$0xff]  ;;  %v7607_v35 = vld [vmem:[#allocation114_spill] sm:$0xff] }
 0x295   : > { %v1605_v49 = vsel %vm7592_vm11, %v7591_v56, 0.0  ;;  %v1606_v20 = vsel %vm7594_vm1, %v7593_v18, 0.0  ;;  %vm1448_vm8 = vcmp.lt.s32.totalorder %v5588_v8, 1350  ;;  %vm7596_vm2 = vcmp.lt.s32.totalorder %v5525_v1, 1350  ;;  %v7602_v1 = vld [vmem:[#allocation157_spill] sm:$0xff]  ;;  %v7609_v11 = vld [vmem:[#allocation168_spill] sm:$0xff] }
 0x296   : > { %v1607_v37 = vsel %vm7596_vm2, %v7595_v17, 0.0  ;;  %v1661_v16 = vadd.f32 %v1660_v6, %v1600_v24  ;;  %v1675_v21 = vadd.f32 %v1674_v31, %v1601_v19  ;;  %v1689_v3 = vadd.f32 %v1688_v26, %v1602_v54  ;;  %v7612_v24 = vld [vmem:[#allocation28_spill] sm:$0xff]  ;;  %v7616_v54 = vld [vmem:[#allocation123_spill] sm:$0xff]  ;;  %v7617_v51 = vld [vmem:[#allocation54_spill] sm:$0xff] }
 0x297   : > { %v1608_v28 = vsel %vm1428_vm10, %v7597_v57, 0.0  ;;  %vm7599_vm11 = vcmp.lt.s32.totalorder %v5531_v55, 1350  ;;  %vm7601_vm1 = vcmp.lt.s32.totalorder %v5534_v9, 1350  ;;  %v1648_v43 = vadd.f32 %v1647_v30, %v1603_v48  ;;  %v7606_v55 = vld [vmem:[#allocation160_spill] sm:$0xff]  ;;  %v7620_v26 = vld [vmem:[#allocation46_spill] sm:$0xff]  ;;  %v7623_v18 = vld [vmem:[#allocation147_spill] sm:$0xff] }
 0x298   : > { %v1609_v63 = vsel %vm7599_vm11, %v7598_v46, 0.0  ;;  %v1610_v61 = vsel %vm7601_vm1, %v7600_v23, 0.0  ;;  %vm7605_vm15 = vcmp.lt.s32.totalorder %v5537_v29, 1350  ;;  %v1662_v10 = vadd.f32 %v1661_v16, %v1604_v53  ;;  %v7614_v29 = vld [vmem:[#allocation29_spill] sm:$0xff]  ;;  %v7627_v57 = vld [vmem:[#allocation170_spill] sm:$0xff]  ;;  %v7628_v23 = vld [vmem:[#allocation115_spill] sm:$0xff] }
 0x299   : > { %v1611_v4 = vsel %vm7605_vm15, %v7604_v59, 0.0  ;;  %v1676_v45 = vadd.f32 %v1675_v21, %v1605_v49  ;;  %v1690_v27 = vadd.f32 %v1689_v3, %v1606_v20  ;;  %vm7608_vm11 = vcmp.lt.s32.totalorder %v5540_v58, 1350  ;;  %v7621_v53 = vld [vmem:[#allocation97_spill] sm:$0xff]  ;;  %v7626_v21 = vld [vmem:[#allocation159_spill] sm:$0xff] }
 0x29a   : > { %v1612_v9 = vsel %vm7608_vm11, %v7607_v35, 0.0  ;;  %vm7610_vm1 = vcmp.lt.s32.totalorder %v5543_v22, 1350  ;;  %vm7613_vm7 = vcmp.lt.s32.totalorder %v7612_v24, 1350  ;;  %v1649_v19 = vadd.f32 %v1648_v43, %v1607_v37  ;;  %v7619_v22 = vld [vmem:[#allocation24_spill] sm:$0xff]  ;;  %v7624_v37 = vld [vmem:[#allocation89_spill] sm:$0xff]  ;;  %v7631_v43 = vld [vmem:[#allocation70_spill] sm:$0xff] }
 0x29b   : > { %v1613_v52 = vsel %vm7610_vm1, %v7609_v11, 0.0  ;;  %v1614_v12 = vsel %vm7613_vm7, %v7611_v62, 0.0  ;;  %vm1456_vm15 = vcmp.lt.s32.totalorder %v7614_v29, 1350  ;;  %vm1457_vm3 = vcmp.lt.s32.totalorder %v7615_v7, 1350  ;;  %v7625_v16 = vld [vmem:[#allocation53_spill] sm:$0xff]  ;;  %v7635_v35 = vld [vmem:[#allocation26_spill] sm:$0xff] }
 0x29c   : > { %vm1458_vm2 = vcmp.lt.s32.totalorder %v7616_v54, 1350  ;;  %vm7618_vm10 = vcmp.lt.s32.totalorder %v5549_v42, 1350  ;;  %v1663_v60 = vadd.f32 %v1662_v10, %v1608_v28  ;;  %v1677_v48 = vadd.f32 %v1676_v45, %v1609_v63  ;;  %v7638_v11 = vld [vmem:[#allocation17_spill] sm:$0xff]  ;;  %v7640_v62 = vld [vmem:[#allocation171_spill] sm:$0xff] }
 0x29d   : > { %v1615_v58 = vsel %vm7618_vm10, %v7617_v51, 0.0  ;;  %v1691_v6 = vadd.f32 %v1690_v27, %v1610_v61  ;;  %v1616_v31 = vsel %vm1436_vm12, %v7619_v22, 0.0  ;;  %v1617_v25 = vsel %vm1437_vm14, %v7620_v26, 0.0  ;;  %v7629_v61 = vld [vmem:[#allocation169_spill] sm:$0xff]  ;;  %v7642_v51 = vld [vmem:[#allocation84_spill] sm:$0xff] }
 0x29e   : > { %vm7622_vm7 = vcmp.lt.s32.totalorder %v5558_v44, 1350  ;;  %v1650_v49 = vadd.f32 %v1649_v19, %v1611_v4  ;;  %v1619_v42 = vsel %vm1439_vm9, %v7623_v18, 0.0  ;;  %v1664_v20 = vadd.f32 %v1663_v60, %v1612_v9  ;;  %v7633_v4 = vld [vmem:[#allocation150_spill] sm:$0xff]  ;;  %v7646_v60 = vld [vmem:[#allocation25_spill] sm:$0xff]  ;;  %v1639_v18 = vld [vmem:[#allocation10] sm:$0xff] }
 0x29f   : > { %v1618_v56 = vsel %vm7622_vm7, %v7621_v53, 0.0  ;;  %v1678_v30 = vadd.f32 %v1677_v48, %v1613_v52  ;;  %v1692_v17 = vadd.f32 %v1691_v6, %v1614_v12  ;;  %v1620_v0 = vsel %vm1440_vm5, %v7624_v37, 0.0  ;;  %v7636_v9 = vld [vmem:[#allocation154_spill] sm:$0xff]  ;;  %v7648_v6 = vld [vmem:[#allocation173_spill] sm:$0xff]  ;;  %v7651_v53 = vld [vmem:[#allocation175_spill] sm:$0xff] }
 0x2a0   : > { %v1621_v33 = vsel %vm1441_vm13, %v7625_v16, 0.0  ;;  %v1622_v44 = vsel %vm1442_vm0, %v7626_v21, 0.0  ;;  %v1651_v3 = vadd.f32 %v1650_v49, %v1615_v58  ;;  %v1623_v34 = vsel %vm1443_vm4, %v7627_v57, 0.0  ;;  %v7644_v58 = vld [vmem:[#allocation172_spill] sm:$0xff]  ;;  %v1642_v37 = vld [vmem:[#allocation10 + $0x18] sm:$0xff] }
 0x2a1   : > { %v1665_v28 = vadd.f32 %v1664_v20, %v1616_v31  ;;  %v1679_v46 = vadd.f32 %v1678_v30, %v1617_v25  ;;  %v1693_v63 = vadd.f32 %v1692_v17, %v1618_v56  ;;  %v1624_v36 = vsel %vm1444_vm6, %v7628_v23, 0.0  ;;  %v7650_v25 = vld [vmem:[#allocation174_spill] sm:$0xff]  ;;  %v7652_v56 = vld [vmem:[#allocation176_spill] sm:$0xff]  ;;  %v1641_v17 = vld [vmem:[#allocation10 + $0x10] sm:$0xff] }
 0x2a2   : > { %vm7630_vm14 = vcmp.lt.s32.totalorder %v5579_v47, 1350  ;;  %vm7632_vm12 = vcmp.lt.s32.totalorder %v5582_v38, 1350  ;;  %v1652_v59 = vadd.f32 %v1651_v3, %v1619_v42  ;;  %vm7634_vm0 = vcmp.lt.s32.totalorder %v5585_v13, 1350  ;;  %v1640_v30 = vld [vmem:[#allocation10 + $0x8] sm:$0xff] }
 0x2a3   : > { %v1625_v32 = vsel %vm7630_vm14, %v7629_v61, 0.0  ;;  %v1626_v40 = vsel %vm7632_vm12, %v7631_v43, 0.0  ;;  %v1627_v39 = vsel %vm7634_vm0, %v7633_v4, 0.0  ;;  %v1666_v10 = vadd.f32 %v1665_v28, %v1620_v0 }
 0x2a4   : > { %v1680_v45 = vadd.f32 %v1679_v46, %v1621_v33  ;;  %v1694_v27 = vadd.f32 %v1693_v63, %v1622_v44  ;;  %v1628_v5 = vsel %vm1448_vm8, %v7635_v35, 0.0  ;;  %vm7637_vm9 = vcmp.lt.s32.totalorder %v5591_v15, 1350 }
 0x2a5   : > { %v1629_v47 = vsel %vm7637_vm9, %v7636_v9, 0.0  ;;  %vm7639_vm5 = vcmp.lt.s32.totalorder %v5594_v50, 1350  ;;  %v1653_v52 = vadd.f32 %v1652_v59, %v1623_v34  ;;  %vm7641_vm13 = vcmp.lt.s32.totalorder %v5597_v41, 1350 }
 0x2a6   : > { %v1630_v38 = vsel %vm7639_vm5, %v7638_v11, 0.0  ;;  %v1631_v13 = vsel %vm7641_vm13, %v7640_v62, 0.0  ;;  %v1667_v24 = vadd.f32 %v1666_v10, %v1624_v36  ;;  %v1681_v12 = vadd.f32 %v1680_v45, %v1625_v32 }
 0x2a7   : > { %v1695_v19 = vadd.f32 %v1694_v27, %v1626_v40  ;;  %vm7643_vm4 = vcmp.lt.s32.totalorder %v7602_v1, 1350  ;;  %vm7645_vm6 = vcmp.lt.s32.totalorder %v5603_v2, 1350  ;;  %vm7647_vm8 = vcmp.lt.s32.totalorder %v7603_v14, 1350 }
 0x2a8   : > { %v1632_v8 = vsel %vm7643_vm4, %v7642_v51, 0.0  ;;  %v1633_v15 = vsel %vm7645_vm6, %v7644_v58, 0.0  ;;  %v1634_v50 = vsel %vm7647_vm8, %v7646_v60, 0.0  ;;  %v1654_v48 = vadd.f32 %v1653_v52, %v1627_v39 }
 0x2a9   : > { %vm7649_vm10 = vcmp.lt.s32.totalorder %v7606_v55, 1350  ;;  %v1668_v22 = vadd.f32 %v1667_v24, %v1628_v5  ;;  %v1682_v31 = vadd.f32 %v1681_v12, %v1629_v47  ;;  %v1696_v26 = vadd.f32 %v1695_v19, %v1630_v38 }
 0x2aa   : > { %v1635_v41 = vsel %vm7649_vm10, %v7648_v6, 0.0  ;;  %v1636_v1 = vsel %vm1456_vm15, %v7650_v25, 0.0  ;;  %v1637_v2 = vsel %vm1457_vm3, %v7651_v53, 0.0  ;;  %v1638_v14 = vsel %vm1458_vm2, %v7652_v56, 0.0 }
 0x2ab   : > { %v1655_v49 = vadd.f32 %v1654_v48, %v1631_v13  ;;  %v1669_v42 = vadd.f32 %v1668_v22, %v1632_v8  ;;  %v1683_v55 = vadd.f32 %v1682_v31, %v1633_v15  ;;  %v1697_v20 = vadd.f32 %v1696_v26, %v1634_v50 }
 0x2ad   : > { %v1656_v0 = vadd.f32 %v1655_v49, %v1635_v41  ;;  %v1670_v29 = vadd.f32 %v1669_v42, %v1636_v1  ;;  %v1684_v16 = vadd.f32 %v1683_v55, %v1637_v2  ;;  %v1698_v33 = vadd.f32 %v1697_v20, %v1638_v14 }
 0x2af   : > { %v1699_v7 = vadd.f32 %v1656_v0, %v1639_v18  ;;  %v1700_v54 = vadd.f32 %v1670_v29, %v1640_v30  ;;  %v1701_v21 = vadd.f32 %v1684_v16, %v1641_v17  ;;  %v1702_v44 = vadd.f32 %v1698_v33, %v1642_v37 }
 0x2b1   : > { %1703 = vst [vmem:[#allocation10] sm:$0xff] %v1699_v7 }
 0x2b2   : > { %1704 = vst [vmem:[#allocation10 + $0x8] sm:$0xff] %v1700_v54 }
 0x2b3   : > { %1705 = vst [vmem:[#allocation10 + $0x10] sm:$0xff] %v1701_v21 }
 0x2b4   : > { %1706 = vst [vmem:[#allocation10 + $0x18] sm:$0xff] %v1702_v44 }
 0x2b5   : > { %1899 = dma.vmem_to_hbm [thread:$0]  (%p1902_p7), %s1716_s25, 512, %s1718_s15, [#allocation4], %s2228_s10, %s2228_s10, %s2229_s5  }
 0x2b6   : > { %2186 = dma.done.wait (%p1902_p7), [#allocation4], 512  }
 0x2b7   : > { %2188 = vsyncadd (%p1902_p7), [#allocation4], 4294966784 }
 0x2b8 PF: > { %s24_s20 = sadd.s32 1, %s2211_s20   ;;  %s7653_s15 = smov %s2195_s16 }
 0x2b9   : > { %p21_p11 = scmp.ge.s32.totalorder %s24_s20, 5   ;;  %s7654_s16 = smov %s2199_s17 }
 0x2ba   : > { %s7655_s17 = smov %s2306_s27  ;;  %s7656_s18 = smov %s2207_s19 }
 0x2bb   : > { %s7657_s19 = smov %s7659_s22  ;;  %23 = sbr.rel (!%p21_p11) target bundleno = 9 (0x9), region = 115 }
 0x2c0   :  { %1734 = vsyncpa [#allocation3], 1 }
 0x2c1   :  { %1736 = vsyncpa [#allocation3 + $0x1], 1 }
 0x2c2   :  { %1737 = vsyncpa [#allocation6], 1 }
 0x2c3   :  { %1739 = vsyncpa [#allocation6 + $0x1], 1 }
 0x2c4   :  { %1740 = vsyncpa [#allocation9], 1 }
 0x2c5   :  { %1742 = vsyncpa [#allocation9 + $0x1], 1 }
 0x2c6   :  { %1743 = vsyncpa [#allocation4], 1 }
 0x2c7   :  { %1745 = vsyncpa [#allocation4 + $0x1], 1 }

</bundles_post_ra>
